<compile_context>
chip_gen: v5e
topology: v5e:2x2
jax: 0.10.0
libtpu: 0.0.40
codegen_flags: <defaults>
</compile_context>

<pallas_src>
import functools

import jax
import jax.numpy as jnp
from jax.experimental import pallas as pl
from jax.experimental.pallas import tpu as pltpu


_LANES = 128            # lane width: fused head projection is padded to this
_TILE_ROW_CAP = 256     # max rows per grid step -> bounds VMEM per block


def _round_up(x, m):
    return (x + m - 1) // m * m


def _row_tile(m):
    """Sublane-aligned row tile bounded by _TILE_ROW_CAP."""
    if m <= _TILE_ROW_CAP:
        return _round_up(m, 8)
    return _TILE_ROW_CAP


def _pad_rows(a, m_pad):
    m = a.shape[0]
    if m_pad == m:
        return a
    return jnp.pad(a, ((0, m_pad - m), (0, 0)))


_COMPILER_PARAMS = pltpu.CompilerParams(
    dimension_semantics=("parallel",),
    vmem_limit_bytes=32 * 1024 * 1024,
)


# ----------------------------------------------------------------------------
# Pallas kernels.
# ----------------------------------------------------------------------------
def _mm_bias_kernel(a_ref, w_ref, b_ref, o_ref, *, apply_relu):
    """Fused (A @ W + b) with optional ReLU; bf16 inputs, f32 accumulate."""
    acc = jnp.dot(a_ref[...], w_ref[...], preferred_element_type=jnp.float32)
    acc = acc + b_ref[...]
    if apply_relu:
        acc = jnp.maximum(acc, 0.0)
    o_ref[...] = acc.astype(o_ref.dtype)


def _fused_head_kernel(p_ref, ws_ref, bs_ref, wp_ref, bp_ref, o_ref):
    """FCOS head: relu(patches @ w_stem + b_stem) @ w_proj + b_proj, all in VMEM."""
    # 3x3 stem (as im2col matmul) + bias + ReLU, f32 accumulation.
    h = jnp.dot(p_ref[...], ws_ref[...], preferred_element_type=jnp.float32)
    h = jnp.maximum(h + bs_ref[...], 0.0)
    # Fused 1x1 cls+reg projection, zero-padded to 128 lanes -> lane-dense store.
    o = jnp.dot(h.astype(wp_ref.dtype), wp_ref[...],
                preferred_element_type=jnp.float32)
    o_ref[...] = (o + bp_ref[...]).astype(o_ref.dtype)


# ----------------------------------------------------------------------------
# Kernel wrappers.
# ----------------------------------------------------------------------------
def matmul_bias(a, w, b, *, apply_relu=False, out_dtype=jnp.float32):
    """a: [M, K] bf16, w: [K, N] bf16, b: [1, N] f32 -> [M, N] out_dtype."""
    M, K = a.shape
    K2, N = w.shape
    assert K == K2, (K, K2)
    tm = _row_tile(M)
    m_pad = _round_up(M, tm)
    a = _pad_rows(a, m_pad)
    cost = pl.CostEstimate(
        flops=2 * m_pad * K * N,
        transcendentals=0,
        bytes_accessed=(m_pad * K * a.dtype.itemsize
                        + K * N * w.dtype.itemsize
                        + N * b.dtype.itemsize
                        + m_pad * N * jnp.dtype(out_dtype).itemsize),
    )
    out = pl.pallas_call(
        functools.partial(_mm_bias_kernel, apply_relu=apply_relu),
        out_shape=jax.ShapeDtypeStruct((m_pad, N), out_dtype),
        grid_spec=pltpu.PrefetchScalarGridSpec(
            num_scalar_prefetch=0,
            grid=(m_pad // tm,),
            in_specs=[
                pl.BlockSpec((tm, K), lambda i: (i, 0)),
                pl.BlockSpec((K, N), lambda i: (0, 0)),   # resident across M grid
                pl.BlockSpec((1, N), lambda i: (0, 0)),   # resident across M grid
            ],
            out_specs=pl.BlockSpec((tm, N), lambda i: (i, 0)),
        ),
        compiler_params=_COMPILER_PARAMS,
        cost_estimate=cost,
    )(a, w, b)
    return out[:M] if m_pad != M else out


def fused_head(patches, w_stem, b_stem, w_proj, b_proj):
    """One pallas_call per head.

    patches: [M, 9*C] bf16, w_stem: [9*C, C] bf16, b_stem: [1, C] f32,
    w_proj:  [C, 128] bf16 (col 0 = cls, cols 1:3 = reg, rest zero),
    b_proj:  [1, 128] f32.  Returns [M, 128] f32 (lane-dense).
    """
    M, K = patches.shape
    K2, C = w_stem.shape
    assert K == K2, (K, K2)
    C2, NP = w_proj.shape
    assert C2 == C and NP == _LANES, (C2, C, NP)
    tm = _row_tile(M)
    m_pad = _round_up(M, tm)
    patches = _pad_rows(patches, m_pad)
    cost = pl.CostEstimate(
        flops=2 * m_pad * K * C + 2 * m_pad * C * NP,
        transcendentals=0,
        bytes_accessed=(m_pad * K * patches.dtype.itemsize
                        + K * C * w_stem.dtype.itemsize
                        + C * NP * w_proj.dtype.itemsize
                        + (C + NP) * 4
                        + m_pad * NP * 4),
    )
    out = pl.pallas_call(
        _fused_head_kernel,
        out_shape=jax.ShapeDtypeStruct((m_pad, NP), jnp.float32),
        grid_spec=pltpu.PrefetchScalarGridSpec(
            num_scalar_prefetch=0,
            grid=(m_pad // tm,),
            in_specs=[
                pl.BlockSpec((tm, K), lambda i: (i, 0)),
                pl.BlockSpec((K, C), lambda i: (0, 0)),    # stem weight, resident
                pl.BlockSpec((1, C), lambda i: (0, 0)),    # stem bias, resident
                pl.BlockSpec((C, NP), lambda i: (0, 0)),   # fused proj weight, resident
                pl.BlockSpec((1, NP), lambda i: (0, 0)),   # fused proj bias, resident
            ],
            out_specs=pl.BlockSpec((tm, NP), lambda i: (i, 0)),
        ),
        compiler_params=_COMPILER_PARAMS,
        cost_estimate=cost,
    )(patches, w_stem, b_stem, w_proj, b_proj)
    return out[:M] if m_pad != M else out


# ----------------------------------------------------------------------------
# Conv2d = im2col (pure JAX glue, bf16) + Pallas matmul kernel.
# ----------------------------------------------------------------------------
def _im2col(x_nhwc, kh, kw, stride, padding):
    B, H, W, Cin = x_nhwc.shape
    xp = jnp.pad(x_nhwc, ((0, 0), (padding, padding), (padding, padding), (0, 0)))
    Ho = (H + 2 * padding - kh) // stride + 1
    Wo = (W + 2 * padding - kw) // stride + 1
    cols = []
    for i in range(kh):
        for j in range(kw):
            cols.append(xp[:, i:i + stride * Ho:stride, j:j + stride * Wo:stride, :])
    patches = jnp.concatenate(cols, axis=-1).reshape(B * Ho * Wo, kh * kw * Cin)
    return patches, Ho, Wo


def conv3x3(x_nhwc, w_mat, b, *, stride, apply_relu=True, out_dtype=jnp.bfloat16):
    """3x3 conv (padding=1): im2col + fused Pallas matmul/bias/ReLU."""
    B = x_nhwc.shape[0]
    patches, Ho, Wo = _im2col(x_nhwc.astype(jnp.bfloat16), 3, 3, stride, 1)
    out = matmul_bias(patches, w_mat, b, apply_relu=apply_relu, out_dtype=out_dtype)
    return out.reshape(B, Ho, Wo, w_mat.shape[1])


# ----------------------------------------------------------------------------
# Deterministic parameter init (synthetic; no checkpoint load).
# ----------------------------------------------------------------------------
def _conv_mat(key, kh, kw, cin, cout):
    fan_in = kh * kw * cin
    w = jax.random.normal(key, (kh * kw * cin, cout), jnp.float32) * (2.0 / fan_in) ** 0.5
    b = jnp.zeros((1, cout), jnp.float32)
    return w.astype(jnp.bfloat16), b


def init_params(key):
    keys = jax.random.split(key, 13)
    p = {}
    # Backbone: downsampling conv stack producing f4(32ch), f8(64ch), f16(128ch).
    # TODO(synk): bb1 has K = 9 (Cin=1); left as a tiny K=9 MXU matmul rather than
    # padding K / special-casing it as a VPU elementwise 3x3.
    p["bb1"] = _conv_mat(keys[0], 3, 3, 1, 32)     # /2
    p["bb2"] = _conv_mat(keys[1], 3, 3, 32, 32)    # /4  -> f4
    p["bb3"] = _conv_mat(keys[2], 3, 3, 32, 64)    # /8  -> f8
    p["bb4"] = _conv_mat(keys[3], 3, 3, 64, 128)   # /16 -> f16
    # FCOS heads: 3x3 stem + fused lane-dense 1x1 projection (cls col 0, reg cols 1:3).
    for name, ch, k0 in (("s4", 32, 4), ("s8", 64, 7), ("s16", 128, 10)):
        p[f"head_{name}_stem"] = _conv_mat(keys[k0], 3, 3, ch, ch)
        w_cls = jax.random.normal(keys[k0 + 1], (ch, 1), jnp.float32) * (2.0 / ch) ** 0.5
        w_reg = jax.random.normal(keys[k0 + 2], (ch, 2), jnp.float32) * (2.0 / ch) ** 0.5
        w_proj = jnp.zeros((ch, _LANES), jnp.float32)
        w_proj = w_proj.at[:, 0:1].set(w_cls).at[:, 1:3].set(w_reg)
        b_proj = jnp.zeros((1, _LANES), jnp.float32)
        p[f"head_{name}_proj"] = (w_proj.astype(jnp.bfloat16), b_proj)
    return p


# ----------------------------------------------------------------------------
# Forward pass (matches MotorDetNet.forward structure / output dict).
# ----------------------------------------------------------------------------
def motor_det_net(params, x_nchw):
    # Input NCHW (PyTorch convention) -> NHWC internally -> outputs NCHW.
    x = jnp.transpose(x_nchw, (0, 2, 3, 1))

    # backbone.multi_feats(x) -> f4, f8, f16 (activations kept in bf16).
    f2 = conv3x3(x, *params["bb1"], stride=2)
    f4 = conv3x3(f2, *params["bb2"], stride=2)
    f8 = conv3x3(f4, *params["bb3"], stride=2)
    f16 = conv3x3(f8, *params["bb4"], stride=2)

    logits, offsets = [], []
    for name, feat in (("s4", f4), ("s8", f8), ("s16", f16)):
        B = feat.shape[0]
        patches, Ho, Wo = _im2col(feat, 3, 3, 1, 1)
        out = fused_head(patches,
                         *params[f"head_{name}_stem"],
                         *params[f"head_{name}_proj"])        # [B*H*W, 128] f32
        out = out.reshape(B, Ho, Wo, _LANES)
        logits.append(jnp.transpose(out[..., 0:1], (0, 3, 1, 2)))   # [B, 1, H, W]
        offsets.append(jnp.transpose(out[..., 1:3], (0, 3, 1, 2)))  # [B, 2, H, W]

    return {"logits": logits, "offsets": offsets, "strides": [4, 8, 16]}


if __name__ == "__main__":
    key = jax.random.PRNGKey(0)
    pkey, xkey = jax.random.split(key)
    params = init_params(pkey)

    # Small synthetic input: batch=2, 1-channel image, 64x64 spatial.
    x = jax.random.normal(xkey, (2, 1, 64, 64), jnp.float32)

    out = jax.jit(motor_det_net)(params, x)
    jax.block_until_ready(out)

    expected_logits = [(2, 1, 16, 16), (2, 1, 8, 8), (2, 1, 4, 4)]
    expected_offsets = [(2, 2, 16, 16), (2, 2, 8, 8), (2, 2, 4, 4)]
    assert [t.shape for t in out["logits"]] == expected_logits
    assert [t.shape for t in out["offsets"]] == expected_offsets
    assert out["strides"] == [4, 8, 16]

    print("KERNEL_OK")
</pallas_src>

<mosaic_0001>
module attributes {stable_mosaic.version = 11 : i64} {
  func.func @_mm_bias_kernel(%arg0: i32, %arg1: memref<256x9xbf16, #tpu.memory_space<vmem>>, %arg2: memref<9x32xbf16, #tpu.memory_space<vmem>>, %arg3: memref<1x32xf32, #tpu.memory_space<vmem>>, %arg4: memref<256x32xbf16, #tpu.memory_space<vmem>>) attributes {dimension_semantics = [#tpu.dimension_semantics<parallel>], iteration_bounds = array<i64: 8>, scalar_prefetch = 0 : i64, scratch_operands = 0 : i64, tpu.core_type = #tpu.core_type<tc>, window_params = [{transform_indices = @transform_0, window_bounds = array<i64: 256, 9>}, {pipeline_mode = #tpu.pipeline_mode<synchronous>, transform_indices = @transform_1, window_bounds = array<i64: 9, 32>}, {pipeline_mode = #tpu.pipeline_mode<synchronous>, transform_indices = @transform_2, window_bounds = array<i64: 1, 32>}, {transform_indices = @transform_3, window_bounds = array<i64: 256, 32>}]} {
    %c0 = arith.constant 0 : index
    %c0_0 = arith.constant 0 : index
    %0 = vector.load %arg1[%c0, %c0_0] : memref<256x9xbf16, #tpu.memory_space<vmem>>, vector<256x9xbf16>
    %c0_1 = arith.constant 0 : index
    %c0_2 = arith.constant 0 : index
    %1 = vector.load %arg2[%c0_1, %c0_2] : memref<9x32xbf16, #tpu.memory_space<vmem>>, vector<9x32xbf16>
    %cst = arith.constant dense<0.000000e+00> : vector<256x32xf32>
    %2 = tpu.matmul %0, %1, %cst {dimension_numbers = #tpu.dot_dimension_numbers<[1], [0], [0], [1], [0, 0, 1, 1], [], []>} : vector<256x9xbf16>, vector<9x32xbf16>, vector<256x32xf32> -> vector<256x32xf32>
    %c0_3 = arith.constant 0 : index
    %c0_4 = arith.constant 0 : index
    %3 = vector.load %arg3[%c0_3, %c0_4] : memref<1x32xf32, #tpu.memory_space<vmem>>, vector<1x32xf32>
    %4 = vector.broadcast %3 : vector<1x32xf32> to vector<256x32xf32>
    %5 = arith.addf %2, %4 : vector<256x32xf32>
    %cst_5 = arith.constant 0.000000e+00 : f32
    %6 = vector.broadcast %cst_5 : f32 to vector<256x32xf32>
    %7 = arith.maximumf %5, %6 : vector<256x32xf32>
    %8 = arith.truncf %7 : vector<256x32xf32> to vector<256x32xbf16>
    %c0_6 = arith.constant 0 : index
    %c0_7 = arith.constant 0 : index
    %9 = vector.load %arg4[%c0_6, %c0_7] : memref<256x32xbf16, #tpu.memory_space<vmem>>, vector<256x32xbf16>
    tpu.vector_store %arg4[%c0_6, %c0_7], %8 {strides = array<i32>} : memref<256x32xbf16, #tpu.memory_space<vmem>>, vector<256x32xbf16>,
    return
  }
  func.func @transform_0(%arg0: i32) -> (i32, i32) {
    %c0_i32 = arith.constant 0 : i32
    %c0_i32_0 = arith.constant 0 : i32
    return %arg0, %c0_i32 : i32, i32
  }
  func.func @transform_1(%arg0: i32) -> (i32, i32) {
    %c0_i32 = arith.constant 0 : i32
    %c0_i32_0 = arith.constant 0 : i32
    %c0_i32_1 = arith.constant 0 : i32
    return %c0_i32, %c0_i32_0 : i32, i32
  }
  func.func @transform_2(%arg0: i32) -> (i32, i32) {
    %c0_i32 = arith.constant 0 : i32
    %c0_i32_0 = arith.constant 0 : i32
    %c0_i32_1 = arith.constant 0 : i32
    return %c0_i32, %c0_i32_0 : i32, i32
  }
  func.func @transform_3(%arg0: i32) -> (i32, i32) {
    %c0_i32 = arith.constant 0 : i32
    %c0_i32_0 = arith.constant 0 : i32
    return %arg0, %c0_i32 : i32, i32
  }
}

module attributes {stable_mosaic.version = 11 : i64} {
  func.func @_mm_bias_kernel(%arg0: i32, %arg1: memref<256x288xbf16, #tpu.memory_space<vmem>>, %arg2: memref<288x32xbf16, #tpu.memory_space<vmem>>, %arg3: memref<1x32xf32, #tpu.memory_space<vmem>>, %arg4: memref<256x32xbf16, #tpu.memory_space<vmem>>) attributes {dimension_semantics = [#tpu.dimension_semantics<parallel>], iteration_bounds = array<i64: 2>, scalar_prefetch = 0 : i64, scratch_operands = 0 : i64, tpu.core_type = #tpu.core_type<tc>, window_params = [{transform_indices = @transform_0, window_bounds = array<i64: 256, 288>}, {pipeline_mode = #tpu.pipeline_mode<synchronous>, transform_indices = @transform_1, window_bounds = array<i64: 288, 32>}, {pipeline_mode = #tpu.pipeline_mode<synchronous>, transform_indices = @transform_2, window_bounds = array<i64: 1, 32>}, {transform_indices = @transform_3, window_bounds = array<i64: 256, 32>}]} {
    %c0 = arith.constant 0 : index
    %c0_0 = arith.constant 0 : index
    %0 = vector.load %arg1[%c0, %c0_0] : memref<256x288xbf16, #tpu.memory_space<vmem>>, vector<256x288xbf16>
    %c0_1 = arith.constant 0 : index
    %c0_2 = arith.constant 0 : index
    %1 = vector.load %arg2[%c0_1, %c0_2] : memref<288x32xbf16, #tpu.memory_space<vmem>>, vector<288x32xbf16>
    %cst = arith.constant dense<0.000000e+00> : vector<256x32xf32>
    %2 = tpu.matmul %0, %1, %cst {dimension_numbers = #tpu.dot_dimension_numbers<[1], [0], [0], [1], [0, 0, 1, 1], [], []>} : vector<256x288xbf16>, vector<288x32xbf16>, vector<256x32xf32> -> vector<256x32xf32>
    %c0_3 = arith.constant 0 : index
    %c0_4 = arith.constant 0 : index
    %3 = vector.load %arg3[%c0_3, %c0_4] : memref<1x32xf32, #tpu.memory_space<vmem>>, vector<1x32xf32>
    %4 = vector.broadcast %3 : vector<1x32xf32> to vector<256x32xf32>
    %5 = arith.addf %2, %4 : vector<256x32xf32>
    %cst_5 = arith.constant 0.000000e+00 : f32
    %6 = vector.broadcast %cst_5 : f32 to vector<256x32xf32>
    %7 = arith.maximumf %5, %6 : vector<256x32xf32>
    %8 = arith.truncf %7 : vector<256x32xf32> to vector<256x32xbf16>
    %c0_6 = arith.constant 0 : index
    %c0_7 = arith.constant 0 : index
    %9 = vector.load %arg4[%c0_6, %c0_7] : memref<256x32xbf16, #tpu.memory_space<vmem>>, vector<256x32xbf16>
    tpu.vector_store %arg4[%c0_6, %c0_7], %8 {strides = array<i32>} : memref<256x32xbf16, #tpu.memory_space<vmem>>, vector<256x32xbf16>,
    return
  }
  func.func @transform_0(%arg0: i32) -> (i32, i32) {
    %c0_i32 = arith.constant 0 : i32
    %c0_i32_0 = arith.constant 0 : i32
    return %arg0, %c0_i32 : i32, i32
  }
  func.func @transform_1(%arg0: i32) -> (i32, i32) {
    %c0_i32 = arith.constant 0 : i32
    %c0_i32_0 = arith.constant 0 : i32
    %c0_i32_1 = arith.constant 0 : i32
    return %c0_i32, %c0_i32_0 : i32, i32
  }
  func.func @transform_2(%arg0: i32) -> (i32, i32) {
    %c0_i32 = arith.constant 0 : i32
    %c0_i32_0 = arith.constant 0 : i32
    %c0_i32_1 = arith.constant 0 : i32
    return %c0_i32, %c0_i32_0 : i32, i32
  }
  func.func @transform_3(%arg0: i32) -> (i32, i32) {
    %c0_i32 = arith.constant 0 : i32
    %c0_i32_0 = arith.constant 0 : i32
    return %arg0, %c0_i32 : i32, i32
  }
}

module attributes {stable_mosaic.version = 11 : i64} {
  func.func @_mm_bias_kernel(%arg0: i32, %arg1: memref<128x288xbf16, #tpu.memory_space<vmem>>, %arg2: memref<288x64xbf16, #tpu.memory_space<vmem>>, %arg3: memref<1x64xf32, #tpu.memory_space<vmem>>, %arg4: memref<128x64xbf16, #tpu.memory_space<vmem>>) attributes {dimension_semantics = [#tpu.dimension_semantics<parallel>], iteration_bounds = array<i64: 1>, scalar_prefetch = 0 : i64, scratch_operands = 0 : i64, tpu.core_type = #tpu.core_type<tc>, window_params = [{transform_indices = @transform_0, window_bounds = array<i64: 128, 288>}, {pipeline_mode = #tpu.pipeline_mode<synchronous>, transform_indices = @transform_1, window_bounds = array<i64: 288, 64>}, {pipeline_mode = #tpu.pipeline_mode<synchronous>, transform_indices = @transform_2, window_bounds = array<i64: 1, 64>}, {transform_indices = @transform_3, window_bounds = array<i64: 128, 64>}]} {
    %c0 = arith.constant 0 : index
    %c0_0 = arith.constant 0 : index
    %0 = vector.load %arg1[%c0, %c0_0] : memref<128x288xbf16, #tpu.memory_space<vmem>>, vector<128x288xbf16>
    %c0_1 = arith.constant 0 : index
    %c0_2 = arith.constant 0 : index
    %1 = vector.load %arg2[%c0_1, %c0_2] : memref<288x64xbf16, #tpu.memory_space<vmem>>, vector<288x64xbf16>
    %cst = arith.constant dense<0.000000e+00> : vector<128x64xf32>
    %2 = tpu.matmul %0, %1, %cst {dimension_numbers = #tpu.dot_dimension_numbers<[1], [0], [0], [1], [0, 0, 1, 1], [], []>} : vector<128x288xbf16>, vector<288x64xbf16>, vector<128x64xf32> -> vector<128x64xf32>
    %c0_3 = arith.constant 0 : index
    %c0_4 = arith.constant 0 : index
    %3 = vector.load %arg3[%c0_3, %c0_4] : memref<1x64xf32, #tpu.memory_space<vmem>>, vector<1x64xf32>
    %4 = vector.broadcast %3 : vector<1x64xf32> to vector<128x64xf32>
    %5 = arith.addf %2, %4 : vector<128x64xf32>
    %cst_5 = arith.constant 0.000000e+00 : f32
    %6 = vector.broadcast %cst_5 : f32 to vector<128x64xf32>
    %7 = arith.maximumf %5, %6 : vector<128x64xf32>
    %8 = arith.truncf %7 : vector<128x64xf32> to vector<128x64xbf16>
    %c0_6 = arith.constant 0 : index
    %c0_7 = arith.constant 0 : index
    %9 = vector.load %arg4[%c0_6, %c0_7] : memref<128x64xbf16, #tpu.memory_space<vmem>>, vector<128x64xbf16>
    tpu.vector_store %arg4[%c0_6, %c0_7], %8 {strides = array<i32>} : memref<128x64xbf16, #tpu.memory_space<vmem>>, vector<128x64xbf16>,
    return
  }
  func.func @transform_0(%arg0: i32) -> (i32, i32) {
    %c0_i32 = arith.constant 0 : i32
    %c0_i32_0 = arith.constant 0 : i32
    return %arg0, %c0_i32 : i32, i32
  }
  func.func @transform_1(%arg0: i32) -> (i32, i32) {
    %c0_i32 = arith.constant 0 : i32
    %c0_i32_0 = arith.constant 0 : i32
    %c0_i32_1 = arith.constant 0 : i32
    return %c0_i32, %c0_i32_0 : i32, i32
  }
  func.func @transform_2(%arg0: i32) -> (i32, i32) {
    %c0_i32 = arith.constant 0 : i32
    %c0_i32_0 = arith.constant 0 : i32
    %c0_i32_1 = arith.constant 0 : i32
    return %c0_i32, %c0_i32_0 : i32, i32
  }
  func.func @transform_3(%arg0: i32) -> (i32, i32) {
    %c0_i32 = arith.constant 0 : i32
    %c0_i32_0 = arith.constant 0 : i32
    return %arg0, %c0_i32 : i32, i32
  }
}

module attributes {stable_mosaic.version = 11 : i64} {
  func.func @_mm_bias_kernel(%arg0: i32, %arg1: memref<32x576xbf16, #tpu.memory_space<vmem>>, %arg2: memref<576x128xbf16, #tpu.memory_space<vmem>>, %arg3: memref<1x128xf32, #tpu.memory_space<vmem>>, %arg4: memref<32x128xbf16, #tpu.memory_space<vmem>>) attributes {dimension_semantics = [#tpu.dimension_semantics<parallel>], iteration_bounds = array<i64: 1>, scalar_prefetch = 0 : i64, scratch_operands = 0 : i64, tpu.core_type = #tpu.core_type<tc>, window_params = [{transform_indices = @transform_0, window_bounds = array<i64: 32, 576>}, {pipeline_mode = #tpu.pipeline_mode<synchronous>, transform_indices = @transform_1, window_bounds = array<i64: 576, 128>}, {pipeline_mode = #tpu.pipeline_mode<synchronous>, transform_indices = @transform_2, window_bounds = array<i64: 1, 128>}, {transform_indices = @transform_3, window_bounds = array<i64: 32, 128>}]} {
    %c0 = arith.constant 0 : index
    %c0_0 = arith.constant 0 : index
    %0 = vector.load %arg1[%c0, %c0_0] : memref<32x576xbf16, #tpu.memory_space<vmem>>, vector<32x576xbf16>
    %c0_1 = arith.constant 0 : index
    %c0_2 = arith.constant 0 : index
    %1 = vector.load %arg2[%c0_1, %c0_2] : memref<576x128xbf16, #tpu.memory_space<vmem>>, vector<576x128xbf16>
    %cst = arith.constant dense<0.000000e+00> : vector<32x128xf32>
    %2 = tpu.matmul %0, %1, %cst {dimension_numbers = #tpu.dot_dimension_numbers<[1], [0], [0], [1], [0, 0, 1, 1], [], []>} : vector<32x576xbf16>, vector<576x128xbf16>, vector<32x128xf32> -> vector<32x128xf32>
    %c0_3 = arith.constant 0 : index
    %c0_4 = arith.constant 0 : index
    %3 = vector.load %arg3[%c0_3, %c0_4] : memref<1x128xf32, #tpu.memory_space<vmem>>, vector<1x128xf32>
    %4 = vector.broadcast %3 : vector<1x128xf32> to vector<32x128xf32>
    %5 = arith.addf %2, %4 : vector<32x128xf32>
    %cst_5 = arith.constant 0.000000e+00 : f32
    %6 = vector.broadcast %cst_5 : f32 to vector<32x128xf32>
    %7 = arith.maximumf %5, %6 : vector<32x128xf32>
    %8 = arith.truncf %7 : vector<32x128xf32> to vector<32x128xbf16>
    %c0_6 = arith.constant 0 : index
    %c0_7 = arith.constant 0 : index
    %9 = vector.load %arg4[%c0_6, %c0_7] : memref<32x128xbf16, #tpu.memory_space<vmem>>, vector<32x128xbf16>
    tpu.vector_store %arg4[%c0_6, %c0_7], %8 {strides = array<i32>} : memref<32x128xbf16, #tpu.memory_space<vmem>>, vector<32x128xbf16>,
    return
  }
  func.func @transform_0(%arg0: i32) -> (i32, i32) {
    %c0_i32 = arith.constant 0 : i32
    %c0_i32_0 = arith.constant 0 : i32
    return %arg0, %c0_i32 : i32, i32
  }
  func.func @transform_1(%arg0: i32) -> (i32, i32) {
    %c0_i32 = arith.constant 0 : i32
    %c0_i32_0 = arith.constant 0 : i32
    %c0_i32_1 = arith.constant 0 : i32
    return %c0_i32, %c0_i32_0 : i32, i32
  }
  func.func @transform_2(%arg0: i32) -> (i32, i32) {
    %c0_i32 = arith.constant 0 : i32
    %c0_i32_0 = arith.constant 0 : i32
    %c0_i32_1 = arith.constant 0 : i32
    return %c0_i32, %c0_i32_0 : i32, i32
  }
  func.func @transform_3(%arg0: i32) -> (i32, i32) {
    %c0_i32 = arith.constant 0 : i32
    %c0_i32_0 = arith.constant 0 : i32
    return %arg0, %c0_i32 : i32, i32
  }
}

module attributes {stable_mosaic.version = 11 : i64} {
  func.func @_fused_head_kernel(%arg0: i32, %arg1: memref<32x1152xbf16, #tpu.memory_space<vmem>>, %arg2: memref<1152x128xbf16, #tpu.memory_space<vmem>>, %arg3: memref<1x128xf32, #tpu.memory_space<vmem>>, %arg4: memref<128x128xbf16, #tpu.memory_space<vmem>>, %arg5: memref<1x128xf32, #tpu.memory_space<vmem>>, %arg6: memref<32x128xf32, #tpu.memory_space<vmem>>) attributes {dimension_semantics = [#tpu.dimension_semantics<parallel>], iteration_bounds = array<i64: 1>, scalar_prefetch = 0 : i64, scratch_operands = 0 : i64, tpu.core_type = #tpu.core_type<tc>, window_params = [{transform_indices = @transform_0, window_bounds = array<i64: 32, 1152>}, {pipeline_mode = #tpu.pipeline_mode<synchronous>, transform_indices = @transform_1, window_bounds = array<i64: 1152, 128>}, {pipeline_mode = #tpu.pipeline_mode<synchronous>, transform_indices = @transform_2, window_bounds = array<i64: 1, 128>}, {pipeline_mode = #tpu.pipeline_mode<synchronous>, transform_indices = @transform_3, window_bounds = array<i64: 128, 128>}, {pipeline_mode = #tpu.pipeline_mode<synchronous>, transform_indices = @transform_4, window_bounds = array<i64: 1, 128>}, {transform_indices = @transform_5, window_bounds = array<i64: 32, 128>}]} {
    %c0 = arith.constant 0 : index
    %c0_0 = arith.constant 0 : index
    %0 = vector.load %arg1[%c0, %c0_0] : memref<32x1152xbf16, #tpu.memory_space<vmem>>, vector<32x1152xbf16>
    %c0_1 = arith.constant 0 : index
    %c0_2 = arith.constant 0 : index
    %1 = vector.load %arg2[%c0_1, %c0_2] : memref<1152x128xbf16, #tpu.memory_space<vmem>>, vector<1152x128xbf16>
    %cst = arith.constant dense<0.000000e+00> : vector<32x128xf32>
    %2 = tpu.matmul %0, %1, %cst {dimension_numbers = #tpu.dot_dimension_numbers<[1], [0], [0], [1], [0, 0, 1, 1], [], []>} : vector<32x1152xbf16>, vector<1152x128xbf16>, vector<32x128xf32> -> vector<32x128xf32>
    %c0_3 = arith.constant 0 : index
    %c0_4 = arith.constant 0 : index
    %3 = vector.load %arg3[%c0_3, %c0_4] : memref<1x128xf32, #tpu.memory_space<vmem>>, vector<1x128xf32>
    %4 = vector.broadcast %3 : vector<1x128xf32> to vector<32x128xf32>
    %5 = arith.addf %2, %4 : vector<32x128xf32>
    %cst_5 = arith.constant 0.000000e+00 : f32
    %6 = vector.broadcast %cst_5 : f32 to vector<32x128xf32>
    %7 = arith.maximumf %5, %6 : vector<32x128xf32>
    %8 = arith.truncf %7 : vector<32x128xf32> to vector<32x128xbf16>
    %c0_6 = arith.constant 0 : index
    %c0_7 = arith.constant 0 : index
    %9 = vector.load %arg4[%c0_6, %c0_7] : memref<128x128xbf16, #tpu.memory_space<vmem>>, vector<128x128xbf16>
    %cst_8 = arith.constant dense<0.000000e+00> : vector<32x128xf32>
    %10 = tpu.matmul %8, %9, %cst_8 {dimension_numbers = #tpu.dot_dimension_numbers<[1], [0], [0], [1], [0, 0, 1, 1], [], []>} : vector<32x128xbf16>, vector<128x128xbf16>, vector<32x128xf32> -> vector<32x128xf32>
    %c0_9 = arith.constant 0 : index
    %c0_10 = arith.constant 0 : index
    %11 = vector.load %arg5[%c0_9, %c0_10] : memref<1x128xf32, #tpu.memory_space<vmem>>, vector<1x128xf32>
    %12 = vector.broadcast %11 : vector<1x128xf32> to vector<32x128xf32>
    %13 = arith.addf %10, %12 : vector<32x128xf32>
    %c0_11 = arith.constant 0 : index
    %c0_12 = arith.constant 0 : index
    %14 = vector.load %arg6[%c0_11, %c0_12] : memref<32x128xf32, #tpu.memory_space<vmem>>, vector<32x128xf32>
    tpu.vector_store %arg6[%c0_11, %c0_12], %13 {strides = array<i32>} : memref<32x128xf32, #tpu.memory_space<vmem>>, vector<32x128xf32>,
    return
  }
  func.func @transform_0(%arg0: i32) -> (i32, i32) {
    %c0_i32 = arith.constant 0 : i32
    %c0_i32_0 = arith.constant 0 : i32
    return %arg0, %c0_i32 : i32, i32
  }
  func.func @transform_1(%arg0: i32) -> (i32, i32) {
    %c0_i32 = arith.constant 0 : i32
    %c0_i32_0 = arith.constant 0 : i32
    %c0_i32_1 = arith.constant 0 : i32
    return %c0_i32, %c0_i32_0 : i32, i32
  }
  func.func @transform_2(%arg0: i32) -> (i32, i32) {
    %c0_i32 = arith.constant 0 : i32
    %c0_i32_0 = arith.constant 0 : i32
    %c0_i32_1 = arith.constant 0 : i32
    return %c0_i32, %c0_i32_0 : i32, i32
  }
  func.func @transform_3(%arg0: i32) -> (i32, i32) {
    %c0_i32 = arith.constant 0 : i32
    %c0_i32_0 = arith.constant 0 : i32
    %c0_i32_1 = arith.constant 0 : i32
    return %c0_i32, %c0_i32_0 : i32, i32
  }
  func.func @transform_4(%arg0: i32) -> (i32, i32) {
    %c0_i32 = arith.constant 0 : i32
    %c0_i32_0 = arith.constant 0 : i32
    %c0_i32_1 = arith.constant 0 : i32
    return %c0_i32, %c0_i32_0 : i32, i32
  }
  func.func @transform_5(%arg0: i32) -> (i32, i32) {
    %c0_i32 = arith.constant 0 : i32
    %c0_i32_0 = arith.constant 0 : i32
    return %arg0, %c0_i32 : i32, i32
  }
}

module attributes {stable_mosaic.version = 11 : i64} {
  func.func @_fused_head_kernel(%arg0: i32, %arg1: memref<128x576xbf16, #tpu.memory_space<vmem>>, %arg2: memref<576x64xbf16, #tpu.memory_space<vmem>>, %arg3: memref<1x64xf32, #tpu.memory_space<vmem>>, %arg4: memref<64x128xbf16, #tpu.memory_space<vmem>>, %arg5: memref<1x128xf32, #tpu.memory_space<vmem>>, %arg6: memref<128x128xf32, #tpu.memory_space<vmem>>) attributes {dimension_semantics = [#tpu.dimension_semantics<parallel>], iteration_bounds = array<i64: 1>, scalar_prefetch = 0 : i64, scratch_operands = 0 : i64, tpu.core_type = #tpu.core_type<tc>, window_params = [{transform_indices = @transform_0, window_bounds = array<i64: 128, 576>}, {pipeline_mode = #tpu.pipeline_mode<synchronous>, transform_indices = @transform_1, window_bounds = array<i64: 576, 64>}, {pipeline_mode = #tpu.pipeline_mode<synchronous>, transform_indices = @transform_2, window_bounds = array<i64: 1, 64>}, {pipeline_mode = #tpu.pipeline_mode<synchronous>, transform_indices = @transform_3, window_bounds = array<i64: 64, 128>}, {pipeline_mode = #tpu.pipeline_mode<synchronous>, transform_indices = @transform_4, window_bounds = array<i64: 1, 128>}, {transform_indices = @transform_5, window_bounds = array<i64: 128, 128>}]} {
    %c0 = arith.constant 0 : index
    %c0_0 = arith.constant 0 : index
    %0 = vector.load %arg1[%c0, %c0_0] : memref<128x576xbf16, #tpu.memory_space<vmem>>, vector<128x576xbf16>
    %c0_1 = arith.constant 0 : index
    %c0_2 = arith.constant 0 : index
    %1 = vector.load %arg2[%c0_1, %c0_2] : memref<576x64xbf16, #tpu.memory_space<vmem>>, vector<576x64xbf16>
    %cst = arith.constant dense<0.000000e+00> : vector<128x64xf32>
    %2 = tpu.matmul %0, %1, %cst {dimension_numbers = #tpu.dot_dimension_numbers<[1], [0], [0], [1], [0, 0, 1, 1], [], []>} : vector<128x576xbf16>, vector<576x64xbf16>, vector<128x64xf32> -> vector<128x64xf32>
    %c0_3 = arith.constant 0 : index
    %c0_4 = arith.constant 0 : index
    %3 = vector.load %arg3[%c0_3, %c0_4] : memref<1x64xf32, #tpu.memory_space<vmem>>, vector<1x64xf32>
    %4 = vector.broadcast %3 : vector<1x64xf32> to vector<128x64xf32>
    %5 = arith.addf %2, %4 : vector<128x64xf32>
    %cst_5 = arith.constant 0.000000e+00 : f32
    %6 = vector.broadcast %cst_5 : f32 to vector<128x64xf32>
    %7 = arith.maximumf %5, %6 : vector<128x64xf32>
    %8 = arith.truncf %7 : vector<128x64xf32> to vector<128x64xbf16>
    %c0_6 = arith.constant 0 : index
    %c0_7 = arith.constant 0 : index
    %9 = vector.load %arg4[%c0_6, %c0_7] : memref<64x128xbf16, #tpu.memory_space<vmem>>, vector<64x128xbf16>
    %cst_8 = arith.constant dense<0.000000e+00> : vector<128x128xf32>
    %10 = tpu.matmul %8, %9, %cst_8 {dimension_numbers = #tpu.dot_dimension_numbers<[1], [0], [0], [1], [0, 0, 1, 1], [], []>} : vector<128x64xbf16>, vector<64x128xbf16>, vector<128x128xf32> -> vector<128x128xf32>
    %c0_9 = arith.constant 0 : index
    %c0_10 = arith.constant 0 : index
    %11 = vector.load %arg5[%c0_9, %c0_10] : memref<1x128xf32, #tpu.memory_space<vmem>>, vector<1x128xf32>
    %12 = vector.broadcast %11 : vector<1x128xf32> to vector<128x128xf32>
    %13 = arith.addf %10, %12 : vector<128x128xf32>
    %c0_11 = arith.constant 0 : index
    %c0_12 = arith.constant 0 : index
    %14 = vector.load %arg6[%c0_11, %c0_12] : memref<128x128xf32, #tpu.memory_space<vmem>>, vector<128x128xf32>
    tpu.vector_store %arg6[%c0_11, %c0_12], %13 {strides = array<i32>} : memref<128x128xf32, #tpu.memory_space<vmem>>, vector<128x128xf32>,
    return
  }
  func.func @transform_0(%arg0: i32) -> (i32, i32) {
    %c0_i32 = arith.constant 0 : i32
    %c0_i32_0 = arith.constant 0 : i32
    return %arg0, %c0_i32 : i32, i32
  }
  func.func @transform_1(%arg0: i32) -> (i32, i32) {
    %c0_i32 = arith.constant 0 : i32
    %c0_i32_0 = arith.constant 0 : i32
    %c0_i32_1 = arith.constant 0 : i32
    return %c0_i32, %c0_i32_0 : i32, i32
  }
  func.func @transform_2(%arg0: i32) -> (i32, i32) {
    %c0_i32 = arith.constant 0 : i32
    %c0_i32_0 = arith.constant 0 : i32
    %c0_i32_1 = arith.constant 0 : i32
    return %c0_i32, %c0_i32_0 : i32, i32
  }
  func.func @transform_3(%arg0: i32) -> (i32, i32) {
    %c0_i32 = arith.constant 0 : i32
    %c0_i32_0 = arith.constant 0 : i32
    %c0_i32_1 = arith.constant 0 : i32
    return %c0_i32, %c0_i32_0 : i32, i32
  }
  func.func @transform_4(%arg0: i32) -> (i32, i32) {
    %c0_i32 = arith.constant 0 : i32
    %c0_i32_0 = arith.constant 0 : i32
    %c0_i32_1 = arith.constant 0 : i32
    return %c0_i32, %c0_i32_0 : i32, i32
  }
  func.func @transform_5(%arg0: i32) -> (i32, i32) {
    %c0_i32 = arith.constant 0 : i32
    %c0_i32_0 = arith.constant 0 : i32
    return %arg0, %c0_i32 : i32, i32
  }
}

module attributes {stable_mosaic.version = 11 : i64} {
  func.func @_fused_head_kernel(%arg0: i32, %arg1: memref<256x288xbf16, #tpu.memory_space<vmem>>, %arg2: memref<288x32xbf16, #tpu.memory_space<vmem>>, %arg3: memref<1x32xf32, #tpu.memory_space<vmem>>, %arg4: memref<32x128xbf16, #tpu.memory_space<vmem>>, %arg5: memref<1x128xf32, #tpu.memory_space<vmem>>, %arg6: memref<256x128xf32, #tpu.memory_space<vmem>>) attributes {dimension_semantics = [#tpu.dimension_semantics<parallel>], iteration_bounds = array<i64: 2>, scalar_prefetch = 0 : i64, scratch_operands = 0 : i64, tpu.core_type = #tpu.core_type<tc>, window_params = [{transform_indices = @transform_0, window_bounds = array<i64: 256, 288>}, {pipeline_mode = #tpu.pipeline_mode<synchronous>, transform_indices = @transform_1, window_bounds = array<i64: 288, 32>}, {pipeline_mode = #tpu.pipeline_mode<synchronous>, transform_indices = @transform_2, window_bounds = array<i64: 1, 32>}, {pipeline_mode = #tpu.pipeline_mode<synchronous>, transform_indices = @transform_3, window_bounds = array<i64: 32, 128>}, {pipeline_mode = #tpu.pipeline_mode<synchronous>, transform_indices = @transform_4, window_bounds = array<i64: 1, 128>}, {transform_indices = @transform_5, window_bounds = array<i64: 256, 128>}]} {
    %c0 = arith.constant 0 : index
    %c0_0 = arith.constant 0 : index
    %0 = vector.load %arg1[%c0, %c0_0] : memref<256x288xbf16, #tpu.memory_space<vmem>>, vector<256x288xbf16>
    %c0_1 = arith.constant 0 : index
    %c0_2 = arith.constant 0 : index
    %1 = vector.load %arg2[%c0_1, %c0_2] : memref<288x32xbf16, #tpu.memory_space<vmem>>, vector<288x32xbf16>
    %cst = arith.constant dense<0.000000e+00> : vector<256x32xf32>
    %2 = tpu.matmul %0, %1, %cst {dimension_numbers = #tpu.dot_dimension_numbers<[1], [0], [0], [1], [0, 0, 1, 1], [], []>} : vector<256x288xbf16>, vector<288x32xbf16>, vector<256x32xf32> -> vector<256x32xf32>
    %c0_3 = arith.constant 0 : index
    %c0_4 = arith.constant 0 : index
    %3 = vector.load %arg3[%c0_3, %c0_4] : memref<1x32xf32, #tpu.memory_space<vmem>>, vector<1x32xf32>
    %4 = vector.broadcast %3 : vector<1x32xf32> to vector<256x32xf32>
    %5 = arith.addf %2, %4 : vector<256x32xf32>
    %cst_5 = arith.constant 0.000000e+00 : f32
    %6 = vector.broadcast %cst_5 : f32 to vector<256x32xf32>
    %7 = arith.maximumf %5, %6 : vector<256x32xf32>
    %8 = arith.truncf %7 : vector<256x32xf32> to vector<256x32xbf16>
    %c0_6 = arith.constant 0 : index
    %c0_7 = arith.constant 0 : index
    %9 = vector.load %arg4[%c0_6, %c0_7] : memref<32x128xbf16, #tpu.memory_space<vmem>>, vector<32x128xbf16>
    %cst_8 = arith.constant dense<0.000000e+00> : vector<256x128xf32>
    %10 = tpu.matmul %8, %9, %cst_8 {dimension_numbers = #tpu.dot_dimension_numbers<[1], [0], [0], [1], [0, 0, 1, 1], [], []>} : vector<256x32xbf16>, vector<32x128xbf16>, vector<256x128xf32> -> vector<256x128xf32>
    %c0_9 = arith.constant 0 : index
    %c0_10 = arith.constant 0 : index
    %11 = vector.load %arg5[%c0_9, %c0_10] : memref<1x128xf32, #tpu.memory_space<vmem>>, vector<1x128xf32>
    %12 = vector.broadcast %11 : vector<1x128xf32> to vector<256x128xf32>
    %13 = arith.addf %10, %12 : vector<256x128xf32>
    %c0_11 = arith.constant 0 : index
    %c0_12 = arith.constant 0 : index
    %14 = vector.load %arg6[%c0_11, %c0_12] : memref<256x128xf32, #tpu.memory_space<vmem>>, vector<256x128xf32>
    tpu.vector_store %arg6[%c0_11, %c0_12], %13 {strides = array<i32>} : memref<256x128xf32, #tpu.memory_space<vmem>>, vector<256x128xf32>,
    return
  }
  func.func @transform_0(%arg0: i32) -> (i32, i32) {
    %c0_i32 = arith.constant 0 : i32
    %c0_i32_0 = arith.constant 0 : i32
    return %arg0, %c0_i32 : i32, i32
  }
  func.func @transform_1(%arg0: i32) -> (i32, i32) {
    %c0_i32 = arith.constant 0 : i32
    %c0_i32_0 = arith.constant 0 : i32
    %c0_i32_1 = arith.constant 0 : i32
    return %c0_i32, %c0_i32_0 : i32, i32
  }
  func.func @transform_2(%arg0: i32) -> (i32, i32) {
    %c0_i32 = arith.constant 0 : i32
    %c0_i32_0 = arith.constant 0 : i32
    %c0_i32_1 = arith.constant 0 : i32
    return %c0_i32, %c0_i32_0 : i32, i32
  }
  func.func @transform_3(%arg0: i32) -> (i32, i32) {
    %c0_i32 = arith.constant 0 : i32
    %c0_i32_0 = arith.constant 0 : i32
    %c0_i32_1 = arith.constant 0 : i32
    return %c0_i32, %c0_i32_0 : i32, i32
  }
  func.func @transform_4(%arg0: i32) -> (i32, i32) {
    %c0_i32 = arith.constant 0 : i32
    %c0_i32_0 = arith.constant 0 : i32
    %c0_i32_1 = arith.constant 0 : i32
    return %c0_i32, %c0_i32_0 : i32, i32
  }
  func.func @transform_5(%arg0: i32) -> (i32, i32) {
    %c0_i32 = arith.constant 0 : i32
    %c0_i32_0 = arith.constant 0 : i32
    return %arg0, %c0_i32 : i32, i32
  }
}

</mosaic_0001>

<bundles_post_ra>
// kernel: motor_det_net.7
= control target key start
LH: loop header
LB: loop body
LE: loop exit
PB: predicated region body
PF: predicated region fallthrough
CT: control target
= control target key end

     0   :  { %s750_s12 = smov 0   ;;  %s899_s0 = inlined_call_operand.vmem [shape: bf16[2048,9], index: 0, kind: input, shape index: {}]   ;;  %s900_s1 = inlined_call_operand.vmem [shape: bf16[9,32], index: 1, kind: input, shape index: {}]   ;;  %s901_s2 = inlined_call_operand.vmem [shape: f32[1,32], index: 2, kind: input, shape index: {}]   ;;  %s902_s3 = inlined_call_operand.vmem [shape: bf16[2048,32], index: 3, kind: output, shape index: {}]  }
   0x1 LB: > { %s596_s13 = sadd.s32 4294967295, %s727_s12   ;;  %p600_p0 = scmp.ge.s32.totalorder %s727_s12, 1  ;;  %s727_s12 = sphi %s750_s12, %s13_s12  }
   0x2   : > { %p138_p1 = scmp.lt.s32.totalorder %s727_s12, 9 }
   0x4   : > { %p139_p2 = pnand %p600_p0, %p138_p1 }
   0x5   : > { %s601_s18 = sshll.u32 (!%p139_p2), %s596_s13, 5 }
   0x6   : > { %142 = sbr.rel (%p139_p2) target bundleno = 217 (0xd9), region = 32  ;;  %p163_p3 = scmp.lt.s32.totalorder (!%p139_p2), %s601_s18, 255 }
   0xb   : > { %v671_v0 = vld [vmem:[%s900_s1] sm:$0xf]  ;;  %v707_v1 = vld [vmem:[%s900_s1] sm:$0x10]  ;;  %vm347_vm0 = vcmask 1043456   ;;  %vm348_vm1 = vcmask 1044480  }
   0xc   : > { %v672_v2 = vor.u32 %v707_v1, %v671_v0  ;;  %v729_v3 = vmov 65535   ;;  %s904_s18 = smov (!%p163_p3, %s601_s18), 255  ;;  %vm298_vm2 = vcmask 72704   ;;  %v791_v23 = vld [vmem:[%s901_s2] ss:$0 sm:$0xff]  ;;  %vm507_vm3 = vcmask 257024  }
   0xd   : > { %v349_v4 = vsel %vm347_vm0, 4294967295, %v729_v3  ;;  %s602_s19 = sshll.u32 %s904_s18, 2 }
   0xe   : > { %v350_v5 = vsel %vm348_vm1, %v349_v4, 0  ;;  %s166_s22 = scalar_lea.vmem %s899_s0, %s602_s19  ;;  %s800_s27 = scalar_lea.vmem %s902_s3, %s602_s19 }
   0xf   : > { %v352_v6 = vand.u32 %v672_v2, %v350_v5  ;;  %v691_v7 = vld [vmem:[%s166_s22] sm:$0xff]  ;;  %v692_v11 = vld [vmem:[%s166_s22 + $0x8] sm:$0xff]  ;;  %v693_v15 = vld [vmem:[%s166_s22 + $0x10] sm:$0xff] }
  0x10   : > { %v695_v8 = vld [vmem:[%s166_s22 + $0x20] sm:$0xff]  ;;  %v696_v12 = vld [vmem:[%s166_s22 + $0x28] sm:$0xff]  ;;  %v697_v16 = vld [vmem:[%s166_s22 + $0x30] sm:$0xff] }
  0x11   : > { %361 = vmatpush.bf16.msra.mxu0 %v352_v6  ;;  %708 = vmatpush.bf16.msra.mxu1 %v352_v6  ;;  %v699_v9 = vld [vmem:[%s166_s22 + $0x40] sm:$0xff]  ;;  %v700_v13 = vld [vmem:[%s166_s22 + $0x48] sm:$0xff]  ;;  %v701_v17 = vld [vmem:[%s166_s22 + $0x50] sm:$0xff] }
  0x12   : > { %709 = vmatpush.bf16.msra.mxu2 %v352_v6  ;;  %710 = vmatpush.bf16.msra.mxu3 %v352_v6  ;;  %v703_v10 = vld [vmem:[%s166_s22 + $0x60] sm:$0xff]  ;;  %v704_v14 = vld [vmem:[%s166_s22 + $0x68] sm:$0xff]  ;;  %v705_v18 = vld [vmem:[%s166_s22 + $0x70] sm:$0xff] }
  0x13   : > { %v694_v19 = vld [vmem:[%s166_s22 + $0x18] sm:$0xff] }
  0x14   : > { %673 = vmatmul.msk.bf16.vlgmr.msra.gmra.mxu0 %vm298_vm2, %v691_v7  ;;  %677 = vmatmul.msk.bf16.vlgmr.msra.gmra.mxu1 %vm298_vm2, %v695_v8  ;;  %v698_v20 = vld [vmem:[%s166_s22 + $0x38] sm:$0xff] }
  0x15   : > { %681 = vmatmul.msk.bf16.vlgmr.msra.gmra.mxu2 %vm298_vm2, %v699_v9  ;;  %685 = vmatmul.msk.bf16.vlgmr.msra.gmra.mxu3 %vm298_vm2, %v703_v10  ;;  %v702_v21 = vld [vmem:[%s166_s22 + $0x58] sm:$0xff] }
  0x16   : > { %v706_v22 = vld [vmem:[%s166_s22 + $0x78] sm:$0xff] }
  0x24   : > { %674 = vmatmul.msk.bf16.gmra.mxu0 %vm298_vm2, %v692_v11  ;;  %678 = vmatmul.msk.bf16.gmra.mxu1 %vm298_vm2, %v696_v12 }
  0x25   : > { %682 = vmatmul.msk.bf16.gmra.mxu2 %vm298_vm2, %v700_v13  ;;  %686 = vmatmul.msk.bf16.gmra.mxu3 %vm298_vm2, %v704_v14 }
  0x34   : > { %675 = vmatmul.msk.bf16.gmra.mxu0 %vm298_vm2, %v693_v15  ;;  %679 = vmatmul.msk.bf16.gmra.mxu1 %vm298_vm2, %v697_v16 }
  0x35   : > { %683 = vmatmul.msk.bf16.gmra.mxu2 %vm298_vm2, %v701_v17  ;;  %687 = vmatmul.msk.bf16.gmra.mxu3 %vm298_vm2, %v705_v18 }
  0x44   : > { %676 = vmatmul.msk.bf16.gmra.mxu0 %vm298_vm2, %v694_v19  ;;  %680 = vmatmul.msk.bf16.gmra.mxu1 %vm298_vm2, %v698_v20 }
  0x45   : > { %684 = vmatmul.msk.bf16.gmra.mxu2 %vm298_vm2, %v702_v21  ;;  %688 = vmatmul.msk.bf16.gmra.mxu3 %vm298_vm2, %v706_v22 }
  0x91   : > { %v363_v24 = vpop.f32.mrf.mxu0  ;;  %v383_v25 = vpop.f32.mrf.mxu1 }
  0x92   : > { %v364_v26 = vadd.f32 %v791_v23, %v363_v24  ;;  %v384_v27 = vadd.f32 %v791_v23, %v383_v25 }
  0x94   : > { %v443_v28 = vmax.f32 %v364_v26, 0.0  ;;  %v451_v29 = vmax.f32 %v384_v27, 0.0 }
  0x96   : > { %v475_v30 = vpack.c.bf16 %v443_v28, %v443_v28  ;;  %v483_v31 = vpack.c.bf16 %v451_v29, %v451_v29 }
  0x98   : > { %508 = vst.msk [vmem:[%s800_s27] sm:$0xf] %vm507_vm3, %v475_v30  ;;  %v403_v32 = vpop.f32.mrf.mxu2  ;;  %v423_v33 = vpop.f32.mrf.mxu3 }
  0x99   : > { %516 = vst.msk [vmem:[%s800_s27 + $0x20] sm:$0xf] %vm507_vm3, %v483_v31  ;;  %v404_v34 = vadd.f32 %v791_v23, %v403_v32  ;;  %v424_v35 = vadd.f32 %v791_v23, %v423_v33  ;;  %v365_v36 = vpop.f32.mrf.mxu0  ;;  %v385_v37 = vpop.f32.mrf.mxu1 }
  0x9a   : > { %v366_v38 = vadd.f32 %v791_v23, %v365_v36  ;;  %v386_v39 = vadd.f32 %v791_v23, %v385_v37 }
  0x9b   : > { %v459_v40 = vmax.f32 %v404_v34, 0.0  ;;  %v467_v41 = vmax.f32 %v424_v35, 0.0 }
  0x9c   : > { %v444_v42 = vmax.f32 %v366_v38, 0.0  ;;  %v452_v43 = vmax.f32 %v386_v39, 0.0 }
  0x9d   : > { %v491_v44 = vpack.c.bf16 %v459_v40, %v459_v40  ;;  %v499_v45 = vpack.c.bf16 %v467_v41, %v467_v41 }
  0x9e   : > { %v476_v46 = vpack.c.bf16 %v444_v42, %v444_v42  ;;  %v484_v47 = vpack.c.bf16 %v452_v43, %v452_v43 }
  0x9f   : > { %524 = vst.msk [vmem:[%s800_s27 + $0x40] sm:$0xf] %vm507_vm3, %v491_v44 }
  0xa0   : > { %532 = vst.msk [vmem:[%s800_s27 + $0x60] sm:$0xf] %vm507_vm3, %v499_v45  ;;  %v405_v48 = vpop.f32.mrf.mxu2  ;;  %v425_v49 = vpop.f32.mrf.mxu3 }
  0xa1   : > { %509 = vst.msk [vmem:[%s800_s27 + $0x4] sm:$0xf] %vm507_vm3, %v476_v46  ;;  %v406_v50 = vadd.f32 %v791_v23, %v405_v48  ;;  %v426_v51 = vadd.f32 %v791_v23, %v425_v49  ;;  %v368_v52 = vpop.f32.mrf.mxu0  ;;  %v388_v53 = vpop.f32.mrf.mxu1 }
  0xa2   : > { %517 = vst.msk [vmem:[%s800_s27 + $0x24] sm:$0xf] %vm507_vm3, %v484_v47  ;;  %v369_v54 = vadd.f32 %v791_v23, %v368_v52  ;;  %v389_v55 = vadd.f32 %v791_v23, %v388_v53 }
  0xa3   : > { %v460_v56 = vmax.f32 %v406_v50, 0.0  ;;  %v468_v57 = vmax.f32 %v426_v51, 0.0 }
  0xa4   : > { %v445_v58 = vmax.f32 %v369_v54, 0.0  ;;  %v453_v59 = vmax.f32 %v389_v55, 0.0 }
  0xa5   : > { %v492_v60 = vpack.c.bf16 %v460_v56, %v460_v56  ;;  %v500_v61 = vpack.c.bf16 %v468_v57, %v468_v57 }
  0xa6   : > { %v477_v62 = vpack.c.bf16 %v445_v58, %v445_v58  ;;  %v485_v63 = vpack.c.bf16 %v453_v59, %v453_v59 }
  0xa7   : > { %525 = vst.msk [vmem:[%s800_s27 + $0x44] sm:$0xf] %vm507_vm3, %v492_v60 }
  0xa8   : > { %533 = vst.msk [vmem:[%s800_s27 + $0x64] sm:$0xf] %vm507_vm3, %v500_v61  ;;  %v408_v0 = vpop.f32.mrf.mxu2  ;;  %v428_v1 = vpop.f32.mrf.mxu3 }
  0xa9   : > { %510 = vst.msk [vmem:[%s800_s27 + $0x8] sm:$0xf] %vm507_vm3, %v477_v62  ;;  %v409_v2 = vadd.f32 %v791_v23, %v408_v0  ;;  %v429_v3 = vadd.f32 %v791_v23, %v428_v1  ;;  %v370_v4 = vpop.f32.mrf.mxu0  ;;  %v390_v5 = vpop.f32.mrf.mxu1 }
  0xaa   : > { %518 = vst.msk [vmem:[%s800_s27 + $0x28] sm:$0xf] %vm507_vm3, %v485_v63  ;;  %v371_v6 = vadd.f32 %v791_v23, %v370_v4  ;;  %v391_v7 = vadd.f32 %v791_v23, %v390_v5 }
  0xab   : > { %v461_v8 = vmax.f32 %v409_v2, 0.0  ;;  %v469_v9 = vmax.f32 %v429_v3, 0.0 }
  0xac   : > { %v446_v10 = vmax.f32 %v371_v6, 0.0  ;;  %v454_v11 = vmax.f32 %v391_v7, 0.0 }
  0xad   : > { %v493_v12 = vpack.c.bf16 %v461_v8, %v461_v8  ;;  %v501_v13 = vpack.c.bf16 %v469_v9, %v469_v9 }
  0xae   : > { %v478_v14 = vpack.c.bf16 %v446_v10, %v446_v10  ;;  %v486_v15 = vpack.c.bf16 %v454_v11, %v454_v11 }
  0xaf   : > { %526 = vst.msk [vmem:[%s800_s27 + $0x48] sm:$0xf] %vm507_vm3, %v493_v12 }
  0xb0   : > { %534 = vst.msk [vmem:[%s800_s27 + $0x68] sm:$0xf] %vm507_vm3, %v501_v13  ;;  %v410_v16 = vpop.f32.mrf.mxu2  ;;  %v430_v17 = vpop.f32.mrf.mxu3 }
  0xb1   : > { %511 = vst.msk [vmem:[%s800_s27 + $0xc] sm:$0xf] %vm507_vm3, %v478_v14  ;;  %v411_v18 = vadd.f32 %v791_v23, %v410_v16  ;;  %v431_v19 = vadd.f32 %v791_v23, %v430_v17  ;;  %v373_v20 = vpop.f32.mrf.mxu0  ;;  %v393_v21 = vpop.f32.mrf.mxu1 }
  0xb2   : > { %519 = vst.msk [vmem:[%s800_s27 + $0x2c] sm:$0xf] %vm507_vm3, %v486_v15  ;;  %v374_v22 = vadd.f32 %v791_v23, %v373_v20  ;;  %v394_v24 = vadd.f32 %v791_v23, %v393_v21 }
  0xb3   : > { %v462_v25 = vmax.f32 %v411_v18, 0.0  ;;  %v470_v26 = vmax.f32 %v431_v19, 0.0 }
  0xb4   : > { %v447_v27 = vmax.f32 %v374_v22, 0.0  ;;  %v455_v28 = vmax.f32 %v394_v24, 0.0 }
  0xb5   : > { %v494_v29 = vpack.c.bf16 %v462_v25, %v462_v25  ;;  %v502_v30 = vpack.c.bf16 %v470_v26, %v470_v26 }
  0xb6   : > { %v479_v31 = vpack.c.bf16 %v447_v27, %v447_v27  ;;  %v487_v32 = vpack.c.bf16 %v455_v28, %v455_v28 }
  0xb7   : > { %527 = vst.msk [vmem:[%s800_s27 + $0x4c] sm:$0xf] %vm507_vm3, %v494_v29 }
  0xb8   : > { %535 = vst.msk [vmem:[%s800_s27 + $0x6c] sm:$0xf] %vm507_vm3, %v502_v30  ;;  %v413_v33 = vpop.f32.mrf.mxu2  ;;  %v433_v34 = vpop.f32.mrf.mxu3 }
  0xb9   : > { %512 = vst.msk [vmem:[%s800_s27 + $0x10] sm:$0xf] %vm507_vm3, %v479_v31  ;;  %v414_v35 = vadd.f32 %v791_v23, %v413_v33  ;;  %v434_v36 = vadd.f32 %v791_v23, %v433_v34  ;;  %v375_v37 = vpop.f32.mrf.mxu0  ;;  %v395_v38 = vpop.f32.mrf.mxu1 }
  0xba   : > { %520 = vst.msk [vmem:[%s800_s27 + $0x30] sm:$0xf] %vm507_vm3, %v487_v32  ;;  %v376_v39 = vadd.f32 %v791_v23, %v375_v37  ;;  %v396_v40 = vadd.f32 %v791_v23, %v395_v38 }
  0xbb   : > { %v463_v41 = vmax.f32 %v414_v35, 0.0  ;;  %v471_v42 = vmax.f32 %v434_v36, 0.0 }
  0xbc   : > { %v448_v43 = vmax.f32 %v376_v39, 0.0  ;;  %v456_v44 = vmax.f32 %v396_v40, 0.0 }
  0xbd   : > { %v495_v45 = vpack.c.bf16 %v463_v41, %v463_v41  ;;  %v503_v46 = vpack.c.bf16 %v471_v42, %v471_v42 }
  0xbe   : > { %v480_v47 = vpack.c.bf16 %v448_v43, %v448_v43  ;;  %v488_v48 = vpack.c.bf16 %v456_v44, %v456_v44 }
  0xbf   : > { %528 = vst.msk [vmem:[%s800_s27 + $0x50] sm:$0xf] %vm507_vm3, %v495_v45 }
  0xc0   : > { %536 = vst.msk [vmem:[%s800_s27 + $0x70] sm:$0xf] %vm507_vm3, %v503_v46  ;;  %v415_v49 = vpop.f32.mrf.mxu2  ;;  %v435_v50 = vpop.f32.mrf.mxu3 }
  0xc1   : > { %513 = vst.msk [vmem:[%s800_s27 + $0x14] sm:$0xf] %vm507_vm3, %v480_v47  ;;  %v416_v51 = vadd.f32 %v791_v23, %v415_v49  ;;  %v436_v52 = vadd.f32 %v791_v23, %v435_v50  ;;  %v378_v53 = vpop.f32.mrf.mxu0  ;;  %v398_v54 = vpop.f32.mrf.mxu1 }
  0xc2   : > { %521 = vst.msk [vmem:[%s800_s27 + $0x34] sm:$0xf] %vm507_vm3, %v488_v48  ;;  %v379_v55 = vadd.f32 %v791_v23, %v378_v53  ;;  %v399_v56 = vadd.f32 %v791_v23, %v398_v54 }
  0xc3   : > { %v464_v57 = vmax.f32 %v416_v51, 0.0  ;;  %v472_v58 = vmax.f32 %v436_v52, 0.0 }
  0xc4   : > { %v449_v59 = vmax.f32 %v379_v55, 0.0  ;;  %v457_v60 = vmax.f32 %v399_v56, 0.0 }
  0xc5   : > { %v496_v61 = vpack.c.bf16 %v464_v57, %v464_v57  ;;  %v504_v62 = vpack.c.bf16 %v472_v58, %v472_v58 }
  0xc6   : > { %v481_v63 = vpack.c.bf16 %v449_v59, %v449_v59  ;;  %v489_v0 = vpack.c.bf16 %v457_v60, %v457_v60 }
  0xc7   : > { %529 = vst.msk [vmem:[%s800_s27 + $0x54] sm:$0xf] %vm507_vm3, %v496_v61 }
  0xc8   : > { %537 = vst.msk [vmem:[%s800_s27 + $0x74] sm:$0xf] %vm507_vm3, %v504_v62  ;;  %v418_v1 = vpop.f32.mrf.mxu2  ;;  %v438_v2 = vpop.f32.mrf.mxu3 }
  0xc9   : > { %514 = vst.msk [vmem:[%s800_s27 + $0x18] sm:$0xf] %vm507_vm3, %v481_v63  ;;  %v419_v3 = vadd.f32 %v791_v23, %v418_v1  ;;  %v439_v4 = vadd.f32 %v791_v23, %v438_v2  ;;  %v380_v5 = vpop.f32.mrf.mxu0  ;;  %v400_v6 = vpop.f32.mrf.mxu1 }
  0xca   : > { %522 = vst.msk [vmem:[%s800_s27 + $0x38] sm:$0xf] %vm507_vm3, %v489_v0  ;;  %v381_v7 = vadd.f32 %v791_v23, %v380_v5  ;;  %v401_v8 = vadd.f32 %v791_v23, %v400_v6 }
  0xcb   : > { %v465_v9 = vmax.f32 %v419_v3, 0.0  ;;  %v473_v10 = vmax.f32 %v439_v4, 0.0 }
  0xcc   : > { %v450_v11 = vmax.f32 %v381_v7, 0.0  ;;  %v458_v12 = vmax.f32 %v401_v8, 0.0 }
  0xcd   : > { %v497_v13 = vpack.c.bf16 %v465_v9, %v465_v9  ;;  %v505_v14 = vpack.c.bf16 %v473_v10, %v473_v10 }
  0xce   : > { %v482_v15 = vpack.c.bf16 %v450_v11, %v450_v11  ;;  %v490_v16 = vpack.c.bf16 %v458_v12, %v458_v12 }
  0xcf   : > { %530 = vst.msk [vmem:[%s800_s27 + $0x58] sm:$0xf] %vm507_vm3, %v497_v13 }
  0xd0   : > { %538 = vst.msk [vmem:[%s800_s27 + $0x78] sm:$0xf] %vm507_vm3, %v505_v14  ;;  %v420_v17 = vpop.f32.mrf.mxu2  ;;  %v440_v18 = vpop.f32.mrf.mxu3 }
  0xd1   : > { %515 = vst.msk [vmem:[%s800_s27 + $0x1c] sm:$0xf] %vm507_vm3, %v482_v15  ;;  %v421_v19 = vadd.f32 %v791_v23, %v420_v17  ;;  %v441_v20 = vadd.f32 %v791_v23, %v440_v18 }
  0xd2   : > { %523 = vst.msk [vmem:[%s800_s27 + $0x3c] sm:$0xf] %vm507_vm3, %v490_v16 }
  0xd3   : > { %v466_v21 = vmax.f32 %v421_v19, 0.0  ;;  %v474_v22 = vmax.f32 %v441_v20, 0.0 }
  0xd5   : > { %v498_v24 = vpack.c.bf16 %v466_v21, %v466_v21  ;;  %v506_v25 = vpack.c.bf16 %v474_v22, %v474_v22 }
  0xd7   : > { %531 = vst.msk [vmem:[%s800_s27 + $0x5c] sm:$0xf] %vm507_vm3, %v498_v24 }
  0xd8   : > { %539 = vst.msk [vmem:[%s800_s27 + $0x7c] sm:$0xf] %vm507_vm3, %v506_v25 }
  0xd9 PF: > { %s13_s12 = sadd.s32 1, %s727_s12  }
  0xda   : > { %p10_p4 = scmp.ge.s32.totalorder %s13_s12, 10  }
  0xdc   :  { %12 = sbr.rel (!%p10_p4) target bundleno = 1 (0x1), region = 62 }

// kernel: motor_det_net.8
= control target key start
LH: loop header
LB: loop body
LE: loop exit
PB: predicated region body
PF: predicated region fallthrough
CT: control target
= control target key end

     0   :  { %s1512_s12 = smov 0   ;;  %s1852_s0 = inlined_call_operand.vmem [shape: bf16[512,288], index: 0, kind: input, shape index: {}]   ;;  %s1853_s1 = inlined_call_operand.vmem [shape: bf16[288,32], index: 1, kind: input, shape index: {}]   ;;  %s1854_s2 = inlined_call_operand.vmem [shape: f32[1,32], index: 2, kind: input, shape index: {}]   ;;  %s1855_s3 = inlined_call_operand.vmem [shape: bf16[512,32], index: 3, kind: output, shape index: {}]  }
   0x1 LB: > { %s1099_s13 = sadd.s32 4294967295, %s1490_s12   ;;  %p1103_p0 = scmp.ge.s32.totalorder %s1490_s12, 1  ;;  %s1490_s12 = sphi %s1512_s12, %s13_s12  }
   0x2   : > { %p139_p1 = scmp.lt.s32.totalorder %s1490_s12, 3 }
   0x4   : > { %p140_p2 = pnand %p1103_p0, %p139_p1 }
   0x5   : > { %s1104_s20 = sshll.u32 (!%p140_p2), %s1099_s13, 5 }
   0x6   : > { %143 = sbr.rel (%p140_p2) target bundleno = 376 (0x178), region = 32  ;;  %p165_p3 = scmp.lt.s32.totalorder (!%p140_p2), %s1104_s20, 63 }
   0xb   : > { %v1445_v0 = vld [vmem:[%s1853_s1 + $0x38] sm:$0xff]  ;;  %v1526_v1 = vld [vmem:[%s1853_s1 + $0x88] sm:$0xff]  ;;  %v1444_v3 = vld [vmem:[%s1853_s1 + $0x30] sm:$0xff]  ;;  %s1857_s20 = smov (!%p165_p3, %s1104_s20), 63  ;;  %vm630_vm0 = vcmask 261120   ;;  %vm1010_vm1 = vcmask 257024  }
   0xc   : > { %v1531_v2 = vld [vmem:[%s1853_s1 + $0x78] sm:$0xff]  ;;  %679 = vmatpush.bf16.msra.mxu0 %v1445_v0  ;;  %1456 = vmatpush.bf16.msra.mxu3 %v1445_v0  ;;  %v1541_v4 = vld [vmem:[%s1853_s1 + $0x80] sm:$0xff]  ;;  %v1452_v5 = vld [vmem:[%s1853_s1 + $0x70] sm:$0xff]  ;;  %s1474_s27 = smul.u32 12, %s1857_s20  ;;  %s1107_s6 = sshll.u32 %s1857_s20, 2 }
   0xd   : > { %863 = vmatpush.bf16.msra.mxu2 %v1526_v1  ;;  %768 = vmatpush.bf16.msra.mxu1 %v1531_v2  ;;  %v1443_v6 = vld [vmem:[%s1853_s1 + $0x28] sm:$0xff]  ;;  %v1442_v11 = vld [vmem:[%s1853_s1 + $0x20] sm:$0xff]  ;;  %v1441_v13 = vld [vmem:[%s1853_s1 + $0x18] sm:$0xff]  ;;  %s1693_s9 = scalar_lea.vmem %s1855_s3, %s1107_s6 }
   0xe   : > { %s1556_s5 = scalar_lea.vmem %s1852_s0, %s1474_s27  ;;  %v1451_v7 = vld [vmem:[%s1853_s1 + $0x68] sm:$0xff]  ;;  %v1450_v12 = vld [vmem:[%s1853_s1 + $0x60] sm:$0xff]  ;;  %v1449_v14 = vld [vmem:[%s1853_s1 + $0x58] sm:$0xff] }
   0xf   : > { %v1118_v8 = vld [vmem:[%s1556_s5 + $0x8] sm:$0xf]  ;;  %v1392_v9 = vld [vmem:[%s1556_s5 + $0x10] sm:$0xf0]  ;;  %v1130_v17 = vld [vmem:[%s1556_s5 + $0x20] sm:$0xf] }
  0x10   : > { %680 = vmatpush.bf16.msra.mxu0 %v1444_v3  ;;  %1457 = vmatpush.bf16.msra.mxu3 %v1444_v3  ;;  %v1119_v10 = vor.u32 %v1392_v9, %v1118_v8  ;;  %v1440_v15 = vld [vmem:[%s1853_s1 + $0x10] sm:$0xff]  ;;  %v1395_v18 = vld [vmem:[%s1556_s5 + $0x28] sm:$0xf0]  ;;  %v1438_v22 = vld [vmem:[%s1853_s1] sm:$0xff] }
  0x11   : > { %864 = vmatpush.bf16.msra.mxu2 %v1541_v4  ;;  %769 = vmatpush.bf16.msra.mxu1 %v1452_v5  ;;  %v1448_v16 = vld [vmem:[%s1853_s1 + $0x50] sm:$0xff]  ;;  %v1439_v19 = vld [vmem:[%s1853_s1 + $0x8] sm:$0xff]  ;;  %v1131_v20 = vor.u32 %v1395_v18, %v1130_v17  ;;  %v1110_v23 = vld [vmem:[%s1556_s5] sm:$0xf] }
  0x12   : > { %v1447_v21 = vld [vmem:[%s1853_s1 + $0x48] sm:$0xff]  ;;  %v1254_v25 = vld [vmem:[%s1556_s5 + $0x120] sm:$0xf]  ;;  %v1390_v28 = vld [vmem:[%s1556_s5 + $0x4] sm:$0xf] }
  0x13   : > { %v1391_v24 = vld [vmem:[%s1556_s5 + $0x8] sm:$0xf0]  ;;  %v1446_v27 = vld [vmem:[%s1853_s1 + $0x40] sm:$0xff]  ;;  %v1112_v29 = vld [vmem:[%s1556_s5 + $0xc] sm:$0xf0] }
  0x14   : > { %681 = vmatpush.bf16.msra.mxu0 %v1443_v6  ;;  %1458 = vmatpush.bf16.msra.mxu3 %v1443_v6  ;;  %v1427_v26 = vld [vmem:[%s1556_s5 + $0x128] sm:$0xf0]  ;;  %v1111_v30 = vor.u32 %v1391_v24, %v1110_v23  ;;  %v1115_v32 = vor.u32 %v1390_v28, %v1112_v29  ;;  %v1142_v33 = vld [vmem:[%s1556_s5 + $0x38] sm:$0xf]  ;;  %v1398_v34 = vld [vmem:[%s1556_s5 + $0x40] sm:$0xf0] }
  0x15   : > { %1372 = vmatmul.msk.bf16.vlgmr.msra.gmra.mxu2 %vm630_vm0, %v1119_v10  ;;  %770 = vmatpush.bf16.msra.mxu1 %v1451_v7  ;;  %v1255_v31 = vor.u32 %v1427_v26, %v1254_v25  ;;  %v1143_v35 = vor.u32 %v1398_v34, %v1142_v33  ;;  %v1122_v36 = vld [vmem:[%s1556_s5 + $0x18] sm:$0xf]  ;;  %v1394_v37 = vld [vmem:[%s1556_s5 + $0x20] sm:$0xf0]  ;;  %v1393_v40 = vld [vmem:[%s1556_s5 + $0x1c] sm:$0xf] }
  0x16   : > { %v1266_v38 = vld [vmem:[%s1556_s5 + $0x138] sm:$0xf]  ;;  %v1430_v39 = vld [vmem:[%s1556_s5 + $0x140] sm:$0xf0]  ;;  %v1124_v41 = vld [vmem:[%s1556_s5 + $0x24] sm:$0xf0]  ;;  %v1123_v42 = vor.u32 %v1394_v37, %v1122_v36 }
  0x17   : > { %v1267_v43 = vor.u32 %v1430_v39, %v1266_v38  ;;  %v1127_v44 = vor.u32 %v1393_v40, %v1124_v41  ;;  %v1154_v45 = vld [vmem:[%s1556_s5 + $0x50] sm:$0xf]  ;;  %v1401_v46 = vld [vmem:[%s1556_s5 + $0x58] sm:$0xf0]  ;;  %v1396_v52 = vld [vmem:[%s1556_s5 + $0x34] sm:$0xf] }
  0x18   : > { %682 = vmatpush.bf16.msra.mxu0 %v1442_v11  ;;  %1459 = vmatpush.bf16.msra.mxu3 %v1442_v11  ;;  %v1155_v47 = vor.u32 %v1401_v46, %v1154_v45  ;;  %v1134_v48 = vld [vmem:[%s1556_s5 + $0x30] sm:$0xf]  ;;  %v1397_v49 = vld [vmem:[%s1556_s5 + $0x38] sm:$0xf0]  ;;  %v1136_v53 = vld [vmem:[%s1556_s5 + $0x3c] sm:$0xf0] }
  0x19   : > { %771 = vmatpush.bf16.msra.mxu1 %v1450_v12  ;;  %v1278_v50 = vld [vmem:[%s1556_s5 + $0x150] sm:$0xf]  ;;  %v1433_v51 = vld [vmem:[%s1556_s5 + $0x158] sm:$0xf0]  ;;  %v1135_v54 = vor.u32 %v1397_v49, %v1134_v48  ;;  %v1139_v56 = vor.u32 %v1396_v52, %v1136_v53  ;;  %v1166_v57 = vld [vmem:[%s1556_s5 + $0x68] sm:$0xf] }
  0x1a   : > { %v1279_v55 = vor.u32 %v1433_v51, %v1278_v50  ;;  %v1404_v58 = vld [vmem:[%s1556_s5 + $0x70] sm:$0xf0]  ;;  %v1146_v60 = vld [vmem:[%s1556_s5 + $0x48] sm:$0xf]  ;;  %v1399_v0 = vld [vmem:[%s1556_s5 + $0x4c] sm:$0xf] }
  0x1b   : > { %v1167_v59 = vor.u32 %v1404_v58, %v1166_v57  ;;  %v1400_v61 = vld [vmem:[%s1556_s5 + $0x50] sm:$0xf0]  ;;  %v1290_v62 = vld [vmem:[%s1556_s5 + $0x168] sm:$0xf]  ;;  %v1407_v6 = vld [vmem:[%s1556_s5 + $0x88] sm:$0xf0] }
  0x1c   : > { %683 = vmatpush.bf16.msra.mxu0 %v1441_v13  ;;  %1460 = vmatpush.bf16.msra.mxu3 %v1441_v13  ;;  %v1436_v63 = vld [vmem:[%s1556_s5 + $0x170] sm:$0xf0]  ;;  %v1158_v8 = vld [vmem:[%s1556_s5 + $0x60] sm:$0xf]  ;;  %v1403_v9 = vld [vmem:[%s1556_s5 + $0x68] sm:$0xf0] }
  0x1d   : > { %772 = vmatpush.bf16.msra.mxu1 %v1449_v14  ;;  %v1291_v3 = vor.u32 %v1436_v63, %v1290_v62  ;;  %v1426_v10 = vld [vmem:[%s1556_s5 + $0x124] sm:$0xf]  ;;  %v1256_v11 = vld [vmem:[%s1556_s5 + $0x12c] sm:$0xf0]  ;;  %v1190_v17 = vld [vmem:[%s1556_s5 + $0x98] sm:$0xf] }
  0x1e   : > { %v1160_v13 = vld [vmem:[%s1556_s5 + $0x6c] sm:$0xf0]  ;;  %v1410_v18 = vld [vmem:[%s1556_s5 + $0xa0] sm:$0xf0]  ;;  %v1268_v23 = vld [vmem:[%s1556_s5 + $0x144] sm:$0xf0] }
  0x1f   : > { %v1405_v24 = vld [vmem:[%s1556_s5 + $0x7c] sm:$0xf]  ;;  %v1172_v25 = vld [vmem:[%s1556_s5 + $0x84] sm:$0xf0]  ;;  %v1202_v29 = vld [vmem:[%s1556_s5 + $0xb0] sm:$0xf] }
  0x20   : > { %684 = vmatpush.bf16.msra.mxu0 %v1440_v15  ;;  %1461 = vmatpush.bf16.msra.mxu3 %v1440_v15  ;;  %v1259_v15 = vor.u32 %v1426_v10, %v1256_v11  ;;  %v1175_v28 = vor.u32 %v1405_v24, %v1172_v25  ;;  %v1409_v33 = vld [vmem:[%s1556_s5 + $0x98] sm:$0xf0]  ;;  %v1432_v34 = vld [vmem:[%s1556_s5 + $0x154] sm:$0xf]  ;;  %v1184_v37 = vld [vmem:[%s1556_s5 + $0x9c] sm:$0xf0] }
  0x21   : > { %773 = vmatpush.bf16.msra.mxu1 %v1448_v16  ;;  %v1408_v36 = vld [vmem:[%s1556_s5 + $0x94] sm:$0xf]  ;;  %v1214_v41 = vld [vmem:[%s1556_s5 + $0xc8] sm:$0xf]  ;;  %v1435_v46 = vld [vmem:[%s1556_s5 + $0x16c] sm:$0xf] }
  0x22   : > { %v1187_v40 = vor.u32 %v1408_v36, %v1184_v37  ;;  %v1412_v45 = vld [vmem:[%s1556_s5 + $0xb0] sm:$0xf0]  ;;  %v1411_v48 = vld [vmem:[%s1556_s5 + $0xac] sm:$0xf]  ;;  %v1196_v49 = vld [vmem:[%s1556_s5 + $0xb4] sm:$0xf0] }
  0x23   : > { %v1199_v53 = vor.u32 %v1411_v48, %v1196_v49  ;;  %v1206_v58 = vld [vmem:[%s1556_s5 + $0xc0] sm:$0xf]  ;;  %v1414_v63 = vld [vmem:[%s1556_s5 + $0xc4] sm:$0xf]  ;;  %v1238_v11 = vld [vmem:[%s1556_s5 + $0xf8] sm:$0xf] }
  0x24   : > { %685 = vmatpush.bf16.msra.mxu0 %v1439_v19  ;;  %1462 = vmatpush.bf16.msra.mxu3 %v1439_v19  ;;  %v1191_v19 = vor.u32 %v1410_v18, %v1190_v17  ;;  %v1679_v62 = vld [vmem:[%s1854_s2] ss:$0 sm:$0xff]  ;;  %v1437_v24 = vld [vmem:[%s1556_s5 + $0x178] sm:$0xf0] }
  0x25   : > { %1373 = vmatmul.msk.bf16.gmra.mxu2 %vm630_vm0, %v1131_v20  ;;  %774 = vmatpush.bf16.msra.mxu1 %v1447_v21  ;;  %v1170_v20 = vld [vmem:[%s1556_s5 + $0x78] sm:$0xf] }
  0x28   : > { %686 = vmatpush.bf16.msra.mxu0 %v1438_v22  ;;  %1463 = vmatpush.bf16.msra.mxu3 %v1438_v22  ;;  %v1429_v22 = vld [vmem:[%s1556_s5 + $0x13c] sm:$0xf] }
  0x29   : > { %775 = vmatpush.bf16.msra.mxu1 %v1446_v27 }
  0x2b   : > { %687 = vmatmul.bf16.vlgmr.msra.gmra.mxu0 %v1111_v30  ;;  %747 = vmatmul.bf16.vlgmr.msra.gmra.mxu3 %v1255_v31  ;;  %v1413_v30 = vld [vmem:[%s1556_s5 + $0xb8] sm:$0xf0] }
  0x2c   : > { %1464 = vmatpush.bf16.msrb.mxu3 %v1531_v2  ;;  %776 = vmatmul.bf16.vlgmr.msra.gmra.mxu1 %v1115_v32  ;;  %v1147_v2 = vor.u32 %v1400_v61, %v1146_v60  ;;  %v1203_v31 = vor.u32 %v1413_v30, %v1202_v29  ;;  %v1182_v32 = vld [vmem:[%s1556_s5 + $0x90] sm:$0xf]  ;;  %v1286_v60 = vld [vmem:[%s1556_s5 + $0x158] sm:$0xf]  ;;  %v1434_v61 = vld [vmem:[%s1556_s5 + $0x160] sm:$0xf0] }
  0x2d   : > { %v1183_v38 = vor.u32 %v1409_v33, %v1182_v32 }
  0x30   : > { %1465 = vmatpush.bf16.msrb.mxu3 %v1452_v5  ;;  %v1178_v5 = vld [vmem:[%s1556_s5 + $0x80] sm:$0xf] }
  0x34   : > { %1466 = vmatpush.bf16.msrb.mxu3 %v1451_v7  ;;  %v1179_v7 = vor.u32 %v1407_v6, %v1178_v5 }
  0x35   : > { %1374 = vmatmul.msk.bf16.gmra.mxu2 %vm630_vm0, %v1143_v35  ;;  %v1280_v35 = vld [vmem:[%s1556_s5 + $0x15c] sm:$0xf0] }
  0x36   : > { %v1283_v39 = vor.u32 %v1432_v34, %v1280_v35 }
  0x38   : > { %1467 = vmatpush.bf16.msrb.mxu3 %v1450_v12  ;;  %v1402_v12 = vld [vmem:[%s1556_s5 + $0x64] sm:$0xf] }
  0x3b   : > { %692 = vmatmul.bf16.gmra.mxu0 %v1123_v42  ;;  %752 = vmatmul.bf16.gmra.mxu3 %v1267_v43  ;;  %v1416_v42 = vld [vmem:[%s1556_s5 + $0xd0] sm:$0xf0] }
  0x3c   : > { %1468 = vmatpush.bf16.msrb.mxu3 %v1449_v14  ;;  %781 = vmatmul.bf16.gmra.mxu1 %v1127_v44  ;;  %v1159_v14 = vor.u32 %v1403_v9, %v1158_v8  ;;  %v1215_v43 = vor.u32 %v1416_v42, %v1214_v41  ;;  %v1194_v44 = vld [vmem:[%s1556_s5 + $0xa8] sm:$0xf]  ;;  %v1250_v41 = vld [vmem:[%s1556_s5 + $0x110] sm:$0xf]  ;;  %v1425_v42 = vld [vmem:[%s1556_s5 + $0x118] sm:$0xf0] }
  0x3d   : > { %v1195_v50 = vor.u32 %v1412_v45, %v1194_v44  ;;  %v1251_v49 = vor.u32 %v1425_v42, %v1250_v41 }
  0x40   : > { %1469 = vmatpush.bf16.msrb.mxu3 %v1448_v16  ;;  %v1163_v16 = vor.u32 %v1402_v12, %v1160_v13  ;;  %v1422_v12 = vld [vmem:[%s1556_s5 + $0x100] sm:$0xf0] }
  0x44   : > { %1470 = vmatpush.bf16.msrb.mxu3 %v1447_v21  ;;  %v1406_v21 = vld [vmem:[%s1556_s5 + $0x80] sm:$0xf0] }
  0x45   : > { %1375 = vmatmul.msk.bf16.gmra.mxu2 %vm630_vm0, %v1155_v47  ;;  %v1171_v26 = vor.u32 %v1406_v21, %v1170_v20  ;;  %v1292_v47 = vld [vmem:[%s1556_s5 + $0x174] sm:$0xf0] }
  0x46   : > { %v1295_v51 = vor.u32 %v1435_v46, %v1292_v47  ;;  %v1218_v21 = vld [vmem:[%s1556_s5 + $0xd8] sm:$0xf] }
  0x48   : > { %1471 = vmatpush.bf16.msrb.mxu3 %v1446_v27  ;;  %v1271_v27 = vor.u32 %v1429_v22, %v1268_v23  ;;  %v1418_v22 = vld [vmem:[%s1556_s5 + $0xe0] sm:$0xf0]  ;;  %v1298_v23 = vld [vmem:[%s1556_s5 + $0x170] sm:$0xf] }
  0x49   : > { %v1219_v30 = vor.u32 %v1418_v22, %v1218_v21 }
  0x4b   : > { %697 = vmatmul.bf16.gmra.mxu0 %v1135_v54  ;;  %757 = vmatmul.bf16.gmra.mxu3 %v1279_v55  ;;  %v1226_v54 = vld [vmem:[%s1556_s5 + $0xe0] sm:$0xf]  ;;  %v1419_v55 = vld [vmem:[%s1556_s5 + $0xe8] sm:$0xf0] }
  0x4c   : > { %1472 = vmatpush.bf16.msra.mxu3 %v1526_v1  ;;  %786 = vmatmul.bf16.gmra.mxu1 %v1139_v56  ;;  %v1148_v1 = vld [vmem:[%s1556_s5 + $0x54] sm:$0xf0]  ;;  %v1227_v57 = vor.u32 %v1419_v55, %v1226_v54  ;;  %v1420_v54 = vld [vmem:[%s1556_s5 + $0xf4] sm:$0xf]  ;;  %v1232_v55 = vld [vmem:[%s1556_s5 + $0xfc] sm:$0xf0] }
  0x50   : > { %1473 = vmatpush.bf16.msra.mxu3 %v1541_v4  ;;  %v1151_v4 = vor.u32 %v1399_v0, %v1148_v1  ;;  %v1208_v0 = vld [vmem:[%s1556_s5 + $0xcc] sm:$0xf0] }
  0x51   : > { %v1211_v5 = vor.u32 %v1414_v63, %v1208_v0 }
  0x55   : > { %1376 = vmatmul.msk.bf16.gmra.mxu2 %vm630_vm0, %v1167_v59  ;;  %v1415_v59 = vld [vmem:[%s1556_s5 + $0xc8] sm:$0xf0] }
  0x56   : > { %v1207_v1 = vor.u32 %v1415_v59, %v1206_v58 }
  0x5b   : > { %702 = vmatmul.bf16.gmra.mxu0 %v1147_v2  ;;  %762 = vmatmul.bf16.gmra.mxu3 %v1291_v3  ;;  %v1287_v2 = vor.u32 %v1434_v61, %v1286_v60  ;;  %v1235_v61 = vor.u32 %v1420_v54, %v1232_v55 }
  0x5c   : > { %791 = vmatmul.bf16.gmra.mxu1 %v1151_v4 }
  0x65   : > { %1377 = vmatmul.msk.bf16.gmra.mxu2 %vm630_vm0, %v1179_v7 }
  0x6b   : > { %707 = vmatmul.bf16.gmra.mxu0 %v1159_v14  ;;  %836 = vmatmul.bf16.vlgmr.msrb.gmra.mxu3 %v1259_v15 }
  0x6c   : > { %796 = vmatmul.bf16.gmra.mxu1 %v1163_v16 }
  0x75   : > { %1378 = vmatmul.msk.bf16.gmra.mxu2 %vm630_vm0, %v1191_v19  ;;  %v1239_v19 = vor.u32 %v1422_v12, %v1238_v11 }
  0x7b   : > { %712 = vmatmul.bf16.gmra.mxu0 %v1171_v26  ;;  %841 = vmatmul.bf16.gmra.mxu3 %v1271_v27  ;;  %v1417_v26 = vld [vmem:[%s1556_s5 + $0xdc] sm:$0xf]  ;;  %v1220_v27 = vld [vmem:[%s1556_s5 + $0xe4] sm:$0xf0] }
  0x7c   : > { %801 = vmatmul.bf16.gmra.mxu1 %v1175_v28  ;;  %v1223_v34 = vor.u32 %v1417_v26, %v1220_v27 }
  0x85   : > { %1379 = vmatmul.msk.bf16.gmra.mxu2 %vm630_vm0, %v1203_v31  ;;  %v1299_v31 = vor.u32 %v1437_v24, %v1298_v23 }
  0x8b   : > { %717 = vmatmul.bf16.gmra.mxu0 %v1183_v38  ;;  %846 = vmatmul.bf16.gmra.mxu3 %v1283_v39 }
  0x8c   : > { %806 = vmatmul.bf16.gmra.mxu1 %v1187_v40 }
  0x95   : > { %1380 = vmatmul.msk.bf16.gmra.mxu2 %vm630_vm0, %v1215_v43 }
  0x98   : > { %v866_v52 = vpop.f32.mrf.mxu2 }
  0x9b   : > { %722 = vmatmul.bf16.gmra.mxu0 %v1195_v50  ;;  %851 = vmatmul.bf16.gmra.mxu3 %v1295_v51  ;;  %v1230_v51 = vld [vmem:[%s1556_s5 + $0xf0] sm:$0xf] }
  0x9c   : > { %811 = vmatmul.bf16.gmra.mxu1 %v1199_v53 }
  0xa0   : > { %v868_v56 = vpop.f32.mrf.mxu2 }
  0xa5   : > { %1381 = vmatmul.msk.bf16.gmra.mxu2 %vm630_vm0, %v1227_v57 }
  0xa8   : > { %v871_v3 = vpop.f32.mrf.mxu2  ;;  %v688_v4 = vpop.f32.mrf.mxu0 }
  0xa9   : > { %v689_v6 = vadd.f32 %v1679_v62, %v688_v4  ;;  %v777_v7 = vpop.f32.mrf.mxu1 }
  0xab   : > { %v778_v8 = vadd.f32 %v777_v7, %v689_v6  ;;  %727 = vmatmul.bf16.gmra.mxu0 %v1207_v1  ;;  %1386 = vmatmul.msk.bf16.vlgmr.msra.gmra.mxu3 %vm630_vm0, %v1287_v2  ;;  %v1428_v6 = vld [vmem:[%s1556_s5 + $0x130] sm:$0xf0] }
  0xac   : > { %816 = vmatmul.bf16.gmra.mxu1 %v1211_v5  ;;  %v1262_v5 = vld [vmem:[%s1556_s5 + $0x128] sm:$0xf] }
  0xad   : > { %v867_v9 = vadd.f32 %v866_v52, %v778_v8  ;;  %v1421_v52 = vld [vmem:[%s1556_s5 + $0xf8] sm:$0xf0] }
  0xae   : > { %v1686_v10 = vpop.f32.mrf.mxu3  ;;  %v1231_v58 = vor.u32 %v1421_v52, %v1230_v51 }
  0xaf   : > { %v946_v13 = vmax.f32 %v867_v9, 0.0  ;;  %v749_v54 = vadd.f32 %v1679_v62, %v1686_v10 }
  0xb0   : > { %v873_v14 = vpop.f32.mrf.mxu2  ;;  %v690_v15 = vpop.f32.mrf.mxu0 }
  0xb1   : > { %v978_v16 = vpack.c.bf16 %v946_v13, %v946_v13  ;;  %v691_v17 = vadd.f32 %v1679_v62, %v690_v15  ;;  %v779_v18 = vpop.f32.mrf.mxu1 }
  0xb3   : > { %1011 = vst.msk [vmem:[%s1693_s9] sm:$0xf] %vm1010_vm1, %v978_v16  ;;  %v780_v20 = vadd.f32 %v779_v18, %v691_v17  ;;  %v1242_v16 = vld [vmem:[%s1556_s5 + $0x108] sm:$0xf]  ;;  %v1424_v17 = vld [vmem:[%s1556_s5 + $0x110] sm:$0xf0] }
  0xb4   : > { %v1243_v23 = vor.u32 %v1424_v17, %v1242_v16 }
  0xb5   : > { %v869_v25 = vadd.f32 %v868_v56, %v780_v20  ;;  %1382 = vmatmul.msk.bf16.gmra.mxu2 %vm630_vm0, %v1239_v19  ;;  %v1423_v19 = vld [vmem:[%s1556_s5 + $0x10c] sm:$0xf]  ;;  %v1244_v20 = vld [vmem:[%s1556_s5 + $0x114] sm:$0xf0] }
  0xb6   : > { %v1705_v28 = vpop.f32.mrf.mxu3  ;;  %v1247_v26 = vor.u32 %v1423_v19, %v1244_v20 }
  0xb7   : > { %v947_v29 = vmax.f32 %v869_v25, 0.0 }
  0xb8   : > { %v876_v32 = vpop.f32.mrf.mxu2  ;;  %v693_v33 = vpop.f32.mrf.mxu0 }
  0xb9   : > { %v979_v35 = vpack.c.bf16 %v947_v29, %v947_v29  ;;  %v694_v36 = vadd.f32 %v1679_v62, %v693_v33  ;;  %v782_v37 = vpop.f32.mrf.mxu1 }
  0xbb   : > { %1012 = vst.msk [vmem:[%s1693_s9 + $0x4] sm:$0xf] %vm1010_vm1, %v979_v35  ;;  %v783_v38 = vadd.f32 %v782_v37, %v694_v36  ;;  %732 = vmatmul.bf16.gmra.mxu0 %v1219_v30  ;;  %1387 = vmatmul.msk.bf16.gmra.mxu3 %vm630_vm0, %v1299_v31  ;;  %v1431_v35 = vld [vmem:[%s1556_s5 + $0x148] sm:$0xf0] }
  0xbc   : > { %821 = vmatmul.bf16.gmra.mxu1 %v1223_v34  ;;  %v1274_v34 = vld [vmem:[%s1556_s5 + $0x140] sm:$0xf] }
  0xbd   : > { %v872_v39 = vadd.f32 %v871_v3, %v783_v38 }
  0xbe   : > { %v1711_v40 = vpop.f32.mrf.mxu3 }
  0xbf   : > { %v948_v43 = vmax.f32 %v872_v39, 0.0 }
  0xc0   : > { %v878_v44 = vpop.f32.mrf.mxu2  ;;  %v695_v45 = vpop.f32.mrf.mxu0 }
  0xc1   : > { %v980_v46 = vpack.c.bf16 %v948_v43, %v948_v43  ;;  %v696_v47 = vadd.f32 %v1679_v62, %v695_v45  ;;  %v784_v48 = vpop.f32.mrf.mxu1  ;;  %v1275_v43 = vor.u32 %v1431_v35, %v1274_v34 }
  0xc3   : > { %1013 = vst.msk [vmem:[%s1693_s9 + $0x8] sm:$0xf] %vm1010_vm1, %v980_v46  ;;  %v785_v50 = vadd.f32 %v784_v48, %v696_v47 }
  0xc5   : > { %v874_v53 = vadd.f32 %v873_v14, %v785_v50  ;;  %1383 = vmatmul.msk.bf16.gmra.mxu2 %vm630_vm0, %v1251_v49  ;;  %v1263_v14 = vor.u32 %v1428_v6, %v1262_v5 }
  0xc6   : > { %v1723_v56 = vpop.f32.mrf.mxu3 }
  0xc7   : > { %v949_v57 = vmax.f32 %v874_v53, 0.0 }
  0xc8   : > { %v881_v59 = vpop.f32.mrf.mxu2  ;;  %v698_v60 = vpop.f32.mrf.mxu0 }
  0xc9   : > { %v981_v63 = vpack.c.bf16 %v949_v57, %v949_v57  ;;  %v699_v0 = vadd.f32 %v1679_v62, %v698_v60  ;;  %v787_v1 = vpop.f32.mrf.mxu1 }
  0xcb   : > { %1014 = vst.msk [vmem:[%s1693_s9 + $0xc] sm:$0xf] %vm1010_vm1, %v981_v63  ;;  %v788_v2 = vadd.f32 %v787_v1, %v699_v0  ;;  %737 = vmatmul.bf16.gmra.mxu0 %v1231_v58 }
  0xcc   : > { %826 = vmatmul.bf16.gmra.mxu1 %v1235_v61 }
  0xcd   : > { %v877_v3 = vadd.f32 %v876_v32, %v788_v2 }
  0xce   : > { %v1728_v4 = vpop.f32.mrf.mxu3 }
  0xcf   : > { %v950_v7 = vmax.f32 %v877_v3, 0.0  ;;  %v751_v3 = vadd.f32 %v1679_v62, %v1705_v28 }
  0xd0   : > { %v883_v8 = vpop.f32.mrf.mxu2  ;;  %v700_v9 = vpop.f32.mrf.mxu0 }
  0xd1   : > { %v982_v11 = vpack.c.bf16 %v950_v7, %v950_v7  ;;  %v701_v12 = vadd.f32 %v1679_v62, %v700_v9  ;;  %v789_v13 = vpop.f32.mrf.mxu1 }
  0xd3   : > { %1015 = vst.msk [vmem:[%s1693_s9 + $0x10] sm:$0xf] %vm1010_vm1, %v982_v11  ;;  %v790_v15 = vadd.f32 %v789_v13, %v701_v12 }
  0xd5   : > { %v879_v18 = vadd.f32 %v878_v44, %v790_v15  ;;  %1384 = vmatmul.msk.bf16.gmra.mxu2 %vm630_vm0, %v1263_v14  ;;  %v754_v15 = vadd.f32 %v1679_v62, %v1711_v40 }
  0xd6   : > { %v1740_v21 = vpop.f32.mrf.mxu3 }
  0xd7   : > { %v951_v22 = vmax.f32 %v879_v18, 0.0 }
  0xd8   : > { %v886_v24 = vpop.f32.mrf.mxu2  ;;  %v703_v25 = vpop.f32.mrf.mxu0 }
  0xd9   : > { %v983_v27 = vpack.c.bf16 %v951_v22, %v951_v22  ;;  %v704_v29 = vadd.f32 %v1679_v62, %v703_v25  ;;  %v792_v30 = vpop.f32.mrf.mxu1 }
  0xdb   : > { %1016 = vst.msk [vmem:[%s1693_s9 + $0x14] sm:$0xf] %vm1010_vm1, %v983_v27  ;;  %v793_v31 = vadd.f32 %v792_v30, %v704_v29  ;;  %742 = vmatmul.bf16.gmra.mxu0 %v1243_v23 }
  0xdc   : > { %831 = vmatmul.bf16.gmra.mxu1 %v1247_v26  ;;  %v756_v26 = vadd.f32 %v1679_v62, %v1723_v56 }
  0xdd   : > { %v882_v32 = vadd.f32 %v881_v59, %v793_v31 }
  0xde   : > { %v1745_v33 = vpop.f32.mrf.mxu3 }
  0xdf   : > { %v952_v36 = vmax.f32 %v882_v32, 0.0 }
  0xe0   : > { %v888_v37 = vpop.f32.mrf.mxu2  ;;  %v705_v38 = vpop.f32.mrf.mxu0 }
  0xe1   : > { %v984_v39 = vpack.c.bf16 %v952_v36, %v952_v36  ;;  %v706_v41 = vadd.f32 %v1679_v62, %v705_v38  ;;  %v794_v42 = vpop.f32.mrf.mxu1 }
  0xe3   : > { %1017 = vst.msk [vmem:[%s1693_s9 + $0x18] sm:$0xf] %vm1010_vm1, %v984_v39  ;;  %v795_v44 = vadd.f32 %v794_v42, %v706_v41 }
  0xe5   : > { %v884_v45 = vadd.f32 %v883_v8, %v795_v44  ;;  %1385 = vmatmul.msk.bf16.gmra.mxu2 %vm630_vm0, %v1275_v43 }
  0xe6   : > { %v1753_v46 = vpop.f32.mrf.mxu3 }
  0xe7   : > { %v953_v47 = vmax.f32 %v884_v45, 0.0 }
  0xe8   : > { %v891_v48 = vpop.f32.mrf.mxu2  ;;  %v708_v49 = vpop.f32.mrf.mxu0 }
  0xe9   : > { %v985_v50 = vpack.c.bf16 %v953_v47, %v953_v47  ;;  %v709_v51 = vadd.f32 %v1679_v62, %v708_v49  ;;  %v797_v52 = vpop.f32.mrf.mxu1 }
  0xeb   : > { %1018 = vst.msk [vmem:[%s1693_s9 + $0x1c] sm:$0xf] %vm1010_vm1, %v985_v50  ;;  %v798_v53 = vadd.f32 %v797_v52, %v709_v51 }
  0xed   : > { %v887_v55 = vadd.f32 %v886_v24, %v798_v53 }
  0xee   : > { %v837_v57 = vpop.f32.mrf.mxu3 }
  0xef   : > { %v954_v58 = vmax.f32 %v887_v55, 0.0  ;;  %v1760_v59 = vadd.f32 %v837_v57, %v749_v54 }
  0xf0   : > { %v893_v60 = vpop.f32.mrf.mxu2  ;;  %v710_v61 = vpop.f32.mrf.mxu0 }
  0xf1   : > { %v986_v63 = vpack.c.bf16 %v954_v58, %v954_v58  ;;  %v711_v0 = vadd.f32 %v1679_v62, %v710_v61  ;;  %v799_v1 = vpop.f32.mrf.mxu1 }
  0xf3   : > { %1019 = vst.msk [vmem:[%s1693_s9 + $0x20] sm:$0xf] %vm1010_vm1, %v986_v63  ;;  %v800_v2 = vadd.f32 %v799_v1, %v711_v0 }
  0xf5   : > { %v889_v5 = vadd.f32 %v888_v37, %v800_v2 }
  0xf6   : > { %v839_v10 = vpop.f32.mrf.mxu3 }
  0xf7   : > { %v955_v6 = vmax.f32 %v889_v5, 0.0  ;;  %v1767_v7 = vadd.f32 %v839_v10, %v751_v3 }
  0xf8   : > { %v896_v8 = vpop.f32.mrf.mxu2  ;;  %v713_v9 = vpop.f32.mrf.mxu0 }
  0xf9   : > { %v987_v11 = vpack.c.bf16 %v955_v6, %v955_v6  ;;  %v714_v12 = vadd.f32 %v1679_v62, %v713_v9  ;;  %v802_v13 = vpop.f32.mrf.mxu1 }
  0xfb   : > { %1020 = vst.msk [vmem:[%s1693_s9 + $0x24] sm:$0xf] %vm1010_vm1, %v987_v11  ;;  %v803_v14 = vadd.f32 %v802_v13, %v714_v12 }
  0xfd   : > { %v892_v16 = vadd.f32 %v891_v48, %v803_v14 }
  0xfe   : > { %v842_v28 = vpop.f32.mrf.mxu3 }
  0xff   : > { %v956_v17 = vmax.f32 %v892_v16, 0.0  ;;  %v1774_v18 = vadd.f32 %v842_v28, %v754_v15  ;;  %v759_v15 = vadd.f32 %v1679_v62, %v1728_v4 }
 0x100   : > { %v898_v19 = vpop.f32.mrf.mxu2  ;;  %v715_v20 = vpop.f32.mrf.mxu0 }
 0x101   : > { %v988_v22 = vpack.c.bf16 %v956_v17, %v956_v17  ;;  %v716_v23 = vadd.f32 %v1679_v62, %v715_v20  ;;  %v804_v24 = vpop.f32.mrf.mxu1 }
 0x103   : > { %1021 = vst.msk [vmem:[%s1693_s9 + $0x28] sm:$0xf] %vm1010_vm1, %v988_v22  ;;  %v805_v25 = vadd.f32 %v804_v24, %v716_v23 }
 0x105   : > { %v894_v27 = vadd.f32 %v893_v60, %v805_v25 }
 0x106   : > { %v844_v40 = vpop.f32.mrf.mxu3 }
 0x107   : > { %v957_v29 = vmax.f32 %v894_v27, 0.0  ;;  %v1781_v30 = vadd.f32 %v844_v40, %v756_v26 }
 0x108   : > { %v901_v31 = vpop.f32.mrf.mxu2  ;;  %v718_v32 = vpop.f32.mrf.mxu0 }
 0x109   : > { %v989_v34 = vpack.c.bf16 %v957_v29, %v957_v29  ;;  %v719_v35 = vadd.f32 %v1679_v62, %v718_v32  ;;  %v807_v36 = vpop.f32.mrf.mxu1  ;;  %v761_v29 = vadd.f32 %v1679_v62, %v1740_v21 }
 0x10b   : > { %1022 = vst.msk [vmem:[%s1693_s9 + $0x2c] sm:$0xf] %vm1010_vm1, %v989_v34  ;;  %v808_v37 = vadd.f32 %v807_v36, %v719_v35 }
 0x10d   : > { %v897_v38 = vadd.f32 %v896_v8, %v808_v37 }
 0x10e   : > { %v847_v39 = vpop.f32.mrf.mxu3 }
 0x10f   : > { %v958_v41 = vmax.f32 %v897_v38, 0.0  ;;  %v848_v28 = vadd.f32 %v847_v39, %v759_v15 }
 0x110   : > { %v903_v56 = vpop.f32.mrf.mxu2  ;;  %v720_v42 = vpop.f32.mrf.mxu0 }
 0x111   : > { %v990_v43 = vpack.c.bf16 %v958_v41, %v958_v41  ;;  %v721_v44 = vadd.f32 %v1679_v62, %v720_v42  ;;  %v809_v45 = vpop.f32.mrf.mxu1 }
 0x113   : > { %1023 = vst.msk [vmem:[%s1693_s9 + $0x30] sm:$0xf] %vm1010_vm1, %v990_v43  ;;  %v810_v47 = vadd.f32 %v809_v45, %v721_v44  ;;  %v764_v43 = vadd.f32 %v1679_v62, %v1745_v33 }
 0x115   : > { %v899_v48 = vadd.f32 %v898_v19, %v810_v47 }
 0x116   : > { %v849_v49 = vpop.f32.mrf.mxu3 }
 0x117   : > { %v959_v50 = vmax.f32 %v899_v48, 0.0  ;;  %v850_v32 = vadd.f32 %v849_v49, %v761_v29 }
 0x118   : > { %v906_v51 = vpop.f32.mrf.mxu2  ;;  %v723_v52 = vpop.f32.mrf.mxu0 }
 0x119   : > { %v991_v53 = vpack.c.bf16 %v959_v50, %v959_v50  ;;  %v724_v54 = vadd.f32 %v1679_v62, %v723_v52  ;;  %v812_v55 = vpop.f32.mrf.mxu1 }
 0x11b   : > { %1024 = vst.msk [vmem:[%s1693_s9 + $0x34] sm:$0xf] %vm1010_vm1, %v991_v53  ;;  %v813_v57 = vadd.f32 %v812_v55, %v724_v54 }
 0x11d   : > { %v902_v58 = vadd.f32 %v901_v31, %v813_v57 }
 0x11e   : > { %v852_v60 = vpop.f32.mrf.mxu3 }
 0x11f   : > { %v960_v61 = vmax.f32 %v902_v58, 0.0  ;;  %v853_v47 = vadd.f32 %v852_v60, %v764_v43  ;;  %v766_v58 = vadd.f32 %v1679_v62, %v1753_v46 }
 0x120   : > { %v908_v63 = vpop.f32.mrf.mxu2  ;;  %v725_v0 = vpop.f32.mrf.mxu0 }
 0x121   : > { %v992_v1 = vpack.c.bf16 %v960_v61, %v960_v61  ;;  %v726_v2 = vadd.f32 %v1679_v62, %v725_v0  ;;  %v814_v3 = vpop.f32.mrf.mxu1 }
 0x123   : > { %1025 = vst.msk [vmem:[%s1693_s9 + $0x38] sm:$0xf] %vm1010_vm1, %v992_v1  ;;  %v815_v5 = vadd.f32 %v814_v3, %v726_v2 }
 0x125   : > { %v904_v10 = vadd.f32 %v903_v56, %v815_v5 }
 0x126   : > { %v854_v6 = vpop.f32.mrf.mxu3 }
 0x127   : > { %v961_v8 = vmax.f32 %v904_v10, 0.0 }
 0x128   : > { %v911_v9 = vpop.f32.mrf.mxu2  ;;  %v728_v11 = vpop.f32.mrf.mxu0 }
 0x129   : > { %v993_v12 = vpack.c.bf16 %v961_v8, %v961_v8  ;;  %v729_v13 = vadd.f32 %v1679_v62, %v728_v11  ;;  %v817_v14 = vpop.f32.mrf.mxu1 }
 0x12b   : > { %1026 = vst.msk [vmem:[%s1693_s9 + $0x3c] sm:$0xf] %vm1010_vm1, %v993_v12  ;;  %v818_v16 = vadd.f32 %v817_v14, %v729_v13 }
 0x12d   : > { %v907_v17 = vadd.f32 %v906_v51, %v818_v16 }
 0x12e   : > { %v936_v19 = vpop.f32.mrf.mxu3 }
 0x12f   : > { %v962_v20 = vmax.f32 %v907_v17, 0.0  ;;  %v937_v22 = vadd.f32 %v936_v19, %v848_v28 }
 0x130   : > { %v913_v23 = vpop.f32.mrf.mxu2  ;;  %v730_v24 = vpop.f32.mrf.mxu0 }
 0x131   : > { %v994_v25 = vpack.c.bf16 %v962_v20, %v962_v20  ;;  %v974_v26 = vmax.f32 %v937_v22, 0.0  ;;  %v731_v27 = vadd.f32 %v1679_v62, %v730_v24  ;;  %v819_v40 = vpop.f32.mrf.mxu1 }
 0x133   : > { %1027 = vst.msk [vmem:[%s1693_s9 + $0x40] sm:$0xf] %vm1010_vm1, %v994_v25  ;;  %v1006_v4 = vpack.c.bf16 %v974_v26, %v974_v26  ;;  %v820_v31 = vadd.f32 %v819_v40, %v731_v27 }
 0x135   : > { %1039 = vst.msk [vmem:[%s1693_s9 + $0x70] sm:$0xf] %vm1010_vm1, %v1006_v4  ;;  %v909_v34 = vadd.f32 %v908_v63, %v820_v31  ;;  %v855_v63 = vadd.f32 %v854_v6, %v766_v58 }
 0x136   : > { %v938_v35 = vpop.f32.mrf.mxu3 }
 0x137   : > { %v963_v36 = vmax.f32 %v909_v34, 0.0  ;;  %v939_v37 = vadd.f32 %v938_v35, %v850_v32 }
 0x138   : > { %v916_v38 = vpop.f32.mrf.mxu2  ;;  %v733_v39 = vpop.f32.mrf.mxu0 }
 0x139   : > { %v995_v41 = vpack.c.bf16 %v963_v36, %v963_v36  ;;  %v975_v56 = vmax.f32 %v939_v37, 0.0  ;;  %v734_v42 = vadd.f32 %v1679_v62, %v733_v39  ;;  %v822_v21 = vpop.f32.mrf.mxu1 }
 0x13b   : > { %1028 = vst.msk [vmem:[%s1693_s9 + $0x44] sm:$0xf] %vm1010_vm1, %v995_v41  ;;  %v1007_v44 = vpack.c.bf16 %v975_v56, %v975_v56  ;;  %v823_v45 = vadd.f32 %v822_v21, %v734_v42 }
 0x13d   : > { %1040 = vst.msk [vmem:[%s1693_s9 + $0x74] sm:$0xf] %vm1010_vm1, %v1007_v44  ;;  %v912_v48 = vadd.f32 %v911_v9, %v823_v45 }
 0x13e   : > { %v941_v49 = vpop.f32.mrf.mxu3 }
 0x13f   : > { %v964_v50 = vmax.f32 %v912_v48, 0.0  ;;  %v942_v51 = vadd.f32 %v941_v49, %v853_v47 }
 0x140   : > { %v918_v52 = vpop.f32.mrf.mxu2  ;;  %v735_v53 = vpop.f32.mrf.mxu0 }
 0x141   : > { %v996_v54 = vpack.c.bf16 %v964_v50, %v964_v50  ;;  %v976_v55 = vmax.f32 %v942_v51, 0.0  ;;  %v736_v57 = vadd.f32 %v1679_v62, %v735_v53  ;;  %v824_v33 = vpop.f32.mrf.mxu1 }
 0x143   : > { %1029 = vst.msk [vmem:[%s1693_s9 + $0x48] sm:$0xf] %vm1010_vm1, %v996_v54  ;;  %v1008_v60 = vpack.c.bf16 %v976_v55, %v976_v55  ;;  %v825_v61 = vadd.f32 %v824_v33, %v736_v57 }
 0x145   : > { %1041 = vst.msk [vmem:[%s1693_s9 + $0x78] sm:$0xf] %vm1010_vm1, %v1008_v60  ;;  %v914_v0 = vadd.f32 %v913_v23, %v825_v61 }
 0x146   : > { %v943_v1 = vpop.f32.mrf.mxu3 }
 0x147   : > { %v965_v2 = vmax.f32 %v914_v0, 0.0  ;;  %v944_v3 = vadd.f32 %v943_v1, %v855_v63 }
 0x148   : > { %v921_v5 = vpop.f32.mrf.mxu2  ;;  %v738_v10 = vpop.f32.mrf.mxu0 }
 0x149   : > { %v997_v8 = vpack.c.bf16 %v965_v2, %v965_v2  ;;  %v977_v9 = vmax.f32 %v944_v3, 0.0  ;;  %v739_v46 = vadd.f32 %v1679_v62, %v738_v10  ;;  %v827_v11 = vpop.f32.mrf.mxu1 }
 0x14b   : > { %1030 = vst.msk [vmem:[%s1693_s9 + $0x4c] sm:$0xf] %vm1010_vm1, %v997_v8  ;;  %v1009_v12 = vpack.c.bf16 %v977_v9, %v977_v9  ;;  %v828_v13 = vadd.f32 %v827_v11, %v739_v46 }
 0x14d   : > { %1042 = vst.msk [vmem:[%s1693_s9 + $0x7c] sm:$0xf] %vm1010_vm1, %v1009_v12  ;;  %v917_v6 = vadd.f32 %v916_v38, %v828_v13 }
 0x14f   : > { %v966_v14 = vmax.f32 %v917_v6, 0.0 }
 0x150   : > { %v923_v15 = vpop.f32.mrf.mxu2  ;;  %v740_v16 = vpop.f32.mrf.mxu0 }
 0x151   : > { %v998_v28 = vpack.c.bf16 %v966_v14, %v966_v14  ;;  %v741_v17 = vadd.f32 %v1679_v62, %v740_v16  ;;  %v829_v19 = vpop.f32.mrf.mxu1 }
 0x153   : > { %1031 = vst.msk [vmem:[%s1693_s9 + $0x50] sm:$0xf] %vm1010_vm1, %v998_v28  ;;  %v830_v20 = vadd.f32 %v829_v19, %v741_v17 }
 0x155   : > { %v919_v22 = vadd.f32 %v918_v52, %v830_v20 }
 0x157   : > { %v967_v23 = vmax.f32 %v919_v22, 0.0 }
 0x158   : > { %v926_v24 = vpop.f32.mrf.mxu2  ;;  %v743_v25 = vpop.f32.mrf.mxu0 }
 0x159   : > { %v999_v26 = vpack.c.bf16 %v967_v23, %v967_v23  ;;  %v927_v27 = vadd.f32 %v926_v24, %v1760_v59  ;;  %v744_v40 = vadd.f32 %v1679_v62, %v743_v25  ;;  %v832_v29 = vpop.f32.mrf.mxu1 }
 0x15b   : > { %1032 = vst.msk [vmem:[%s1693_s9 + $0x54] sm:$0xf] %vm1010_vm1, %v999_v26  ;;  %v970_v4 = vmax.f32 %v927_v27, 0.0  ;;  %v833_v31 = vadd.f32 %v832_v29, %v744_v40 }
 0x15d   : > { %v1002_v32 = vpack.c.bf16 %v970_v4, %v970_v4  ;;  %v922_v34 = vadd.f32 %v921_v5, %v833_v31 }
 0x15f   : > { %1035 = vst.msk [vmem:[%s1693_s9 + $0x60] sm:$0xf] %vm1010_vm1, %v1002_v32  ;;  %v968_v35 = vmax.f32 %v922_v34, 0.0 }
 0x160   : > { %v928_v36 = vpop.f32.mrf.mxu2  ;;  %v745_v37 = vpop.f32.mrf.mxu0 }
 0x161   : > { %v1000_v38 = vpack.c.bf16 %v968_v35, %v968_v35  ;;  %v929_v59 = vadd.f32 %v928_v36, %v1767_v7  ;;  %v746_v39 = vadd.f32 %v1679_v62, %v745_v37  ;;  %v834_v41 = vpop.f32.mrf.mxu1 }
 0x163   : > { %1033 = vst.msk [vmem:[%s1693_s9 + $0x58] sm:$0xf] %vm1010_vm1, %v1000_v38  ;;  %v971_v56 = vmax.f32 %v929_v59, 0.0  ;;  %v835_v42 = vadd.f32 %v834_v41, %v746_v39 }
 0x165   : > { %v1003_v21 = vpack.c.bf16 %v971_v56, %v971_v56  ;;  %v924_v43 = vadd.f32 %v923_v15, %v835_v42 }
 0x167   : > { %1036 = vst.msk [vmem:[%s1693_s9 + $0x64] sm:$0xf] %vm1010_vm1, %v1003_v21  ;;  %v969_v44 = vmax.f32 %v924_v43, 0.0 }
 0x168   : > { %v931_v45 = vpop.f32.mrf.mxu2 }
 0x169   : > { %v1001_v47 = vpack.c.bf16 %v969_v44, %v969_v44  ;;  %v932_v48 = vadd.f32 %v931_v45, %v1774_v18 }
 0x16b   : > { %1034 = vst.msk [vmem:[%s1693_s9 + $0x5c] sm:$0xf] %vm1010_vm1, %v1001_v47  ;;  %v972_v7 = vmax.f32 %v932_v48, 0.0 }
 0x16d   : > { %v1004_v49 = vpack.c.bf16 %v972_v7, %v972_v7 }
 0x16f   : > { %1037 = vst.msk [vmem:[%s1693_s9 + $0x68] sm:$0xf] %vm1010_vm1, %v1004_v49 }
 0x170   : > { %v933_v62 = vpop.f32.mrf.mxu2 }
 0x171   : > { %v934_v50 = vadd.f32 %v933_v62, %v1781_v30 }
 0x173   : > { %v973_v51 = vmax.f32 %v934_v50, 0.0 }
 0x175   : > { %v1005_v52 = vpack.c.bf16 %v973_v51, %v973_v51 }
 0x177   : > { %1038 = vst.msk [vmem:[%s1693_s9 + $0x6c] sm:$0xf] %vm1010_vm1, %v1005_v52 }
 0x178 PF: > { %s13_s12 = sadd.s32 1, %s1490_s12  }
 0x179   : > { %p10_p4 = scmp.ge.s32.totalorder %s13_s12, 4  }
 0x17b   :  { %12 = sbr.rel (!%p10_p4) target bundleno = 1 (0x1), region = 62 }

// kernel: motor_det_net.9
= control target key start
LH: loop header
LB: loop body
LE: loop exit
PB: predicated region body
PF: predicated region fallthrough
CT: control target
= control target key end

     0   :  { %vm315_vm0 = vcmask 261120   ;;  %vm519_vm1 = vcmask 519168   ;;  %s1086_s1 = inlined_call_operand.vmem [shape: bf16[288,64], index: 1, kind: input, shape index: {}]   ;;  %s1087_s0 = inlined_call_operand.vmem [shape: bf16[128,288], index: 0, kind: input, shape index: {}]   ;;  %s1088_s2 = inlined_call_operand.vmem [shape: f32[1,64], index: 2, kind: input, shape index: {}]   ;;  %s1089_s3 = inlined_call_operand.vmem [shape: bf16[128,64], index: 3, kind: output, shape index: {}]  }
   0x1   :  { %v747_v0 = vld [vmem:[%s1086_s1 + $0x38] sm:$0xff]  ;;  %v757_v1 = vld [vmem:[%s1086_s1 + $0x88] sm:$0xff]  ;;  %v746_v3 = vld [vmem:[%s1086_s1 + $0x30] sm:$0xff] }
   0x2   :  { %v755_v2 = vld [vmem:[%s1086_s1 + $0x78] sm:$0xff]  ;;  %340 = vmatpush.bf16.msra.mxu0 %v747_v0  ;;  %758 = vmatpush.bf16.msra.mxu3 %v747_v0  ;;  %v756_v4 = vld [vmem:[%s1086_s1 + $0x80] sm:$0xff]  ;;  %v754_v5 = vld [vmem:[%s1086_s1 + $0x70] sm:$0xff] }
   0x3   :  { %444 = vmatpush.bf16.msra.mxu2 %v757_v1  ;;  %389 = vmatpush.bf16.msra.mxu1 %v755_v2  ;;  %v550_v6 = vld [vmem:[%s1087_s0 + $0x8] sm:$0xf]  ;;  %v718_v7 = vld [vmem:[%s1087_s0 + $0x10] sm:$0xf0]  ;;  %v744_v11 = vld [vmem:[%s1086_s1 + $0x20] sm:$0xff] }
   0x4   :  { %v551_v8 = vor.u32 %v718_v7, %v550_v6  ;;  %v745_v9 = vld [vmem:[%s1086_s1 + $0x28] sm:$0xff]  ;;  %v752_v12 = vld [vmem:[%s1086_s1 + $0x60] sm:$0xff]  ;;  %v743_v13 = vld [vmem:[%s1086_s1 + $0x18] sm:$0xff] }
   0x5   :  { %v753_v10 = vld [vmem:[%s1086_s1 + $0x68] sm:$0xff]  ;;  %v751_v14 = vld [vmem:[%s1086_s1 + $0x58] sm:$0xff]  ;;  %v742_v15 = vld [vmem:[%s1086_s1 + $0x10] sm:$0xff] }
   0x6   :  { %341 = vmatpush.bf16.msra.mxu0 %v746_v3  ;;  %759 = vmatpush.bf16.msra.mxu3 %v746_v3  ;;  %v750_v16 = vld [vmem:[%s1086_s1 + $0x50] sm:$0xff]  ;;  %v562_v17 = vld [vmem:[%s1087_s0 + $0x20] sm:$0xf]  ;;  %v721_v18 = vld [vmem:[%s1087_s0 + $0x28] sm:$0xf0] }
   0x7   :  { %445 = vmatpush.bf16.msra.mxu2 %v756_v4  ;;  %390 = vmatpush.bf16.msra.mxu1 %v754_v5  ;;  %v563_v19 = vor.u32 %v721_v18, %v562_v17  ;;  %v741_v20 = vld [vmem:[%s1086_s1 + $0x8] sm:$0xff]  ;;  %v740_v22 = vld [vmem:[%s1086_s1] sm:$0xff]  ;;  %v614_v26 = vld [vmem:[%s1087_s0 + $0x90] sm:$0xf] }
   0x8   :  { %v749_v21 = vld [vmem:[%s1086_s1 + $0x48] sm:$0xff]  ;;  %v748_v23 = vld [vmem:[%s1086_s1 + $0x40] sm:$0xff]  ;;  %v735_v27 = vld [vmem:[%s1087_s0 + $0x98] sm:$0xf0] }
   0x9   :  { %v542_v24 = vld [vmem:[%s1087_s0] sm:$0xf]  ;;  %v717_v25 = vld [vmem:[%s1087_s0 + $0x8] sm:$0xf0]  ;;  %v716_v28 = vld [vmem:[%s1087_s0 + $0x4] sm:$0xf]  ;;  %v615_v31 = vor.u32 %v735_v27, %v614_v26 }
   0xa   :  { %708 = vmatmul.msk.bf16.vlgmr.msra.gmra.mxu2 %vm315_vm0, %v551_v8  ;;  %342 = vmatpush.bf16.msra.mxu0 %v745_v9  ;;  %v544_v29 = vld [vmem:[%s1087_s0 + $0xc] sm:$0xf0]  ;;  %v543_v30 = vor.u32 %v717_v25, %v542_v24  ;;  %v574_v33 = vld [vmem:[%s1087_s0 + $0x38] sm:$0xf]  ;;  %v724_v34 = vld [vmem:[%s1087_s0 + $0x40] sm:$0xf0] }
   0xb   :  { %760 = vmatpush.bf16.msra.mxu3 %v745_v9  ;;  %391 = vmatpush.bf16.msra.mxu1 %v753_v10  ;;  %v547_v32 = vor.u32 %v716_v28, %v544_v29  ;;  %v575_v35 = vor.u32 %v724_v34, %v574_v33  ;;  %v554_v36 = vld [vmem:[%s1087_s0 + $0x18] sm:$0xf]  ;;  %v720_v37 = vld [vmem:[%s1087_s0 + $0x20] sm:$0xf0]  ;;  %v626_v38 = vld [vmem:[%s1087_s0 + $0xa8] sm:$0xf] }
   0xc   :  { %v738_v39 = vld [vmem:[%s1087_s0 + $0xb0] sm:$0xf0]  ;;  %v719_v40 = vld [vmem:[%s1087_s0 + $0x1c] sm:$0xf]  ;;  %v556_v41 = vld [vmem:[%s1087_s0 + $0x24] sm:$0xf0]  ;;  %v555_v42 = vor.u32 %v720_v37, %v554_v36 }
   0xd   :  { %v627_v43 = vor.u32 %v738_v39, %v626_v38  ;;  %v559_v44 = vor.u32 %v719_v40, %v556_v41  ;;  %v586_v45 = vld [vmem:[%s1087_s0 + $0x50] sm:$0xf]  ;;  %v727_v46 = vld [vmem:[%s1087_s0 + $0x58] sm:$0xf0]  ;;  %v734_v50 = vld [vmem:[%s1087_s0 + $0x94] sm:$0xf] }
   0xe   :  { %343 = vmatpush.bf16.msra.mxu0 %v744_v11  ;;  %v587_v47 = vor.u32 %v727_v46, %v586_v45  ;;  %v566_v48 = vld [vmem:[%s1087_s0 + $0x30] sm:$0xf]  ;;  %v723_v49 = vld [vmem:[%s1087_s0 + $0x38] sm:$0xf0]  ;;  %v616_v51 = vld [vmem:[%s1087_s0 + $0x9c] sm:$0xf0] }
   0xf   :  { %761 = vmatpush.bf16.msra.mxu3 %v744_v11  ;;  %392 = vmatpush.bf16.msra.mxu1 %v752_v12  ;;  %v722_v52 = vld [vmem:[%s1087_s0 + $0x34] sm:$0xf]  ;;  %v568_v53 = vld [vmem:[%s1087_s0 + $0x3c] sm:$0xf0]  ;;  %v567_v54 = vor.u32 %v723_v49, %v566_v48  ;;  %v619_v55 = vor.u32 %v734_v50, %v616_v51  ;;  %v598_v57 = vld [vmem:[%s1087_s0 + $0x68] sm:$0xf] }
  0x10   :  { %v571_v56 = vor.u32 %v722_v52, %v568_v53  ;;  %v730_v58 = vld [vmem:[%s1087_s0 + $0x70] sm:$0xf0]  ;;  %v578_v60 = vld [vmem:[%s1087_s0 + $0x48] sm:$0xf]  ;;  %v737_v62 = vld [vmem:[%s1087_s0 + $0xac] sm:$0xf] }
  0x11   :  { %v599_v59 = vor.u32 %v730_v58, %v598_v57  ;;  %v726_v61 = vld [vmem:[%s1087_s0 + $0x50] sm:$0xf0]  ;;  %v628_v63 = vld [vmem:[%s1087_s0 + $0xb4] sm:$0xf0]  ;;  %v725_v0 = vld [vmem:[%s1087_s0 + $0x4c] sm:$0xf] }
  0x12   :  { %344 = vmatpush.bf16.msra.mxu0 %v743_v13  ;;  %v580_v1 = vld [vmem:[%s1087_s0 + $0x54] sm:$0xf0]  ;;  %v631_v3 = vor.u32 %v737_v62, %v628_v63  ;;  %v733_v6 = vld [vmem:[%s1087_s0 + $0x88] sm:$0xf0]  ;;  %v590_v8 = vld [vmem:[%s1087_s0 + $0x60] sm:$0xf] }
  0x13   :  { %762 = vmatpush.bf16.msra.mxu3 %v743_v13  ;;  %393 = vmatpush.bf16.msra.mxu1 %v751_v14  ;;  %v583_v4 = vor.u32 %v725_v0, %v580_v1  ;;  %v729_v9 = vld [vmem:[%s1087_s0 + $0x68] sm:$0xf0]  ;;  %v592_v11 = vld [vmem:[%s1087_s0 + $0x6c] sm:$0xf0]  ;;  %v602_v17 = vld [vmem:[%s1087_s0 + $0x78] sm:$0xf] }
  0x14   :  { %v732_v18 = vld [vmem:[%s1087_s0 + $0x80] sm:$0xf0]  ;;  %v739_v24 = vld [vmem:[%s1087_s0 + $0xb8] sm:$0xf0]  ;;  %v1004_v28 = vld [vmem:[%s1088_s2] ss:$0 sm:$0xff] }
  0x16   :  { %345 = vmatpush.bf16.msra.mxu0 %v742_v15 }
  0x17   :  { %763 = vmatpush.bf16.msra.mxu3 %v742_v15  ;;  %394 = vmatpush.bf16.msra.mxu1 %v750_v16  ;;  %v736_v15 = vld [vmem:[%s1087_s0 + $0xa0] sm:$0xf0] }
  0x1a   :  { %709 = vmatmul.msk.bf16.gmra.mxu2 %vm315_vm0, %v563_v19  ;;  %346 = vmatpush.bf16.msra.mxu0 %v741_v20  ;;  %v731_v19 = vld [vmem:[%s1087_s0 + $0x7c] sm:$0xf] }
  0x1b   :  { %764 = vmatpush.bf16.msra.mxu3 %v741_v20  ;;  %395 = vmatpush.bf16.msra.mxu1 %v749_v21  ;;  %v604_v20 = vld [vmem:[%s1087_s0 + $0x84] sm:$0xf0] }
  0x1e   :  { %347 = vmatpush.bf16.msra.mxu0 %v740_v22 }
  0x1f   :  { %765 = vmatpush.bf16.msra.mxu3 %v740_v22  ;;  %396 = vmatpush.bf16.msra.mxu1 %v748_v23  ;;  %v607_v22 = vor.u32 %v731_v19, %v604_v20 }
  0x21   :  { %348 = vmatmul.bf16.vlgmr.msra.gmra.mxu0 %v543_v30 }
  0x22   :  { %378 = vmatmul.bf16.vlgmr.msra.gmra.mxu3 %v615_v31  ;;  %397 = vmatmul.bf16.vlgmr.msra.gmra.mxu1 %v547_v32 }
  0x23   :  { %766 = vmatpush.bf16.msrb.mxu3 %v755_v2  ;;  %v579_v2 = vor.u32 %v726_v61, %v578_v60 }
  0x27   :  { %767 = vmatpush.bf16.msrb.mxu3 %v754_v5  ;;  %v610_v5 = vld [vmem:[%s1087_s0 + $0x80] sm:$0xf] }
  0x28   :  { %v611_v7 = vor.u32 %v733_v6, %v610_v5 }
  0x2a   :  { %710 = vmatmul.msk.bf16.gmra.mxu2 %vm315_vm0, %v575_v35 }
  0x2b   :  { %768 = vmatpush.bf16.msrb.mxu3 %v753_v10  ;;  %v728_v10 = vld [vmem:[%s1087_s0 + $0x64] sm:$0xf] }
  0x2c   :  { %v595_v13 = vor.u32 %v728_v10, %v592_v11 }
  0x2f   :  { %769 = vmatpush.bf16.msrb.mxu3 %v752_v12  ;;  %v591_v12 = vor.u32 %v729_v9, %v590_v8 }
  0x31   :  { %353 = vmatmul.bf16.gmra.mxu0 %v555_v42 }
  0x32   :  { %383 = vmatmul.bf16.gmra.mxu3 %v627_v43  ;;  %402 = vmatmul.bf16.gmra.mxu1 %v559_v44 }
  0x33   :  { %770 = vmatpush.bf16.msrb.mxu3 %v751_v14  ;;  %v622_v14 = vld [vmem:[%s1087_s0 + $0x98] sm:$0xf] }
  0x37   :  { %771 = vmatpush.bf16.msrb.mxu3 %v750_v16  ;;  %v623_v16 = vor.u32 %v736_v15, %v622_v14 }
  0x3a   :  { %711 = vmatmul.msk.bf16.gmra.mxu2 %vm315_vm0, %v587_v47 }
  0x3b   :  { %772 = vmatpush.bf16.msrb.mxu3 %v749_v21  ;;  %v603_v21 = vor.u32 %v732_v18, %v602_v17 }
  0x3f   :  { %773 = vmatpush.bf16.msrb.mxu3 %v748_v23  ;;  %v634_v23 = vld [vmem:[%s1087_s0 + $0xb0] sm:$0xf] }
  0x40   :  { %v635_v25 = vor.u32 %v739_v24, %v634_v23 }
  0x41   :  { %358 = vmatmul.bf16.gmra.mxu0 %v567_v54 }
  0x42   :  { %427 = vmatmul.bf16.vlgmr.msrb.gmra.mxu3 %v619_v55  ;;  %407 = vmatmul.bf16.gmra.mxu1 %v571_v56 }
  0x4a   :  { %712 = vmatmul.msk.bf16.gmra.mxu2 %vm315_vm0, %v599_v59 }
  0x51   :  { %363 = vmatmul.bf16.gmra.mxu0 %v579_v2 }
  0x52   :  { %432 = vmatmul.bf16.gmra.mxu3 %v631_v3  ;;  %412 = vmatmul.bf16.gmra.mxu1 %v583_v4 }
  0x5a   :  { %713 = vmatmul.msk.bf16.gmra.mxu2 %vm315_vm0, %v611_v7 }
  0x61   :  { %368 = vmatmul.bf16.gmra.mxu0 %v591_v12 }
  0x62   :  { %417 = vmatmul.bf16.gmra.mxu1 %v595_v13 }
  0x6a   :  { %714 = vmatmul.msk.bf16.gmra.mxu2 %vm315_vm0, %v623_v16 }
  0x71   :  { %373 = vmatmul.bf16.gmra.mxu0 %v603_v21 }
  0x72   :  { %422 = vmatmul.bf16.gmra.mxu1 %v607_v22 }
  0x7a   :  { %715 = vmatmul.msk.bf16.gmra.mxu2 %vm315_vm0, %v635_v25 }
  0x8d   :  { %v447_v26 = vpop.f32.mrf.mxu2 }
  0x95   :  { %v449_v27 = vpop.f32.mrf.mxu2 }
  0x9d   :  { %v452_v29 = vpop.f32.mrf.mxu2 }
  0x9e   :  { %v349_v30 = vpop.f32.mrf.mxu0 }
  0x9f   :  { %v350_v31 = vadd.f32 %v1004_v28, %v349_v30  ;;  %v398_v32 = vpop.f32.mrf.mxu1 }
  0xa1   :  { %v399_v33 = vadd.f32 %v398_v32, %v350_v31 }
  0xa3   :  { %v448_v34 = vadd.f32 %v447_v26, %v399_v33 }
  0xa5   :  { %v487_v35 = vmax.f32 %v448_v34, 0.0  ;;  %v454_v36 = vpop.f32.mrf.mxu2  ;;  %v379_v58 = vpop.f32.mrf.mxu3 }
  0xa6   :  { %v351_v37 = vpop.f32.mrf.mxu0 }
  0xa7   :  { %v503_v38 = vpack.c.bf16 %v487_v35, %v487_v35  ;;  %v352_v39 = vadd.f32 %v1004_v28, %v351_v37  ;;  %v400_v40 = vpop.f32.mrf.mxu1 }
  0xa9   :  { %520 = vst.msk [vmem:[%s1089_s3] sm:$0xf] %vm519_vm1, %v503_v38  ;;  %v401_v41 = vadd.f32 %v400_v40, %v352_v39 }
  0xab   :  { %v450_v42 = vadd.f32 %v449_v27, %v401_v41 }
  0xad   :  { %v488_v43 = vmax.f32 %v450_v42, 0.0  ;;  %v457_v44 = vpop.f32.mrf.mxu2  ;;  %v381_v4 = vpop.f32.mrf.mxu3 }
  0xae   :  { %v354_v45 = vpop.f32.mrf.mxu0 }
  0xaf   :  { %v504_v46 = vpack.c.bf16 %v488_v43, %v488_v43  ;;  %v355_v47 = vadd.f32 %v1004_v28, %v354_v45  ;;  %v403_v48 = vpop.f32.mrf.mxu1 }
  0xb1   :  { %521 = vst.msk [vmem:[%s1089_s3 + $0x4] sm:$0xf] %vm519_vm1, %v504_v46  ;;  %v404_v49 = vadd.f32 %v403_v48, %v355_v47  ;;  %v380_v47 = vadd.f32 %v1004_v28, %v379_v58 }
  0xb3   :  { %v453_v50 = vadd.f32 %v452_v29, %v404_v49 }
  0xb5   :  { %v489_v51 = vmax.f32 %v453_v50, 0.0  ;;  %v459_v52 = vpop.f32.mrf.mxu2  ;;  %v384_v16 = vpop.f32.mrf.mxu3 }
  0xb6   :  { %v356_v53 = vpop.f32.mrf.mxu0 }
  0xb7   :  { %v505_v54 = vpack.c.bf16 %v489_v51, %v489_v51  ;;  %v357_v55 = vadd.f32 %v1004_v28, %v356_v53  ;;  %v405_v56 = vpop.f32.mrf.mxu1 }
  0xb9   :  { %522 = vst.msk [vmem:[%s1089_s3 + $0x8] sm:$0xf] %vm519_vm1, %v505_v54  ;;  %v406_v57 = vadd.f32 %v405_v56, %v357_v55 }
  0xbb   :  { %v455_v59 = vadd.f32 %v454_v36, %v406_v57 }
  0xbd   :  { %v490_v60 = vmax.f32 %v455_v59, 0.0  ;;  %v462_v61 = vpop.f32.mrf.mxu2  ;;  %v386_v29 = vpop.f32.mrf.mxu3 }
  0xbe   :  { %v359_v62 = vpop.f32.mrf.mxu0 }
  0xbf   :  { %v506_v63 = vpack.c.bf16 %v490_v60, %v490_v60  ;;  %v360_v0 = vadd.f32 %v1004_v28, %v359_v62  ;;  %v408_v1 = vpop.f32.mrf.mxu1  ;;  %v382_v60 = vadd.f32 %v1004_v28, %v381_v4 }
  0xc1   :  { %523 = vst.msk [vmem:[%s1089_s3 + $0xc] sm:$0xf] %vm519_vm1, %v506_v63  ;;  %v409_v2 = vadd.f32 %v408_v1, %v360_v0 }
  0xc3   :  { %v458_v3 = vadd.f32 %v457_v44, %v409_v2 }
  0xc5   :  { %v491_v5 = vmax.f32 %v458_v3, 0.0  ;;  %v464_v6 = vpop.f32.mrf.mxu2  ;;  %v428_v39 = vpop.f32.mrf.mxu3 }
  0xc6   :  { %v361_v7 = vpop.f32.mrf.mxu0  ;;  %v429_v50 = vadd.f32 %v428_v39, %v380_v47 }
  0xc7   :  { %v507_v8 = vpack.c.bf16 %v491_v5, %v491_v5  ;;  %v362_v9 = vadd.f32 %v1004_v28, %v361_v7  ;;  %v410_v10 = vpop.f32.mrf.mxu1 }
  0xc9   :  { %524 = vst.msk [vmem:[%s1089_s3 + $0x10] sm:$0xf] %vm519_vm1, %v507_v8  ;;  %v411_v11 = vadd.f32 %v410_v10, %v362_v9  ;;  %v385_v9 = vadd.f32 %v1004_v28, %v384_v16  ;;  %v387_v16 = vadd.f32 %v1004_v28, %v386_v29 }
  0xcb   :  { %v460_v12 = vadd.f32 %v459_v52, %v411_v11 }
  0xcd   :  { %v492_v13 = vmax.f32 %v460_v12, 0.0  ;;  %v467_v14 = vpop.f32.mrf.mxu2  ;;  %v430_v51 = vpop.f32.mrf.mxu3 }
  0xce   :  { %v364_v15 = vpop.f32.mrf.mxu0  ;;  %v431_v0 = vadd.f32 %v430_v51, %v382_v60 }
  0xcf   :  { %v508_v17 = vpack.c.bf16 %v492_v13, %v492_v13  ;;  %v365_v18 = vadd.f32 %v1004_v28, %v364_v15  ;;  %v413_v19 = vpop.f32.mrf.mxu1 }
  0xd1   :  { %525 = vst.msk [vmem:[%s1089_s3 + $0x14] sm:$0xf] %vm519_vm1, %v508_v17  ;;  %v414_v20 = vadd.f32 %v413_v19, %v365_v18 }
  0xd3   :  { %v463_v21 = vadd.f32 %v462_v61, %v414_v20 }
  0xd5   :  { %v493_v22 = vmax.f32 %v463_v21, 0.0  ;;  %v469_v23 = vpop.f32.mrf.mxu2  ;;  %v433_v4 = vpop.f32.mrf.mxu3 }
  0xd6   :  { %v366_v24 = vpop.f32.mrf.mxu0 }
  0xd7   :  { %v509_v25 = vpack.c.bf16 %v493_v22, %v493_v22  ;;  %v367_v26 = vadd.f32 %v1004_v28, %v366_v24  ;;  %v415_v27 = vpop.f32.mrf.mxu1 }
  0xd9   :  { %526 = vst.msk [vmem:[%s1089_s3 + $0x18] sm:$0xf] %vm519_vm1, %v509_v25  ;;  %v416_v30 = vadd.f32 %v415_v27, %v367_v26 }
  0xdb   :  { %v465_v31 = vadd.f32 %v464_v6, %v416_v30 }
  0xdd   :  { %v494_v32 = vmax.f32 %v465_v31, 0.0  ;;  %v472_v33 = vpop.f32.mrf.mxu2  ;;  %v435_v21 = vpop.f32.mrf.mxu3 }
  0xde   :  { %v369_v34 = vpop.f32.mrf.mxu0 }
  0xdf   :  { %v510_v35 = vpack.c.bf16 %v494_v32, %v494_v32  ;;  %v370_v36 = vadd.f32 %v1004_v28, %v369_v34  ;;  %v418_v37 = vpop.f32.mrf.mxu1 }
  0xe1   :  { %527 = vst.msk [vmem:[%s1089_s3 + $0x1c] sm:$0xf] %vm519_vm1, %v510_v35  ;;  %v419_v38 = vadd.f32 %v418_v37, %v370_v36 }
  0xe3   :  { %v468_v40 = vadd.f32 %v467_v14, %v419_v38  ;;  %v434_v14 = vadd.f32 %v433_v4, %v385_v9 }
  0xe5   :  { %v495_v41 = vmax.f32 %v468_v40, 0.0  ;;  %v474_v42 = vpop.f32.mrf.mxu2 }
  0xe6   :  { %v371_v43 = vpop.f32.mrf.mxu0 }
  0xe7   :  { %v511_v44 = vpack.c.bf16 %v495_v41, %v495_v41  ;;  %v372_v45 = vadd.f32 %v1004_v28, %v371_v43  ;;  %v420_v46 = vpop.f32.mrf.mxu1 }
  0xe9   :  { %528 = vst.msk [vmem:[%s1089_s3 + $0x20] sm:$0xf] %vm519_vm1, %v511_v44  ;;  %v421_v48 = vadd.f32 %v420_v46, %v372_v45 }
  0xeb   :  { %v470_v49 = vadd.f32 %v469_v23, %v421_v48  ;;  %v436_v23 = vadd.f32 %v435_v21, %v387_v16 }
  0xed   :  { %v496_v52 = vmax.f32 %v470_v49, 0.0  ;;  %v477_v53 = vpop.f32.mrf.mxu2 }
  0xee   :  { %v478_v54 = vadd.f32 %v477_v53, %v429_v50  ;;  %v374_v55 = vpop.f32.mrf.mxu0 }
  0xef   :  { %v512_v56 = vpack.c.bf16 %v496_v52, %v496_v52  ;;  %v375_v57 = vadd.f32 %v1004_v28, %v374_v55  ;;  %v423_v59 = vpop.f32.mrf.mxu1 }
  0xf0   :  { %v499_v58 = vmax.f32 %v478_v54, 0.0 }
  0xf1   :  { %529 = vst.msk [vmem:[%s1089_s3 + $0x24] sm:$0xf] %vm519_vm1, %v512_v56  ;;  %v424_v61 = vadd.f32 %v423_v59, %v375_v57 }
  0xf2   :  { %v515_v62 = vpack.c.bf16 %v499_v58, %v499_v58 }
  0xf3   :  { %v473_v63 = vadd.f32 %v472_v33, %v424_v61 }
  0xf4   :  { %532 = vst.msk [vmem:[%s1089_s3 + $0x30] sm:$0xf] %vm519_vm1, %v515_v62 }
  0xf5   :  { %v497_v1 = vmax.f32 %v473_v63, 0.0  ;;  %v479_v2 = vpop.f32.mrf.mxu2 }
  0xf6   :  { %v480_v3 = vadd.f32 %v479_v2, %v431_v0  ;;  %v376_v5 = vpop.f32.mrf.mxu0 }
  0xf7   :  { %v513_v6 = vpack.c.bf16 %v497_v1, %v497_v1  ;;  %v377_v7 = vadd.f32 %v1004_v28, %v376_v5  ;;  %v425_v8 = vpop.f32.mrf.mxu1 }
  0xf8   :  { %v500_v10 = vmax.f32 %v480_v3, 0.0 }
  0xf9   :  { %530 = vst.msk [vmem:[%s1089_s3 + $0x28] sm:$0xf] %vm519_vm1, %v513_v6  ;;  %v426_v11 = vadd.f32 %v425_v8, %v377_v7 }
  0xfa   :  { %v516_v12 = vpack.c.bf16 %v500_v10, %v500_v10 }
  0xfb   :  { %v475_v13 = vadd.f32 %v474_v42, %v426_v11 }
  0xfc   :  { %533 = vst.msk [vmem:[%s1089_s3 + $0x34] sm:$0xf] %vm519_vm1, %v516_v12 }
  0xfd   :  { %v498_v15 = vmax.f32 %v475_v13, 0.0  ;;  %v482_v17 = vpop.f32.mrf.mxu2 }
  0xfe   :  { %v483_v18 = vadd.f32 %v482_v17, %v434_v14 }
  0xff   :  { %v514_v19 = vpack.c.bf16 %v498_v15, %v498_v15 }
 0x100   :  { %v501_v20 = vmax.f32 %v483_v18, 0.0 }
 0x101   :  { %531 = vst.msk [vmem:[%s1089_s3 + $0x2c] sm:$0xf] %vm519_vm1, %v514_v19 }
 0x102   :  { %v517_v22 = vpack.c.bf16 %v501_v20, %v501_v20 }
 0x104   :  { %534 = vst.msk [vmem:[%s1089_s3 + $0x38] sm:$0xf] %vm519_vm1, %v517_v22 }
 0x105   :  { %v484_v24 = vpop.f32.mrf.mxu2 }
 0x106   :  { %v485_v25 = vadd.f32 %v484_v24, %v436_v23 }
 0x108   :  { %v502_v26 = vmax.f32 %v485_v25, 0.0 }
 0x10a   :  { %v518_v27 = vpack.c.bf16 %v502_v26, %v502_v26 }
 0x10c   :  { %535 = vst.msk [vmem:[%s1089_s3 + $0x3c] sm:$0xf] %vm519_vm1, %v518_v27 }

// kernel: motor_det_net.10
= control target key start
LH: loop header
LB: loop body
LE: loop exit
PB: predicated region body
PF: predicated region fallthrough
CT: control target
= control target key end

     0   :  { %vm369_vm0 = vcmask 523264   ;;  %s932_s1 = inlined_call_operand.vmem [shape: bf16[576,128], index: 1, kind: input, shape index: {}]   ;;  %s933_s2 = inlined_call_operand.vmem [shape: f32[1,128], index: 2, kind: input, shape index: {}]   ;;  %s934_s0 = inlined_call_operand.vmem [shape: bf16[32,576], index: 0, kind: input, shape index: {}]   ;;  %s935_s3 = inlined_call_operand.vmem [shape: bf16[32,128], index: 3, kind: output, shape index: {}]  }
   0x1   :  { %v690_v0 = vld [vmem:[%s932_s1 + $0x38] sm:$0xff]  ;;  %v689_v4 = vld [vmem:[%s932_s1 + $0x30] sm:$0xff]  ;;  %v688_v8 = vld [vmem:[%s932_s1 + $0x28] sm:$0xff] }
   0x2   :  { %v698_v1 = vld [vmem:[%s932_s1 + $0x78] sm:$0xff]  ;;  %376 = vmatpush.bf16.msra.mxu0 %v690_v0  ;;  %v697_v5 = vld [vmem:[%s932_s1 + $0x70] sm:$0xff]  ;;  %v696_v9 = vld [vmem:[%s932_s1 + $0x68] sm:$0xff] }
   0x3   :  { %v706_v2 = vld [vmem:[%s932_s1 + $0xb8] sm:$0xff]  ;;  %395 = vmatpush.bf16.msra.mxu1 %v698_v1  ;;  %v705_v6 = vld [vmem:[%s932_s1 + $0xb0] sm:$0xff]  ;;  %v704_v10 = vld [vmem:[%s932_s1 + $0xa8] sm:$0xff] }
   0x4   :  { %v714_v3 = vld [vmem:[%s932_s1 + $0xf8] sm:$0xff]  ;;  %414 = vmatpush.bf16.msra.mxu2 %v706_v2  ;;  %v713_v7 = vld [vmem:[%s932_s1 + $0xf0] sm:$0xff]  ;;  %v712_v11 = vld [vmem:[%s932_s1 + $0xe8] sm:$0xff] }
   0x5   :  { %433 = vmatpush.bf16.msra.mxu3 %v714_v3  ;;  %v687_v12 = vld [vmem:[%s932_s1 + $0x20] sm:$0xff]  ;;  %v686_v16 = vld [vmem:[%s932_s1 + $0x18] sm:$0xff]  ;;  %v685_v20 = vld [vmem:[%s932_s1 + $0x10] sm:$0xff] }
   0x6   :  { %377 = vmatpush.bf16.msra.mxu0 %v689_v4  ;;  %v695_v13 = vld [vmem:[%s932_s1 + $0x60] sm:$0xff]  ;;  %v694_v17 = vld [vmem:[%s932_s1 + $0x58] sm:$0xff]  ;;  %v693_v21 = vld [vmem:[%s932_s1 + $0x50] sm:$0xff] }
   0x7   :  { %396 = vmatpush.bf16.msra.mxu1 %v697_v5  ;;  %v703_v14 = vld [vmem:[%s932_s1 + $0xa0] sm:$0xff]  ;;  %v702_v18 = vld [vmem:[%s932_s1 + $0x98] sm:$0xff]  ;;  %v701_v22 = vld [vmem:[%s932_s1 + $0x90] sm:$0xff] }
   0x8   :  { %415 = vmatpush.bf16.msra.mxu2 %v705_v6  ;;  %v711_v15 = vld [vmem:[%s932_s1 + $0xe0] sm:$0xff]  ;;  %v710_v19 = vld [vmem:[%s932_s1 + $0xd8] sm:$0xff]  ;;  %v709_v23 = vld [vmem:[%s932_s1 + $0xd0] sm:$0xff] }
   0x9   :  { %434 = vmatpush.bf16.msra.mxu3 %v713_v7  ;;  %v684_v24 = vld [vmem:[%s932_s1 + $0x8] sm:$0xff]  ;;  %v683_v28 = vld [vmem:[%s932_s1] sm:$0xff]  ;;  %v675_v33 = vld [vmem:[%s934_s0 + $0x10] sm:$0xf0] }
   0xa   :  { %378 = vmatpush.bf16.msra.mxu0 %v688_v8  ;;  %v692_v25 = vld [vmem:[%s932_s1 + $0x48] sm:$0xff]  ;;  %v691_v29 = vld [vmem:[%s932_s1 + $0x40] sm:$0xff]  ;;  %v491_v35 = vld [vmem:[%s934_s0 + $0x14] sm:$0xf0] }
   0xb   :  { %397 = vmatpush.bf16.msra.mxu1 %v696_v9  ;;  %v700_v26 = vld [vmem:[%s932_s1 + $0x88] sm:$0xff]  ;;  %v699_v30 = vld [vmem:[%s932_s1 + $0x80] sm:$0xff]  ;;  %v676_v37 = vld [vmem:[%s934_s0 + $0x18] sm:$0xf0] }
   0xc   :  { %416 = vmatpush.bf16.msra.mxu2 %v704_v10  ;;  %v708_v27 = vld [vmem:[%s932_s1 + $0xc8] sm:$0xff]  ;;  %v707_v31 = vld [vmem:[%s932_s1 + $0xc0] sm:$0xff]  ;;  %v718_v40 = vld [vmem:[%s932_s1 + $0x118] sm:$0xff] }
   0xd   :  { %435 = vmatpush.bf16.msra.mxu3 %v712_v11  ;;  %v489_v32 = vld [vmem:[%s934_s0] sm:$0xf]  ;;  %v673_v34 = vld [vmem:[%s934_s0 + $0x4] sm:$0xf]  ;;  %v497_v36 = vld [vmem:[%s934_s0 + $0x8] sm:$0xf] }
   0xe   :  { %379 = vmatpush.bf16.msra.mxu0 %v687_v12  ;;  %v674_v38 = vld [vmem:[%s934_s0 + $0xc] sm:$0xf]  ;;  %v499_v39 = vld [vmem:[%s934_s0 + $0x1c] sm:$0xf0]  ;;  %v490_v41 = vor.u32 %v675_v33, %v489_v32  ;;  %v494_v42 = vor.u32 %v673_v34, %v491_v35  ;;  %v498_v43 = vor.u32 %v676_v37, %v497_v36  ;;  %v717_v45 = vld [vmem:[%s932_s1 + $0x110] sm:$0xff] }
   0xf   :  { %398 = vmatpush.bf16.msra.mxu1 %v695_v13  ;;  %v502_v44 = vor.u32 %v674_v38, %v499_v39  ;;  %v716_v46 = vld [vmem:[%s932_s1 + $0x108] sm:$0xff]  ;;  %v715_v47 = vld [vmem:[%s932_s1 + $0x100] sm:$0xff]  ;;  %v680_v49 = vld [vmem:[%s934_s0 + $0x38] sm:$0xf0] }
  0x10   :  { %417 = vmatpush.bf16.msra.mxu2 %v703_v14  ;;  %v509_v48 = vld [vmem:[%s934_s0 + $0x28] sm:$0xf]  ;;  %v678_v50 = vld [vmem:[%s934_s0 + $0x2c] sm:$0xf]  ;;  %v511_v51 = vld [vmem:[%s934_s0 + $0x3c] sm:$0xf0] }
  0x11   :  { %436 = vmatpush.bf16.msra.mxu3 %v711_v15  ;;  %v517_v52 = vld [vmem:[%s934_s0 + $0x30] sm:$0xf]  ;;  %v681_v53 = vld [vmem:[%s934_s0 + $0x40] sm:$0xf0]  ;;  %v679_v54 = vld [vmem:[%s934_s0 + $0x34] sm:$0xf]  ;;  %v510_v56 = vor.u32 %v680_v49, %v509_v48  ;;  %v514_v57 = vor.u32 %v678_v50, %v511_v51 }
  0x12   :  { %380 = vmatpush.bf16.msra.mxu0 %v686_v16  ;;  %v519_v55 = vld [vmem:[%s934_s0 + $0x44] sm:$0xf0]  ;;  %v518_v58 = vor.u32 %v681_v53, %v517_v52  ;;  %v505_v60 = vld [vmem:[%s934_s0 + $0x10] sm:$0xf]  ;;  %v677_v61 = vld [vmem:[%s934_s0 + $0x20] sm:$0xf0] }
  0x13   :  { %399 = vmatpush.bf16.msra.mxu1 %v694_v17  ;;  %v522_v59 = vor.u32 %v679_v54, %v519_v55  ;;  %v525_v62 = vld [vmem:[%s934_s0 + $0x38] sm:$0xf]  ;;  %v682_v63 = vld [vmem:[%s934_s0 + $0x48] sm:$0xf0]  ;;  %v506_v0 = vor.u32 %v677_v61, %v505_v60  ;;  %v734_v12 = vld [vmem:[%s933_s2] ss:$0 sm:$0xff] }
  0x14   :  { %418 = vmatpush.bf16.msra.mxu2 %v702_v18  ;;  %v526_v1 = vor.u32 %v682_v63, %v525_v62 }
  0x15   :  { %437 = vmatpush.bf16.msra.mxu3 %v710_v19 }
  0x16   :  { %381 = vmatpush.bf16.msra.mxu0 %v685_v20 }
  0x17   :  { %400 = vmatpush.bf16.msra.mxu1 %v693_v21 }
  0x18   :  { %419 = vmatpush.bf16.msra.mxu2 %v701_v22 }
  0x19   :  { %438 = vmatpush.bf16.msra.mxu3 %v709_v23 }
  0x1a   :  { %382 = vmatpush.bf16.msra.mxu0 %v684_v24 }
  0x1b   :  { %401 = vmatpush.bf16.msra.mxu1 %v692_v25 }
  0x1c   :  { %420 = vmatpush.bf16.msra.mxu2 %v700_v26 }
  0x1d   :  { %439 = vmatpush.bf16.msra.mxu3 %v708_v27 }
  0x1e   :  { %383 = vmatpush.bf16.msra.mxu0 %v683_v28 }
  0x1f   :  { %402 = vmatpush.bf16.msra.mxu1 %v691_v29 }
  0x20   :  { %421 = vmatpush.bf16.msra.mxu2 %v699_v30 }
  0x21   :  { %440 = vmatpush.bf16.msra.mxu3 %v707_v31  ;;  %384 = vmatmul.bf16.vlgmr.msra.gmra.mxu0 %v490_v41 }
  0x22   :  { %456 = vmatpush.bf16.msrb.mxu0 %v718_v40  ;;  %403 = vmatmul.bf16.vlgmr.msra.gmra.mxu1 %v494_v42 }
  0x23   :  { %730 = vmatpush.bf16.msrb.mxu1 %v718_v40  ;;  %422 = vmatmul.bf16.vlgmr.msra.gmra.mxu2 %v498_v43 }
  0x24   :  { %441 = vmatmul.bf16.vlgmr.msra.gmra.mxu3 %v502_v44 }
  0x26   :  { %457 = vmatpush.bf16.msrb.mxu0 %v717_v45 }
  0x27   :  { %731 = vmatpush.bf16.msrb.mxu1 %v717_v45 }
  0x2a   :  { %458 = vmatpush.bf16.msrb.mxu0 %v716_v46 }
  0x2b   :  { %732 = vmatpush.bf16.msrb.mxu1 %v716_v46 }
  0x2e   :  { %459 = vmatpush.bf16.msrb.mxu0 %v715_v47 }
  0x2f   :  { %733 = vmatpush.bf16.msrb.mxu1 %v715_v47 }
  0x31   :  { %389 = vmatmul.bf16.gmra.mxu0 %v510_v56 }
  0x32   :  { %408 = vmatmul.bf16.gmra.mxu1 %v514_v57 }
  0x33   :  { %427 = vmatmul.bf16.gmra.mxu2 %v518_v58 }
  0x34   :  { %446 = vmatmul.bf16.gmra.mxu3 %v522_v59 }
  0x41   :  { %671 = vmatmul.msk.bf16.vlgmr.msrb.gmra.mxu0 %vm369_vm0, %v506_v0 }
  0x42   :  { %672 = vmatmul.msk.bf16.vlgmr.msrb.gmra.mxu1 %vm369_vm0, %v526_v1 }
  0x9e   :  { %v385_v2 = vpop.f32.mrf.mxu0 }
  0x9f   :  { %v404_v3 = vpop.f32.mrf.mxu1  ;;  %v386_v16 = vadd.f32 %v734_v12, %v385_v2 }
  0xa1   :  { %v405_v21 = vadd.f32 %v404_v3, %v386_v16 }
  0xa6   :  { %v423_v4 = vpop.f32.mrf.mxu2  ;;  %v387_v6 = vpop.f32.mrf.mxu0 }
  0xa7   :  { %v442_v5 = vpop.f32.mrf.mxu3  ;;  %v406_v7 = vpop.f32.mrf.mxu1  ;;  %v388_v19 = vadd.f32 %v734_v12, %v387_v6  ;;  %v424_v26 = vadd.f32 %v423_v4, %v405_v21 }
  0xa9   :  { %v407_v27 = vadd.f32 %v406_v7, %v388_v19  ;;  %v443_v32 = vadd.f32 %v442_v5, %v424_v26 }
  0xae   :  { %v425_v8 = vpop.f32.mrf.mxu2  ;;  %v390_v9 = vpop.f32.mrf.mxu0 }
  0xaf   :  { %v409_v10 = vpop.f32.mrf.mxu1  ;;  %v444_v11 = vpop.f32.mrf.mxu3  ;;  %v391_v17 = vadd.f32 %v734_v12, %v390_v9  ;;  %v426_v30 = vadd.f32 %v425_v8, %v407_v27 }
  0xb1   :  { %v410_v22 = vadd.f32 %v409_v10, %v391_v17  ;;  %v445_v35 = vadd.f32 %v444_v11, %v426_v30 }
  0xb6   :  { %v428_v13 = vpop.f32.mrf.mxu2  ;;  %v392_v14 = vpop.f32.mrf.mxu0 }
  0xb7   :  { %v411_v15 = vpop.f32.mrf.mxu1  ;;  %v447_v18 = vpop.f32.mrf.mxu3  ;;  %v393_v20 = vadd.f32 %v734_v12, %v392_v14  ;;  %v429_v28 = vadd.f32 %v428_v13, %v410_v22 }
  0xb9   :  { %v412_v29 = vadd.f32 %v411_v15, %v393_v20  ;;  %v448_v33 = vadd.f32 %v447_v18, %v429_v28 }
  0xbe   :  { %v430_v23 = vpop.f32.mrf.mxu2  ;;  %v461_v24 = vpop.f32.mrf.mxu0 }
  0xbf   :  { %v466_v25 = vpop.f32.mrf.mxu1  ;;  %v431_v31 = vadd.f32 %v430_v23, %v412_v29  ;;  %v449_v34 = vpop.f32.mrf.mxu3  ;;  %v462_v37 = vadd.f32 %v461_v24, %v443_v32 }
  0xc0   :  { %v467_v38 = vadd.f32 %v466_v25, %v448_v33 }
  0xc1   :  { %v450_v36 = vadd.f32 %v449_v34, %v431_v31  ;;  %v471_v43 = vmax.f32 %v462_v37, 0.0 }
  0xc2   :  { %v473_v44 = vmax.f32 %v467_v38, 0.0 }
  0xc6   :  { %v463_v39 = vpop.f32.mrf.mxu0 }
  0xc7   :  { %v468_v40 = vpop.f32.mrf.mxu1  ;;  %v464_v41 = vadd.f32 %v463_v39, %v445_v35 }
  0xc8   :  { %v469_v42 = vadd.f32 %v468_v40, %v450_v36 }
  0xc9   :  { %v472_v45 = vmax.f32 %v464_v41, 0.0 }
  0xca   :  { %v474_v46 = vmax.f32 %v469_v42, 0.0 }
  0xcb   :  { %v722_v47 = vpack.c.bf16 %v472_v45, %v471_v43 }
  0xcc   :  { %v727_v48 = vpack.c.bf16 %v474_v46, %v473_v44 }
  0xcd   :  { %723 = vst [vmem:[%s935_s3] sm:$0xff] %v722_v47  }
  0xce   :  { %729 = vst [vmem:[%s935_s3 + $0x8] sm:$0xff] %v727_v48  }

// kernel: motor_det_net.13
= control target key start
LH: loop header
LB: loop body
LE: loop exit
PB: predicated region body
PF: predicated region fallthrough
CT: control target
= control target key end

     0   :  { %s1888_s1 = inlined_call_operand.vmem [shape: bf16[1152,128], index: 1, kind: input, shape index: {}]   ;;  %s1889_s0 = inlined_call_operand.vmem [shape: bf16[32,1152], index: 0, kind: input, shape index: {}]   ;;  %s1890_s2 = inlined_call_operand.vmem [shape: f32[1,128], index: 2, kind: input, shape index: {}]   ;;  %s1891_s4 = inlined_call_operand.vmem [shape: f32[1,128], index: 4, kind: input, shape index: {}]   ;;  %s1892_s3 = inlined_call_operand.vmem [shape: bf16[128,128], index: 3, kind: input, shape index: {}]   ;;  %s1893_s5 = inlined_call_operand.vmem [shape: f32[32,128], index: 5, kind: output, shape index: {}]  }
   0x1   :  { %v1401_v0 = vld [vmem:[%s1888_s1 + $0x38] sm:$0xff]  ;;  %v1400_v4 = vld [vmem:[%s1888_s1 + $0x30] sm:$0xff]  ;;  %v1399_v8 = vld [vmem:[%s1888_s1 + $0x28] sm:$0xff] }
   0x2   :  { %v1417_v1 = vld [vmem:[%s1888_s1 + $0xb8] sm:$0xff]  ;;  %712 = vmatpush.bf16.msra.mxu0 %v1401_v0  ;;  %v1416_v5 = vld [vmem:[%s1888_s1 + $0xb0] sm:$0xff]  ;;  %v1415_v9 = vld [vmem:[%s1888_s1 + $0xa8] sm:$0xff] }
   0x3   :  { %v1409_v2 = vld [vmem:[%s1888_s1 + $0x78] sm:$0xff]  ;;  %750 = vmatpush.bf16.msra.mxu2 %v1417_v1  ;;  %v1408_v6 = vld [vmem:[%s1888_s1 + $0x70] sm:$0xff]  ;;  %v1407_v10 = vld [vmem:[%s1888_s1 + $0x68] sm:$0xff] }
   0x4   :  { %v1425_v3 = vld [vmem:[%s1888_s1 + $0xf8] sm:$0xff]  ;;  %731 = vmatpush.bf16.msra.mxu1 %v1409_v2  ;;  %v1424_v7 = vld [vmem:[%s1888_s1 + $0xf0] sm:$0xff]  ;;  %v1423_v11 = vld [vmem:[%s1888_s1 + $0xe8] sm:$0xff] }
   0x5   :  { %769 = vmatpush.bf16.msra.mxu3 %v1425_v3  ;;  %v1398_v12 = vld [vmem:[%s1888_s1 + $0x20] sm:$0xff]  ;;  %v1397_v16 = vld [vmem:[%s1888_s1 + $0x18] sm:$0xff]  ;;  %v1396_v20 = vld [vmem:[%s1888_s1 + $0x10] sm:$0xff] }
   0x6   :  { %713 = vmatpush.bf16.msra.mxu0 %v1400_v4  ;;  %v1414_v13 = vld [vmem:[%s1888_s1 + $0xa0] sm:$0xff]  ;;  %v1413_v17 = vld [vmem:[%s1888_s1 + $0x98] sm:$0xff]  ;;  %v1412_v21 = vld [vmem:[%s1888_s1 + $0x90] sm:$0xff] }
   0x7   :  { %751 = vmatpush.bf16.msra.mxu2 %v1416_v5  ;;  %v1406_v14 = vld [vmem:[%s1888_s1 + $0x60] sm:$0xff]  ;;  %v1405_v18 = vld [vmem:[%s1888_s1 + $0x58] sm:$0xff]  ;;  %v1404_v22 = vld [vmem:[%s1888_s1 + $0x50] sm:$0xff] }
   0x8   :  { %732 = vmatpush.bf16.msra.mxu1 %v1408_v6  ;;  %v1422_v15 = vld [vmem:[%s1888_s1 + $0xe0] sm:$0xff]  ;;  %v1421_v19 = vld [vmem:[%s1888_s1 + $0xd8] sm:$0xff]  ;;  %v1420_v23 = vld [vmem:[%s1888_s1 + $0xd0] sm:$0xff] }
   0x9   :  { %770 = vmatpush.bf16.msra.mxu3 %v1424_v7  ;;  %v1395_v24 = vld [vmem:[%s1888_s1 + $0x8] sm:$0xff]  ;;  %v1394_v28 = vld [vmem:[%s1888_s1] sm:$0xff]  ;;  %v996_v39 = vld [vmem:[%s1889_s0 + $0x2c] sm:$0xf0] }
   0xa   :  { %714 = vmatpush.bf16.msra.mxu0 %v1399_v8  ;;  %v1411_v25 = vld [vmem:[%s1888_s1 + $0x88] sm:$0xff]  ;;  %v1410_v29 = vld [vmem:[%s1888_s1 + $0x80] sm:$0xff]  ;;  %v1449_v40 = vld [vmem:[%s1888_s1 + $0x1b8] sm:$0xff] }
   0xb   :  { %752 = vmatpush.bf16.msra.mxu2 %v1415_v9  ;;  %v1403_v26 = vld [vmem:[%s1888_s1 + $0x48] sm:$0xff]  ;;  %v1402_v30 = vld [vmem:[%s1888_s1 + $0x40] sm:$0xff]  ;;  %v1433_v41 = vld [vmem:[%s1888_s1 + $0x138] sm:$0xff] }
   0xc   :  { %733 = vmatpush.bf16.msra.mxu1 %v1407_v10  ;;  %v1419_v27 = vld [vmem:[%s1888_s1 + $0xc8] sm:$0xff]  ;;  %v1418_v31 = vld [vmem:[%s1888_s1 + $0xc0] sm:$0xff]  ;;  %v1441_v46 = vld [vmem:[%s1888_s1 + $0x178] sm:$0xff] }
   0xd   :  { %771 = vmatpush.bf16.msra.mxu3 %v1423_v11  ;;  %v986_v32 = vld [vmem:[%s1889_s0] sm:$0xf]  ;;  %v1380_v33 = vld [vmem:[%s1889_s0 + $0x20] sm:$0xf0]  ;;  %v994_v34 = vld [vmem:[%s1889_s0 + $0x8] sm:$0xf] }
   0xe   :  { %715 = vmatpush.bf16.msra.mxu0 %v1398_v12  ;;  %v1381_v35 = vld [vmem:[%s1889_s0 + $0x28] sm:$0xf0]  ;;  %v1376_v36 = vld [vmem:[%s1889_s0 + $0x4] sm:$0xf]  ;;  %v988_v37 = vld [vmem:[%s1889_s0 + $0x24] sm:$0xf0]  ;;  %v987_v42 = vor.u32 %v1380_v33, %v986_v32 }
   0xf   :  { %753 = vmatpush.bf16.msra.mxu2 %v1414_v13  ;;  %v1377_v38 = vld [vmem:[%s1889_s0 + $0xc] sm:$0xf]  ;;  %v995_v43 = vor.u32 %v1381_v35, %v994_v34  ;;  %v991_v44 = vor.u32 %v1376_v36, %v988_v37  ;;  %v1457_v47 = vld [vmem:[%s1888_s1 + $0x1f8] sm:$0xff]  ;;  %v1448_v48 = vld [vmem:[%s1888_s1 + $0x1b0] sm:$0xff] }
  0x10   :  { %734 = vmatpush.bf16.msra.mxu1 %v1406_v14  ;;  %v999_v45 = vor.u32 %v1377_v38, %v996_v39  ;;  %v1432_v49 = vld [vmem:[%s1888_s1 + $0x130] sm:$0xff]  ;;  %v1447_v52 = vld [vmem:[%s1888_s1 + $0x1a8] sm:$0xff]  ;;  %v1446_v56 = vld [vmem:[%s1888_s1 + $0x1a0] sm:$0xff] }
  0x11   :  { %772 = vmatpush.bf16.msra.mxu3 %v1422_v15  ;;  %v1440_v50 = vld [vmem:[%s1888_s1 + $0x170] sm:$0xff]  ;;  %v1431_v53 = vld [vmem:[%s1888_s1 + $0x128] sm:$0xff]  ;;  %v1430_v57 = vld [vmem:[%s1888_s1 + $0x120] sm:$0xff] }
  0x12   :  { %716 = vmatpush.bf16.msra.mxu0 %v1397_v16  ;;  %v1456_v51 = vld [vmem:[%s1888_s1 + $0x1f0] sm:$0xff]  ;;  %v1439_v54 = vld [vmem:[%s1888_s1 + $0x168] sm:$0xff]  ;;  %v1438_v58 = vld [vmem:[%s1888_s1 + $0x160] sm:$0xff] }
  0x13   :  { %754 = vmatpush.bf16.msra.mxu2 %v1413_v17  ;;  %v1455_v55 = vld [vmem:[%s1888_s1 + $0x1e8] sm:$0xff]  ;;  %v1454_v59 = vld [vmem:[%s1888_s1 + $0x1e0] sm:$0xff]  ;;  %v1030_v62 = vld [vmem:[%s1889_s0 + $0x50] sm:$0xf] }
  0x14   :  { %735 = vmatpush.bf16.msra.mxu1 %v1405_v18  ;;  %v1022_v60 = vld [vmem:[%s1889_s0 + $0x48] sm:$0xf]  ;;  %v1389_v61 = vld [vmem:[%s1889_s0 + $0x68] sm:$0xf0]  ;;  %v1390_v63 = vld [vmem:[%s1889_s0 + $0x70] sm:$0xf0] }
  0x15   :  { %773 = vmatpush.bf16.msra.mxu3 %v1421_v19  ;;  %v1385_v0 = vld [vmem:[%s1889_s0 + $0x4c] sm:$0xf]  ;;  %v1024_v1 = vld [vmem:[%s1889_s0 + $0x6c] sm:$0xf0]  ;;  %v1386_v2 = vld [vmem:[%s1889_s0 + $0x54] sm:$0xf]  ;;  %v1023_v6 = vor.u32 %v1389_v61, %v1022_v60  ;;  %v1031_v7 = vor.u32 %v1390_v63, %v1030_v62 }
  0x16   :  { %717 = vmatpush.bf16.msra.mxu0 %v1396_v20  ;;  %v1032_v3 = vld [vmem:[%s1889_s0 + $0x74] sm:$0xf0]  ;;  %v1027_v8 = vor.u32 %v1385_v0, %v1024_v1  ;;  %v1444_v12 = vld [vmem:[%s1888_s1 + $0x190] sm:$0xff]  ;;  %v1443_v16 = vld [vmem:[%s1888_s1 + $0x188] sm:$0xff] }
  0x17   :  { %755 = vmatpush.bf16.msra.mxu2 %v1412_v21  ;;  %v1445_v4 = vld [vmem:[%s1888_s1 + $0x198] sm:$0xff]  ;;  %v1035_v9 = vor.u32 %v1386_v2, %v1032_v3  ;;  %v1428_v13 = vld [vmem:[%s1888_s1 + $0x110] sm:$0xff]  ;;  %v1427_v17 = vld [vmem:[%s1888_s1 + $0x108] sm:$0xff] }
  0x18   :  { %736 = vmatpush.bf16.msra.mxu1 %v1404_v22  ;;  %v1429_v5 = vld [vmem:[%s1888_s1 + $0x118] sm:$0xff]  ;;  %v1436_v14 = vld [vmem:[%s1888_s1 + $0x150] sm:$0xff]  ;;  %v1435_v18 = vld [vmem:[%s1888_s1 + $0x148] sm:$0xff] }
  0x19   :  { %774 = vmatpush.bf16.msra.mxu3 %v1420_v23  ;;  %v1437_v10 = vld [vmem:[%s1888_s1 + $0x158] sm:$0xff]  ;;  %v1452_v15 = vld [vmem:[%s1888_s1 + $0x1d0] sm:$0xff]  ;;  %v1451_v19 = vld [vmem:[%s1888_s1 + $0x1c8] sm:$0xff] }
  0x1a   :  { %718 = vmatpush.bf16.msra.mxu0 %v1395_v24  ;;  %v1453_v11 = vld [vmem:[%s1888_s1 + $0x1d8] sm:$0xff]  ;;  %v1442_v20 = vld [vmem:[%s1888_s1 + $0x180] sm:$0xff]  ;;  %v1002_v24 = vld [vmem:[%s1889_s0 + $0x10] sm:$0xf] }
  0x1b   :  { %756 = vmatpush.bf16.msra.mxu2 %v1411_v25  ;;  %v1426_v21 = vld [vmem:[%s1888_s1 + $0x100] sm:$0xff]  ;;  %v1382_v25 = vld [vmem:[%s1889_s0 + $0x30] sm:$0xf0]  ;;  %v1463_v38 = vld [vmem:[%s1888_s1 + $0x228] sm:$0xff] }
  0x1c   :  { %737 = vmatpush.bf16.msra.mxu1 %v1403_v26  ;;  %v1434_v22 = vld [vmem:[%s1888_s1 + $0x140] sm:$0xff]  ;;  %v1465_v26 = vld [vmem:[%s1888_s1 + $0x238] sm:$0xff]  ;;  %v1003_v33 = vor.u32 %v1382_v25, %v1002_v24  ;;  %v1464_v37 = vld [vmem:[%s1888_s1 + $0x230] sm:$0xff] }
  0x1d   :  { %775 = vmatpush.bf16.msra.mxu3 %v1419_v27  ;;  %v1450_v23 = vld [vmem:[%s1888_s1 + $0x1c0] sm:$0xff]  ;;  %v1010_v27 = vld [vmem:[%s1889_s0 + $0x18] sm:$0xf] }
  0x1e   :  { %719 = vmatpush.bf16.msra.mxu0 %v1394_v28  ;;  %v1383_v28 = vld [vmem:[%s1889_s0 + $0x38] sm:$0xf0]  ;;  %v1012_v32 = vld [vmem:[%s1889_s0 + $0x3c] sm:$0xf0] }
  0x1f   :  { %757 = vmatpush.bf16.msra.mxu2 %v1410_v29  ;;  %v1378_v29 = vld [vmem:[%s1889_s0 + $0x14] sm:$0xf]  ;;  %v1011_v34 = vor.u32 %v1383_v28, %v1010_v27  ;;  %v1462_v39 = vld [vmem:[%s1888_s1 + $0x220] sm:$0xff] }
  0x20   :  { %738 = vmatpush.bf16.msra.mxu1 %v1402_v30  ;;  %v1004_v30 = vld [vmem:[%s1889_s0 + $0x34] sm:$0xf0]  ;;  %v1490_v25 = vld [vmem:[%s1890_s2] ss:$0 sm:$0xff] }
  0x21   :  { %776 = vmatpush.bf16.msra.mxu3 %v1418_v31  ;;  %720 = vmatmul.bf16.vlgmr.msra.gmra.mxu0 %v987_v42  ;;  %v1379_v31 = vld [vmem:[%s1889_s0 + $0x1c] sm:$0xf]  ;;  %v1007_v35 = vor.u32 %v1378_v29, %v1004_v30  ;;  %v1046_v42 = vld [vmem:[%s1889_s0 + $0x60] sm:$0xf] }
  0x22   :  { %788 = vmatpush.bf16.msrb.mxu0 %v1433_v41  ;;  %758 = vmatmul.bf16.vlgmr.msra.gmra.mxu2 %v995_v43  ;;  %v1015_v36 = vor.u32 %v1379_v31, %v1012_v32  ;;  %v1391_v41 = vld [vmem:[%s1889_s0 + $0x78] sm:$0xf0]  ;;  %v1392_v43 = vld [vmem:[%s1889_s0 + $0x80] sm:$0xf0] }
  0x23   :  { %826 = vmatpush.bf16.msrb.mxu2 %v1449_v40  ;;  %739 = vmatmul.bf16.vlgmr.msra.gmra.mxu1 %v991_v44  ;;  %v1038_v40 = vld [vmem:[%s1889_s0 + $0x58] sm:$0xf] }
  0x24   :  { %777 = vmatmul.bf16.vlgmr.msra.gmra.mxu3 %v999_v45  ;;  %807 = vmatpush.bf16.msrb.mxu1 %v1441_v46  ;;  %v1461_v44 = vld [vmem:[%s1888_s1 + $0x218] sm:$0xff]  ;;  %v1040_v46 = vld [vmem:[%s1889_s0 + $0x7c] sm:$0xf0] }
  0x25   :  { %845 = vmatpush.bf16.msrb.mxu3 %v1457_v47  ;;  %v1387_v45 = vld [vmem:[%s1889_s0 + $0x5c] sm:$0xf]  ;;  %v1388_v47 = vld [vmem:[%s1889_s0 + $0x64] sm:$0xf] }
  0x26   :  { %789 = vmatpush.bf16.msrb.mxu0 %v1432_v49  ;;  %v1039_v49 = vor.u32 %v1391_v41, %v1038_v40 }
  0x27   :  { %827 = vmatpush.bf16.msrb.mxu2 %v1448_v48  ;;  %v1048_v48 = vld [vmem:[%s1889_s0 + $0x84] sm:$0xf0] }
  0x28   :  { %808 = vmatpush.bf16.msrb.mxu1 %v1440_v50  ;;  %v1047_v50 = vor.u32 %v1392_v43, %v1046_v42 }
  0x29   :  { %846 = vmatpush.bf16.msrb.mxu3 %v1456_v51  ;;  %v1043_v51 = vor.u32 %v1387_v45, %v1040_v46 }
  0x2a   :  { %790 = vmatpush.bf16.msrb.mxu0 %v1431_v53  ;;  %v1460_v53 = vld [vmem:[%s1888_s1 + $0x210] sm:$0xff] }
  0x2b   :  { %828 = vmatpush.bf16.msrb.mxu2 %v1447_v52  ;;  %v1051_v52 = vor.u32 %v1388_v47, %v1048_v48 }
  0x2c   :  { %809 = vmatpush.bf16.msrb.mxu1 %v1439_v54  ;;  %v1459_v54 = vld [vmem:[%s1888_s1 + $0x208] sm:$0xff] }
  0x2d   :  { %847 = vmatpush.bf16.msrb.mxu3 %v1455_v55  ;;  %v1458_v55 = vld [vmem:[%s1888_s1 + $0x200] sm:$0xff] }
  0x2e   :  { %791 = vmatpush.bf16.msrb.mxu0 %v1430_v57  ;;  %v1384_v57 = vld [vmem:[%s1889_s0 + $0x40] sm:$0xf0] }
  0x2f   :  { %829 = vmatpush.bf16.msrb.mxu2 %v1446_v56  ;;  %v1018_v56 = vld [vmem:[%s1889_s0 + $0x20] sm:$0xf] }
  0x30   :  { %810 = vmatpush.bf16.msrb.mxu1 %v1438_v58  ;;  %v1054_v58 = vld [vmem:[%s1889_s0 + $0x68] sm:$0xf]  ;;  %v1019_v60 = vor.u32 %v1384_v57, %v1018_v56 }
  0x31   :  { %848 = vmatpush.bf16.msrb.mxu3 %v1454_v59  ;;  %725 = vmatmul.bf16.gmra.mxu0 %v1023_v6  ;;  %v1393_v59 = vld [vmem:[%s1889_s0 + $0x88] sm:$0xf0] }
  0x32   :  { %792 = vmatpush.bf16.msrb.mxu0 %v1429_v5  ;;  %763 = vmatmul.bf16.gmra.mxu2 %v1031_v7  ;;  %v1055_v61 = vor.u32 %v1393_v59, %v1054_v58  ;;  %v1473_v5 = vld [vmem:[%s1892_s3 + $0x38] sm:$0xff] }
  0x33   :  { %830 = vmatpush.bf16.msrb.mxu2 %v1445_v4  ;;  %744 = vmatmul.bf16.gmra.mxu1 %v1027_v8 }
  0x34   :  { %782 = vmatmul.bf16.gmra.mxu3 %v1035_v9  ;;  %811 = vmatpush.bf16.msrb.mxu1 %v1437_v10  ;;  %v1472_v9 = vld [vmem:[%s1892_s3 + $0x30] sm:$0xff] }
  0x35   :  { %849 = vmatpush.bf16.msrb.mxu3 %v1453_v11  ;;  %v1471_v11 = vld [vmem:[%s1892_s3 + $0x28] sm:$0xff] }
  0x36   :  { %793 = vmatpush.bf16.msrb.mxu0 %v1428_v13 }
  0x37   :  { %831 = vmatpush.bf16.msrb.mxu2 %v1444_v12 }
  0x38   :  { %812 = vmatpush.bf16.msrb.mxu1 %v1436_v14  ;;  %v1470_v14 = vld [vmem:[%s1892_s3 + $0x20] sm:$0xff] }
  0x39   :  { %850 = vmatpush.bf16.msrb.mxu3 %v1452_v15 }
  0x3a   :  { %794 = vmatpush.bf16.msrb.mxu0 %v1427_v17  ;;  %v1469_v17 = vld [vmem:[%s1892_s3 + $0x18] sm:$0xff] }
  0x3b   :  { %832 = vmatpush.bf16.msrb.mxu2 %v1443_v16 }
  0x3c   :  { %813 = vmatpush.bf16.msrb.mxu1 %v1435_v18 }
  0x3d   :  { %851 = vmatpush.bf16.msrb.mxu3 %v1451_v19 }
  0x3e   :  { %795 = vmatpush.bf16.msrb.mxu0 %v1426_v21 }
  0x3f   :  { %833 = vmatpush.bf16.msrb.mxu2 %v1442_v20  ;;  %v1468_v20 = vld [vmem:[%s1892_s3 + $0x10] sm:$0xff] }
  0x40   :  { %814 = vmatpush.bf16.msrb.mxu1 %v1434_v22 }
  0x41   :  { %852 = vmatpush.bf16.msrb.mxu3 %v1450_v23  ;;  %796 = vmatmul.bf16.vlgmr.msrb.gmra.mxu0 %v1003_v33  ;;  %v1467_v23 = vld [vmem:[%s1892_s3 + $0x8] sm:$0xff] }
  0x42   :  { %864 = vmatpush.bf16.msra.mxu0 %v1465_v26  ;;  %834 = vmatmul.bf16.vlgmr.msrb.gmra.mxu2 %v1011_v34 }
  0x43   :  { %1474 = vmatpush.bf16.msra.mxu2 %v1465_v26  ;;  %815 = vmatmul.bf16.vlgmr.msrb.gmra.mxu1 %v1007_v35  ;;  %v1466_v26 = vld [vmem:[%s1892_s3] sm:$0xff] }
  0x44   :  { %853 = vmatmul.bf16.vlgmr.msrb.gmra.mxu3 %v1015_v36  ;;  %957 = vmatpush.bf16.msra.mxu1 %v1473_v5 }
  0x45   :  { %1482 = vmatpush.bf16.msra.mxu3 %v1473_v5 }
  0x46   :  { %865 = vmatpush.bf16.msra.mxu0 %v1464_v37 }
  0x47   :  { %1475 = vmatpush.bf16.msra.mxu2 %v1464_v37 }
  0x48   :  { %958 = vmatpush.bf16.msra.mxu1 %v1472_v9 }
  0x49   :  { %1483 = vmatpush.bf16.msra.mxu3 %v1472_v9 }
  0x4a   :  { %866 = vmatpush.bf16.msra.mxu0 %v1463_v38 }
  0x4b   :  { %1476 = vmatpush.bf16.msra.mxu2 %v1463_v38 }
  0x4c   :  { %959 = vmatpush.bf16.msra.mxu1 %v1471_v11 }
  0x4d   :  { %1484 = vmatpush.bf16.msra.mxu3 %v1471_v11 }
  0x4e   :  { %867 = vmatpush.bf16.msra.mxu0 %v1462_v39 }
  0x4f   :  { %1477 = vmatpush.bf16.msra.mxu2 %v1462_v39 }
  0x50   :  { %960 = vmatpush.bf16.msra.mxu1 %v1470_v14 }
  0x51   :  { %801 = vmatmul.bf16.gmra.mxu0 %v1039_v49  ;;  %1485 = vmatpush.bf16.msra.mxu3 %v1470_v14 }
  0x52   :  { %868 = vmatpush.bf16.msra.mxu0 %v1461_v44  ;;  %839 = vmatmul.bf16.gmra.mxu2 %v1047_v50 }
  0x53   :  { %1478 = vmatpush.bf16.msra.mxu2 %v1461_v44  ;;  %820 = vmatmul.bf16.gmra.mxu1 %v1043_v51 }
  0x54   :  { %858 = vmatmul.bf16.gmra.mxu3 %v1051_v52  ;;  %961 = vmatpush.bf16.msra.mxu1 %v1469_v17 }
  0x55   :  { %1486 = vmatpush.bf16.msra.mxu3 %v1469_v17 }
  0x56   :  { %869 = vmatpush.bf16.msra.mxu0 %v1460_v53 }
  0x57   :  { %1479 = vmatpush.bf16.msra.mxu2 %v1460_v53 }
  0x58   :  { %962 = vmatpush.bf16.msra.mxu1 %v1468_v20 }
  0x59   :  { %1487 = vmatpush.bf16.msra.mxu3 %v1468_v20 }
  0x5a   :  { %870 = vmatpush.bf16.msra.mxu0 %v1459_v54 }
  0x5b   :  { %1480 = vmatpush.bf16.msra.mxu2 %v1459_v54 }
  0x5c   :  { %963 = vmatpush.bf16.msra.mxu1 %v1467_v23 }
  0x5d   :  { %1488 = vmatpush.bf16.msra.mxu3 %v1467_v23 }
  0x5e   :  { %871 = vmatpush.bf16.msra.mxu0 %v1458_v55 }
  0x5f   :  { %1481 = vmatpush.bf16.msra.mxu2 %v1458_v55 }
  0x60   :  { %964 = vmatpush.bf16.msra.mxu1 %v1466_v26 }
  0x61   :  { %872 = vmatmul.bf16.vlgmr.msra.gmra.mxu0 %v1019_v60  ;;  %1489 = vmatpush.bf16.msra.mxu3 %v1466_v26 }
  0x62   :  { %877 = vmatmul.bf16.vlgmr.msra.gmra.mxu2 %v1055_v61 }
  0x9e   :  { %v721_v62 = vpop.f32.mrf.mxu0 }
  0x9f   :  { %v722_v28 = vadd.f32 %v1490_v25, %v721_v62 }
  0xa0   :  { %v740_v63 = vpop.f32.mrf.mxu1 }
  0xa1   :  { %v741_v33 = vadd.f32 %v740_v63, %v722_v28 }
  0xa5   :  { %v759_v0 = vpop.f32.mrf.mxu2 }
  0xa6   :  { %v723_v2 = vpop.f32.mrf.mxu0  ;;  %v760_v36 = vadd.f32 %v759_v0, %v741_v33 }
  0xa7   :  { %v778_v1 = vpop.f32.mrf.mxu3  ;;  %v724_v30 = vadd.f32 %v1490_v25, %v723_v2 }
  0xa8   :  { %v742_v3 = vpop.f32.mrf.mxu1  ;;  %v779_v43 = vadd.f32 %v778_v1, %v760_v36 }
  0xa9   :  { %v743_v34 = vadd.f32 %v742_v3, %v724_v30 }
  0xad   :  { %v761_v4 = vpop.f32.mrf.mxu2 }
  0xae   :  { %v726_v7 = vpop.f32.mrf.mxu0  ;;  %v762_v40 = vadd.f32 %v761_v4, %v743_v34 }
  0xaf   :  { %v780_v6 = vpop.f32.mrf.mxu3  ;;  %v727_v35 = vadd.f32 %v1490_v25, %v726_v7 }
  0xb0   :  { %v745_v8 = vpop.f32.mrf.mxu1  ;;  %v781_v46 = vadd.f32 %v780_v6, %v762_v40 }
  0xb1   :  { %v746_v41 = vadd.f32 %v745_v8, %v727_v35 }
  0xb5   :  { %v764_v10 = vpop.f32.mrf.mxu2 }
  0xb6   :  { %v728_v12 = vpop.f32.mrf.mxu0  ;;  %v765_v47 = vadd.f32 %v764_v10, %v746_v41 }
  0xb7   :  { %v783_v13 = vpop.f32.mrf.mxu3  ;;  %v729_v37 = vadd.f32 %v1490_v25, %v728_v12 }
  0xb8   :  { %v747_v15 = vpop.f32.mrf.mxu1  ;;  %v784_v52 = vadd.f32 %v783_v13, %v765_v47 }
  0xb9   :  { %v748_v44 = vadd.f32 %v747_v15, %v729_v37 }
  0xbd   :  { %v766_v16 = vpop.f32.mrf.mxu2 }
  0xbe   :  { %v797_v18 = vpop.f32.mrf.mxu0  ;;  %v767_v49 = vadd.f32 %v766_v16, %v748_v44 }
  0xbf   :  { %v785_v19 = vpop.f32.mrf.mxu3  ;;  %v798_v48 = vadd.f32 %v797_v18, %v779_v43 }
  0xc0   :  { %v816_v21 = vpop.f32.mrf.mxu1  ;;  %v786_v56 = vadd.f32 %v785_v19, %v767_v49 }
  0xc1   :  { %v817_v53 = vadd.f32 %v816_v21, %v798_v48  ;;  %v1491_v21 = vld [vmem:[%s1891_s4] ss:$0 sm:$0xff] }
  0xc5   :  { %v835_v22 = vpop.f32.mrf.mxu2 }
  0xc6   :  { %v799_v24 = vpop.f32.mrf.mxu0  ;;  %v836_v57 = vadd.f32 %v835_v22, %v817_v53 }
  0xc7   :  { %v854_v27 = vpop.f32.mrf.mxu3  ;;  %v800_v50 = vadd.f32 %v799_v24, %v781_v46 }
  0xc8   :  { %v818_v31 = vpop.f32.mrf.mxu1  ;;  %v855_v63 = vadd.f32 %v854_v27, %v836_v57 }
  0xc9   :  { %v819_v58 = vadd.f32 %v818_v31, %v800_v50 }
  0xcd   :  { %v837_v29 = vpop.f32.mrf.mxu2 }
  0xce   :  { %v802_v32 = vpop.f32.mrf.mxu0  ;;  %v838_v60 = vadd.f32 %v837_v29, %v819_v58 }
  0xcf   :  { %v856_v38 = vpop.f32.mrf.mxu3  ;;  %v803_v59 = vadd.f32 %v802_v32, %v784_v52 }
  0xd0   :  { %v821_v45 = vpop.f32.mrf.mxu1  ;;  %v857_v2 = vadd.f32 %v856_v38, %v838_v60 }
  0xd1   :  { %v822_v0 = vadd.f32 %v821_v45, %v803_v59 }
  0xd5   :  { %v840_v39 = vpop.f32.mrf.mxu2 }
  0xd6   :  { %v804_v42 = vpop.f32.mrf.mxu0  ;;  %v841_v3 = vadd.f32 %v840_v39, %v822_v0 }
  0xd7   :  { %v859_v54 = vpop.f32.mrf.mxu3  ;;  %v805_v61 = vadd.f32 %v804_v42, %v786_v56 }
  0xd8   :  { %v823_v62 = vpop.f32.mrf.mxu1  ;;  %v860_v10 = vadd.f32 %v859_v54, %v841_v3 }
  0xd9   :  { %v824_v4 = vadd.f32 %v823_v62, %v805_v61 }
  0xdd   :  { %v842_v51 = vpop.f32.mrf.mxu2 }
  0xde   :  { %v873_v55 = vpop.f32.mrf.mxu0  ;;  %v843_v7 = vadd.f32 %v842_v51, %v824_v4 }
  0xdf   :  { %v874_v5 = vadd.f32 %v873_v55, %v855_v63  ;;  %v861_v9 = vpop.f32.mrf.mxu3 }
  0xe0   :  { %v862_v13 = vadd.f32 %v861_v9, %v843_v7 }
  0xe1   :  { %v883_v11 = vmax.f32 %v874_v5, 0.0 }
  0xe5   :  { %v878_v1 = vpop.f32.mrf.mxu2 }
  0xe6   :  { %v875_v6 = vpop.f32.mrf.mxu0  ;;  %v879_v14 = vadd.f32 %v878_v1, %v860_v10 }
  0xe7   :  { %v876_v8 = vadd.f32 %v875_v6, %v857_v2 }
  0xe8   :  { %v885_v18 = vmax.f32 %v879_v14, 0.0 }
  0xe9   :  { %v884_v12 = vmax.f32 %v876_v8, 0.0 }
  0xeb   :  { %v887_v15 = vpack.c.bf16 %v884_v12, %v883_v11 }
  0xed   :  { %v880_v16 = vpop.f32.mrf.mxu2  ;;  %965 = vmatmul.bf16.vlgmr.msra.gmra.mxu1 %v887_v15 }
  0xee   :  { %v881_v17 = vadd.f32 %v880_v16, %v862_v13 }
  0xf0   :  { %v886_v19 = vmax.f32 %v881_v17, 0.0 }
  0xf2   :  { %v888_v20 = vpack.c.bf16 %v886_v19, %v885_v18 }
  0xf4   :  { %970 = vmatmul.bf16.vlgmr.msra.gmra.mxu3 %v888_v20 }
 0x16a   :  { %v966_v22 = vpop.f32.mrf.mxu1 }
 0x16b   :  { %v967_v23 = vadd.f32 %v1491_v21, %v966_v22 }
 0x16d   :  { %976 = vst [vmem:[%s1893_s5] sm:$0xff] %v967_v23 }
 0x172   :  { %v968_v24 = vpop.f32.mrf.mxu1 }
 0x173   :  { %v969_v25 = vadd.f32 %v1491_v21, %v968_v24 }
 0x175   :  { %977 = vst [vmem:[%s1893_s5 + $0x8] sm:$0xff] %v969_v25 }
 0x177   :  { %v971_v26 = vpop.f32.mrf.mxu3 }
 0x178   :  { %v972_v27 = vadd.f32 %v1491_v21, %v971_v26 }
 0x17a   :  { %978 = vst [vmem:[%s1893_s5 + $0x10] sm:$0xff] %v972_v27 }
 0x17f   :  { %v973_v28 = vpop.f32.mrf.mxu3 }
 0x180   :  { %v974_v29 = vadd.f32 %v1491_v21, %v973_v28 }
 0x182   :  { %979 = vst [vmem:[%s1893_s5 + $0x18] sm:$0xff] %v974_v29 }

// kernel: motor_det_net.12
= control target key start
LH: loop header
LB: loop body
LE: loop exit
PB: predicated region body
PF: predicated region fallthrough
CT: control target
= control target key end

     0   :  { %vm561_vm0 = vcmask 523264   ;;  %s1944_s1 = inlined_call_operand.vmem [shape: bf16[576,64], index: 1, kind: input, shape index: {}]   ;;  %s1945_s2 = inlined_call_operand.vmem [shape: f32[1,64], index: 2, kind: input, shape index: {}]   ;;  %s1946_s0 = inlined_call_operand.vmem [shape: bf16[128,576], index: 0, kind: input, shape index: {}]   ;;  %s1947_s3 = inlined_call_operand.vmem [shape: bf16[64,128], index: 3, kind: input, shape index: {}]   ;;  %s1948_s4 = inlined_call_operand.vmem [shape: f32[1,128], index: 4, kind: input, shape index: {}]   ;;  %s1949_s5 = inlined_call_operand.vmem [shape: f32[128,128], index: 5, kind: output, shape index: {}]  }
   0x1   :  { %v1367_v0 = vld [vmem:[%s1944_s1 + $0x38] sm:$0xff]  ;;  %v1366_v2 = vld [vmem:[%s1944_s1 + $0x30] sm:$0xff]  ;;  %v1365_v4 = vld [vmem:[%s1944_s1 + $0x28] sm:$0xff] }
   0x2   :  { %v1375_v1 = vld [vmem:[%s1944_s1 + $0x78] sm:$0xff]  ;;  %1400 = vmatpush.bf16.msra.mxu2 %v1367_v0  ;;  %v1374_v3 = vld [vmem:[%s1944_s1 + $0x70] sm:$0xff]  ;;  %586 = vmatpush.bf16.msra.mxu0 %v1367_v0  ;;  %v1373_v5 = vld [vmem:[%s1944_s1 + $0x68] sm:$0xff] }
   0x3   :  { %1408 = vmatpush.bf16.msra.mxu3 %v1375_v1  ;;  %635 = vmatpush.bf16.msra.mxu1 %v1375_v1  ;;  %v1364_v6 = vld [vmem:[%s1944_s1 + $0x20] sm:$0xff]  ;;  %v1363_v8 = vld [vmem:[%s1944_s1 + $0x18] sm:$0xff]  ;;  %v1362_v10 = vld [vmem:[%s1944_s1 + $0x10] sm:$0xff] }
   0x4   :  { %v1372_v7 = vld [vmem:[%s1944_s1 + $0x60] sm:$0xff]  ;;  %v1371_v9 = vld [vmem:[%s1944_s1 + $0x58] sm:$0xff]  ;;  %v1370_v11 = vld [vmem:[%s1944_s1 + $0x50] sm:$0xff] }
   0x5   :  { %v1361_v12 = vld [vmem:[%s1944_s1 + $0x8] sm:$0xff]  ;;  %v1360_v14 = vld [vmem:[%s1944_s1] sm:$0xff]  ;;  %v1342_v17 = vld [vmem:[%s1946_s0 + $0xb0] sm:$0xf0] }
   0x6   :  { %1401 = vmatpush.bf16.msra.mxu2 %v1366_v2  ;;  %587 = vmatpush.bf16.msra.mxu0 %v1366_v2  ;;  %v1369_v13 = vld [vmem:[%s1944_s1 + $0x48] sm:$0xff]  ;;  %v1368_v15 = vld [vmem:[%s1944_s1 + $0x40] sm:$0xff]  ;;  %v1068_v19 = vld [vmem:[%s1946_s0 + $0xb4] sm:$0xf0] }
   0x7   :  { %1409 = vmatpush.bf16.msra.mxu3 %v1374_v3  ;;  %636 = vmatpush.bf16.msra.mxu1 %v1374_v3  ;;  %v1066_v16 = vld [vmem:[%s1946_s0 + $0xa0] sm:$0xf]  ;;  %v1340_v18 = vld [vmem:[%s1946_s0 + $0xa4] sm:$0xf]  ;;  %v1383_v20 = vld [vmem:[%s1944_s1 + $0xb8] sm:$0xff] }
   0x8   :  { %v986_v21 = vld [vmem:[%s1946_s0] sm:$0xf]  ;;  %v1322_v22 = vld [vmem:[%s1946_s0 + $0x10] sm:$0xf0]  ;;  %v1391_v23 = vld [vmem:[%s1944_s1 + $0xf8] sm:$0xff]  ;;  %v1067_v26 = vor.u32 %v1342_v17, %v1066_v16  ;;  %v1071_v27 = vor.u32 %v1340_v18, %v1068_v19 }
   0x9   :  { %v1320_v24 = vld [vmem:[%s1946_s0 + $0x4] sm:$0xf]  ;;  %v988_v25 = vld [vmem:[%s1946_s0 + $0x14] sm:$0xf0]  ;;  %v987_v28 = vor.u32 %v1322_v22, %v986_v21  ;;  %v1382_v30 = vld [vmem:[%s1944_s1 + $0xb0] sm:$0xff] }
   0xa   :  { %1402 = vmatpush.bf16.msra.mxu2 %v1365_v4  ;;  %588 = vmatpush.bf16.msra.mxu0 %v1365_v4  ;;  %v991_v29 = vor.u32 %v1320_v24, %v988_v25  ;;  %v1390_v31 = vld [vmem:[%s1944_s1 + $0xf0] sm:$0xff]  ;;  %v1395_v32 = vld [vmem:[%s1944_s1 + $0x118] sm:$0xff]  ;;  %v1381_v33 = vld [vmem:[%s1944_s1 + $0xa8] sm:$0xff] }
   0xb   :  { %1410 = vmatpush.bf16.msra.mxu3 %v1373_v5  ;;  %637 = vmatpush.bf16.msra.mxu1 %v1373_v5  ;;  %v1389_v34 = vld [vmem:[%s1944_s1 + $0xe8] sm:$0xff]  ;;  %v1394_v35 = vld [vmem:[%s1944_s1 + $0x110] sm:$0xff]  ;;  %v1380_v36 = vld [vmem:[%s1944_s1 + $0xa0] sm:$0xff] }
   0xc   :  { %v1388_v37 = vld [vmem:[%s1944_s1 + $0xe0] sm:$0xff]  ;;  %v1393_v38 = vld [vmem:[%s1944_s1 + $0x108] sm:$0xff]  ;;  %v1347_v40 = vld [vmem:[%s1946_s0 + $0xd8] sm:$0xf0] }
   0xd   :  { %v1086_v39 = vld [vmem:[%s1946_s0 + $0xc8] sm:$0xf]  ;;  %v1345_v41 = vld [vmem:[%s1946_s0 + $0xcc] sm:$0xf]  ;;  %v1088_v42 = vld [vmem:[%s1946_s0 + $0xdc] sm:$0xf0] }
   0xe   :  { %1403 = vmatpush.bf16.msra.mxu2 %v1364_v6  ;;  %589 = vmatpush.bf16.msra.mxu0 %v1364_v6  ;;  %v1006_v43 = vld [vmem:[%s1946_s0 + $0x28] sm:$0xf]  ;;  %v1327_v44 = vld [vmem:[%s1946_s0 + $0x38] sm:$0xf0]  ;;  %v1325_v46 = vld [vmem:[%s1946_s0 + $0x2c] sm:$0xf]  ;;  %v1087_v49 = vor.u32 %v1347_v40, %v1086_v39  ;;  %v1091_v50 = vor.u32 %v1345_v41, %v1088_v42 }
   0xf   :  { %1411 = vmatpush.bf16.msra.mxu3 %v1372_v7  ;;  %638 = vmatpush.bf16.msra.mxu1 %v1372_v7  ;;  %v1379_v45 = vld [vmem:[%s1944_s1 + $0x98] sm:$0xff]  ;;  %v1008_v47 = vld [vmem:[%s1946_s0 + $0x3c] sm:$0xf0]  ;;  %v1007_v51 = vor.u32 %v1327_v44, %v1006_v43  ;;  %v1378_v53 = vld [vmem:[%s1944_s1 + $0x90] sm:$0xff] }
  0x10   :  { %v1387_v48 = vld [vmem:[%s1944_s1 + $0xd8] sm:$0xff]  ;;  %v1011_v52 = vor.u32 %v1325_v46, %v1008_v47  ;;  %v1386_v54 = vld [vmem:[%s1944_s1 + $0xd0] sm:$0xff]  ;;  %v1377_v55 = vld [vmem:[%s1944_s1 + $0x88] sm:$0xff] }
  0x11   :  { %v1392_v56 = vld [vmem:[%s1944_s1 + $0x100] sm:$0xff]  ;;  %v1385_v57 = vld [vmem:[%s1944_s1 + $0xc8] sm:$0xff]  ;;  %v1106_v60 = vld [vmem:[%s1946_s0 + $0xf0] sm:$0xf] }
  0x12   :  { %1404 = vmatpush.bf16.msra.mxu2 %v1363_v8  ;;  %590 = vmatpush.bf16.msra.mxu0 %v1363_v8  ;;  %v1376_v58 = vld [vmem:[%s1944_s1 + $0x80] sm:$0xff]  ;;  %v1350_v62 = vld [vmem:[%s1946_s0 + $0xf4] sm:$0xf]  ;;  %v1108_v63 = vld [vmem:[%s1946_s0 + $0x104] sm:$0xf0] }
  0x13   :  { %1412 = vmatpush.bf16.msra.mxu3 %v1371_v9  ;;  %639 = vmatpush.bf16.msra.mxu1 %v1371_v9  ;;  %v1384_v59 = vld [vmem:[%s1944_s1 + $0xc0] sm:$0xff]  ;;  %v1026_v0 = vld [vmem:[%s1946_s0 + $0x50] sm:$0xf]  ;;  %v1330_v2 = vld [vmem:[%s1946_s0 + $0x54] sm:$0xf]  ;;  %v1111_v5 = vor.u32 %v1350_v62, %v1108_v63 }
  0x14   :  { %v1352_v61 = vld [vmem:[%s1946_s0 + $0x100] sm:$0xf0]  ;;  %v1028_v3 = vld [vmem:[%s1946_s0 + $0x64] sm:$0xf0]  ;;  %v1126_v8 = vld [vmem:[%s1946_s0 + $0x118] sm:$0xf] }
  0x15   :  { %v1332_v1 = vld [vmem:[%s1946_s0 + $0x60] sm:$0xf0]  ;;  %v1107_v4 = vor.u32 %v1352_v61, %v1106_v60  ;;  %v1031_v7 = vor.u32 %v1330_v2, %v1028_v3  ;;  %v1357_v9 = vld [vmem:[%s1946_s0 + $0x128] sm:$0xf0]  ;;  %v1323_v21 = vld [vmem:[%s1946_s0 + $0x18] sm:$0xf0] }
  0x16   :  { %1405 = vmatpush.bf16.msra.mxu2 %v1362_v10  ;;  %591 = vmatpush.bf16.msra.mxu0 %v1362_v10  ;;  %v1027_v6 = vor.u32 %v1332_v1, %v1026_v0  ;;  %v1355_v10 = vld [vmem:[%s1946_s0 + $0x11c] sm:$0xf]  ;;  %v1127_v16 = vor.u32 %v1357_v9, %v1126_v8  ;;  %v1321_v22 = vld [vmem:[%s1946_s0 + $0xc] sm:$0xf]  ;;  %v1002_v24 = vld [vmem:[%s1946_s0 + $0x10] sm:$0xf] }
  0x17   :  { %1413 = vmatpush.bf16.msra.mxu3 %v1370_v11  ;;  %640 = vmatpush.bf16.msra.mxu1 %v1370_v11  ;;  %v1128_v11 = vld [vmem:[%s1946_s0 + $0x12c] sm:$0xf0]  ;;  %v1324_v25 = vld [vmem:[%s1946_s0 + $0x20] sm:$0xf0]  ;;  %v1333_v39 = vld [vmem:[%s1946_s0 + $0x68] sm:$0xf0] }
  0x18   :  { %v1131_v17 = vor.u32 %v1355_v10, %v1128_v11  ;;  %v1331_v40 = vld [vmem:[%s1946_s0 + $0x5c] sm:$0xf]  ;;  %v1036_v41 = vld [vmem:[%s1946_s0 + $0x6c] sm:$0xf0]  ;;  %v1042_v42 = vld [vmem:[%s1946_s0 + $0x60] sm:$0xf] }
  0x19   :  { %v1334_v43 = vld [vmem:[%s1946_s0 + $0x70] sm:$0xf0]  ;;  %v1054_v47 = vld [vmem:[%s1946_s0 + $0x80] sm:$0xf]  ;;  %v1082_v61 = vld [vmem:[%s1946_s0 + $0xb0] sm:$0xf] }
  0x1a   :  { %1406 = vmatpush.bf16.msra.mxu2 %v1361_v12  ;;  %592 = vmatpush.bf16.msra.mxu0 %v1361_v12  ;;  %v1046_v12 = vld [vmem:[%s1946_s0 + $0x78] sm:$0xf]  ;;  %v1043_v46 = vor.u32 %v1334_v43, %v1042_v42  ;;  %v1076_v60 = vld [vmem:[%s1946_s0 + $0xbc] sm:$0xf0]  ;;  %v1344_v62 = vld [vmem:[%s1946_s0 + $0xc0] sm:$0xf0] }
  0x1b   :  { %1414 = vmatpush.bf16.msra.mxu3 %v1369_v13  ;;  %641 = vmatpush.bf16.msra.mxu1 %v1369_v13  ;;  %v1337_v13 = vld [vmem:[%s1946_s0 + $0x88] sm:$0xf0]  ;;  %v1083_v1 = vor.u32 %v1344_v62, %v1082_v61  ;;  %v1754_v3 = vld [vmem:[%s1945_s2] ss:$0 sm:$0xff]  ;;  %v1398_v9 = vld [vmem:[%s1947_s3 + $0x10] sm:$0xff] }
  0x1c   :  { %v1047_v18 = vor.u32 %v1337_v13, %v1046_v12  ;;  %v1094_v10 = vld [vmem:[%s1946_s0 + $0xd0] sm:$0xf]  ;;  %v1348_v11 = vld [vmem:[%s1946_s0 + $0xe0] sm:$0xf0]  ;;  %v1346_v12 = vld [vmem:[%s1946_s0 + $0xd4] sm:$0xf] }
  0x1d   :  { %v1096_v13 = vld [vmem:[%s1946_s0 + $0xe4] sm:$0xf0] }
  0x1e   :  { %1407 = vmatpush.bf16.msra.mxu2 %v1360_v14  ;;  %593 = vmatpush.bf16.msra.mxu0 %v1360_v14  ;;  %v1335_v14 = vld [vmem:[%s1946_s0 + $0x7c] sm:$0xf] }
  0x1f   :  { %1415 = vmatpush.bf16.msra.mxu3 %v1368_v15  ;;  %642 = vmatpush.bf16.msra.mxu1 %v1368_v15  ;;  %v1048_v15 = vld [vmem:[%s1946_s0 + $0x8c] sm:$0xf0] }
  0x20   :  { %v1051_v19 = vor.u32 %v1335_v14, %v1048_v15  ;;  %v1102_v14 = vld [vmem:[%s1946_s0 + $0xd8] sm:$0xf]  ;;  %v1349_v15 = vld [vmem:[%s1946_s0 + $0xe8] sm:$0xf0] }
  0x21   :  { %614 = vmatmul.bf16.vlgmr.msra.gmra.mxu2 %v1067_v26  ;;  %594 = vmatmul.bf16.vlgmr.msra.gmra.mxu0 %v987_v28  ;;  %v1003_v28 = vor.u32 %v1324_v25, %v1002_v24 }
  0x22   :  { %684 = vmatpush.bf16.msrb.mxu2 %v1383_v20  ;;  %663 = vmatmul.bf16.vlgmr.msra.gmra.mxu3 %v1071_v27  ;;  %v994_v20 = vld [vmem:[%s1946_s0 + $0x8] sm:$0xf] }
  0x23   :  { %733 = vmatpush.bf16.msrb.mxu3 %v1391_v23  ;;  %643 = vmatmul.bf16.vlgmr.msra.gmra.mxu1 %v991_v29  ;;  %v996_v23 = vld [vmem:[%s1946_s0 + $0x1c] sm:$0xf0]  ;;  %v995_v26 = vor.u32 %v1323_v21, %v994_v20  ;;  %v1014_v29 = vld [vmem:[%s1946_s0 + $0x30] sm:$0xf]  ;;  %v1099_v20 = vor.u32 %v1346_v12, %v1096_v13  ;;  %v1103_v21 = vor.u32 %v1349_v15, %v1102_v14 }
  0x24   :  { %786 = vmatpush.bf16.msrb.mxu0 %v1395_v32  ;;  %v999_v27 = vor.u32 %v1321_v22, %v996_v23  ;;  %v1016_v32 = vld [vmem:[%s1946_s0 + $0x44] sm:$0xf0] }
  0x26   :  { %685 = vmatpush.bf16.msrb.mxu2 %v1382_v30  ;;  %v1328_v30 = vld [vmem:[%s1946_s0 + $0x40] sm:$0xf0] }
  0x27   :  { %734 = vmatpush.bf16.msrb.mxu3 %v1390_v31  ;;  %v1326_v31 = vld [vmem:[%s1946_s0 + $0x34] sm:$0xf] }
  0x28   :  { %787 = vmatpush.bf16.msrb.mxu0 %v1394_v35  ;;  %v1015_v35 = vor.u32 %v1328_v30, %v1014_v29  ;;  %v1397_v29 = vld [vmem:[%s1947_s3 + $0x8] sm:$0xff]  ;;  %v1114_v30 = vld [vmem:[%s1946_s0 + $0xf8] sm:$0xf] }
  0x2a   :  { %686 = vmatpush.bf16.msrb.mxu2 %v1381_v33  ;;  %v1022_v33 = vld [vmem:[%s1946_s0 + $0x38] sm:$0xf] }
  0x2b   :  { %735 = vmatpush.bf16.msrb.mxu3 %v1389_v34  ;;  %v1329_v34 = vld [vmem:[%s1946_s0 + $0x48] sm:$0xf0] }
  0x2c   :  { %788 = vmatpush.bf16.msrb.mxu0 %v1393_v38  ;;  %v1034_v38 = vld [vmem:[%s1946_s0 + $0x58] sm:$0xf] }
  0x2d   :  { %v1035_v44 = vor.u32 %v1333_v39, %v1034_v38 }
  0x2e   :  { %687 = vmatpush.bf16.msrb.mxu2 %v1380_v36  ;;  %v1019_v36 = vor.u32 %v1326_v31, %v1016_v32  ;;  %v1353_v31 = vld [vmem:[%s1946_s0 + $0x108] sm:$0xf0]  ;;  %v1351_v32 = vld [vmem:[%s1946_s0 + $0xfc] sm:$0xf] }
  0x2f   :  { %736 = vmatpush.bf16.msrb.mxu3 %v1388_v37  ;;  %v1023_v37 = vor.u32 %v1329_v34, %v1022_v33  ;;  %v1116_v33 = vld [vmem:[%s1946_s0 + $0x10c] sm:$0xf0]  ;;  %v1122_v34 = vld [vmem:[%s1946_s0 + $0x100] sm:$0xf]  ;;  %v1115_v39 = vor.u32 %v1353_v31, %v1114_v30 }
  0x30   :  { %789 = vmatpush.bf16.msrb.mxu0 %v1392_v56  ;;  %v1399_v56 = vld [vmem:[%s1947_s3 + $0x18] sm:$0xff] }
  0x31   :  { %619 = vmatmul.bf16.gmra.mxu2 %v1087_v49  ;;  %599 = vmatmul.bf16.gmra.mxu0 %v1007_v51  ;;  %v1336_v49 = vld [vmem:[%s1946_s0 + $0x84] sm:$0xf]  ;;  %v1062_v51 = vld [vmem:[%s1946_s0 + $0x88] sm:$0xf] }
  0x32   :  { %688 = vmatpush.bf16.msrb.mxu2 %v1379_v45  ;;  %668 = vmatmul.bf16.gmra.mxu3 %v1091_v50  ;;  %v1039_v45 = vor.u32 %v1331_v40, %v1036_v41  ;;  %v1056_v50 = vld [vmem:[%s1946_s0 + $0x94] sm:$0xf0]  ;;  %v1119_v40 = vor.u32 %v1351_v32, %v1116_v33 }
  0x33   :  { %737 = vmatpush.bf16.msrb.mxu3 %v1387_v48  ;;  %648 = vmatmul.bf16.gmra.mxu1 %v1011_v52  ;;  %v1338_v48 = vld [vmem:[%s1946_s0 + $0x90] sm:$0xf0]  ;;  %v1339_v52 = vld [vmem:[%s1946_s0 + $0x98] sm:$0xf0] }
  0x34   :  { %919 = vmatpush.bf16.msrb.mxu1 %v1399_v56 }
  0x36   :  { %689 = vmatpush.bf16.msrb.mxu2 %v1378_v53  ;;  %v1055_v53 = vor.u32 %v1338_v48, %v1054_v47 }
  0x37   :  { %738 = vmatpush.bf16.msrb.mxu3 %v1386_v54  ;;  %v1059_v54 = vor.u32 %v1336_v49, %v1056_v50  ;;  %v1134_v49 = vld [vmem:[%s1946_s0 + $0x120] sm:$0xf]  ;;  %v1358_v50 = vld [vmem:[%s1946_s0 + $0x130] sm:$0xf0] }
  0x38   :  { %920 = vmatpush.bf16.msrb.mxu1 %v1398_v9 }
  0x3a   :  { %690 = vmatpush.bf16.msrb.mxu2 %v1377_v55  ;;  %v1063_v55 = vor.u32 %v1339_v52, %v1062_v51  ;;  %v1356_v51 = vld [vmem:[%s1946_s0 + $0x124] sm:$0xf]  ;;  %v1136_v52 = vld [vmem:[%s1946_s0 + $0x134] sm:$0xf0] }
  0x3b   :  { %739 = vmatpush.bf16.msrb.mxu3 %v1385_v57  ;;  %v1074_v57 = vld [vmem:[%s1946_s0 + $0xa8] sm:$0xf] }
  0x3c   :  { %921 = vmatpush.bf16.msrb.mxu1 %v1397_v29 }
  0x3e   :  { %691 = vmatpush.bf16.msrb.mxu2 %v1376_v58  ;;  %v1343_v58 = vld [vmem:[%s1946_s0 + $0xb8] sm:$0xf0] }
  0x3f   :  { %740 = vmatpush.bf16.msrb.mxu3 %v1384_v59  ;;  %v1341_v59 = vld [vmem:[%s1946_s0 + $0xac] sm:$0xf]  ;;  %v1075_v63 = vor.u32 %v1343_v58, %v1074_v57 }
  0x40   :  { %v1079_v0 = vor.u32 %v1341_v59, %v1076_v60  ;;  %v1135_v59 = vor.u32 %v1358_v50, %v1134_v49  ;;  %v1139_v60 = vor.u32 %v1356_v51, %v1136_v52 }
  0x41   :  { %624 = vmatmul.bf16.gmra.mxu2 %v1107_v4  ;;  %604 = vmatmul.bf16.gmra.mxu0 %v1027_v6 }
  0x42   :  { %673 = vmatmul.bf16.gmra.mxu3 %v1111_v5 }
  0x43   :  { %653 = vmatmul.bf16.gmra.mxu1 %v1031_v7 }
  0x51   :  { %629 = vmatmul.bf16.gmra.mxu2 %v1127_v16  ;;  %609 = vmatmul.bf16.gmra.mxu0 %v1047_v18 }
  0x52   :  { %678 = vmatmul.bf16.gmra.mxu3 %v1131_v17 }
  0x53   :  { %658 = vmatmul.bf16.gmra.mxu1 %v1051_v19  ;;  %v1095_v19 = vor.u32 %v1348_v11, %v1094_v10 }
  0x61   :  { %692 = vmatmul.bf16.vlgmr.msrb.gmra.mxu2 %v995_v26  ;;  %1288 = vmatmul.msk.bf16.vlgmr.msrb.gmra.mxu0 %vm561_vm0, %v1003_v28 }
  0x62   :  { %741 = vmatmul.bf16.vlgmr.msrb.gmra.mxu3 %v999_v27 }
  0x71   :  { %697 = vmatmul.bf16.gmra.mxu2 %v1015_v35  ;;  %1289 = vmatmul.msk.bf16.gmra.mxu0 %vm561_vm0, %v1023_v37  ;;  %v1354_v35 = vld [vmem:[%s1946_s0 + $0x110] sm:$0xf0] }
  0x72   :  { %746 = vmatmul.bf16.gmra.mxu3 %v1019_v36  ;;  %v1123_v41 = vor.u32 %v1354_v35, %v1122_v34 }
  0x81   :  { %702 = vmatmul.bf16.gmra.mxu2 %v1035_v44  ;;  %1290 = vmatmul.msk.bf16.gmra.mxu0 %vm561_vm0, %v1043_v46 }
  0x82   :  { %751 = vmatmul.bf16.gmra.mxu3 %v1039_v45 }
  0x91   :  { %707 = vmatmul.bf16.gmra.mxu2 %v1055_v53  ;;  %1291 = vmatmul.msk.bf16.gmra.mxu0 %vm561_vm0, %v1063_v55  ;;  %v1142_v53 = vld [vmem:[%s1946_s0 + $0x128] sm:$0xf]  ;;  %v1396_v55 = vld [vmem:[%s1947_s3] sm:$0xff] }
  0x92   :  { %756 = vmatmul.bf16.gmra.mxu3 %v1059_v54  ;;  %v1359_v54 = vld [vmem:[%s1946_s0 + $0x138] sm:$0xf0]  ;;  %922 = vmatpush.bf16.msrb.mxu1 %v1396_v55 }
  0x93   :  { %v1143_v61 = vor.u32 %v1359_v54, %v1142_v53 }
  0x9e   :  { %v1749_v2 = vpop.f32.mrf.mxu0 }
  0xa1   :  { %712 = vmatmul.bf16.gmra.mxu2 %v1075_v63  ;;  %1292 = vmatmul.msk.bf16.gmra.mxu0 %vm561_vm0, %v1083_v1 }
  0xa2   :  { %761 = vmatmul.bf16.gmra.mxu3 %v1079_v0  ;;  %v644_v0 = vpop.f32.mrf.mxu1 }
  0xa4   :  { %v615_v4 = vpop.f32.mrf.mxu2 }
  0xa5   :  { %v664_v5 = vpop.f32.mrf.mxu3  ;;  %v616_v6 = vadd.f32 %v1754_v3, %v615_v4 }
  0xa6   :  { %v1760_v8 = vpop.f32.mrf.mxu0 }
  0xa7   :  { %v1758_v7 = vadd.f32 %v664_v5, %v616_v6 }
  0xaa   :  { %v646_v10 = vpop.f32.mrf.mxu1 }
  0xac   :  { %v617_v16 = vpop.f32.mrf.mxu2 }
  0xad   :  { %v666_v17 = vpop.f32.mrf.mxu3  ;;  %v618_v18 = vadd.f32 %v1754_v3, %v617_v16  ;;  %v596_v16 = vadd.f32 %v1754_v3, %v1749_v2 }
  0xae   :  { %v1786_v23 = vpop.f32.mrf.mxu0 }
  0xaf   :  { %v1784_v22 = vadd.f32 %v666_v17, %v618_v18  ;;  %v601_v2 = vadd.f32 %v1754_v3, %v1786_v23 }
  0xb1   :  { %717 = vmatmul.bf16.gmra.mxu2 %v1095_v19  ;;  %1293 = vmatmul.msk.bf16.gmra.mxu0 %vm561_vm0, %v1103_v21  ;;  %v645_v19 = vadd.f32 %v644_v0, %v596_v16  ;;  %v598_v21 = vadd.f32 %v1754_v3, %v1760_v8 }
  0xb2   :  { %766 = vmatmul.bf16.gmra.mxu3 %v1099_v20  ;;  %v649_v20 = vpop.f32.mrf.mxu1 }
  0xb3   :  { %v650_v8 = vadd.f32 %v649_v20, %v601_v2 }
  0xb4   :  { %v620_v24 = vpop.f32.mrf.mxu2 }
  0xb5   :  { %v669_v25 = vpop.f32.mrf.mxu3  ;;  %v621_v26 = vadd.f32 %v1754_v3, %v620_v24 }
  0xb6   :  { %v1792_v28 = vpop.f32.mrf.mxu0 }
  0xb7   :  { %v1790_v27 = vadd.f32 %v669_v25, %v621_v26  ;;  %v647_v26 = vadd.f32 %v646_v10, %v598_v21 }
  0xba   :  { %v651_v33 = vpop.f32.mrf.mxu1 }
  0xbc   :  { %v622_v36 = vpop.f32.mrf.mxu2 }
  0xbd   :  { %v671_v37 = vpop.f32.mrf.mxu3  ;;  %v623_v38 = vadd.f32 %v1754_v3, %v622_v36 }
  0xbe   :  { %v1818_v43 = vpop.f32.mrf.mxu0 }
  0xbf   :  { %v1816_v42 = vadd.f32 %v671_v37, %v623_v38 }
  0xc1   :  { %722 = vmatmul.bf16.gmra.mxu2 %v1115_v39  ;;  %1294 = vmatmul.msk.bf16.gmra.mxu0 %vm561_vm0, %v1123_v41 }
  0xc2   :  { %771 = vmatmul.bf16.gmra.mxu3 %v1119_v40  ;;  %v654_v50 = vpop.f32.mrf.mxu1 }
  0xc4   :  { %v625_v44 = vpop.f32.mrf.mxu2 }
  0xc5   :  { %v674_v45 = vpop.f32.mrf.mxu3  ;;  %v626_v46 = vadd.f32 %v1754_v3, %v625_v44 }
  0xc6   :  { %v1824_v48 = vpop.f32.mrf.mxu0 }
  0xc7   :  { %v1822_v47 = vadd.f32 %v674_v45, %v626_v46  ;;  %v603_v45 = vadd.f32 %v1754_v3, %v1792_v28  ;;  %v608_v10 = vadd.f32 %v1754_v3, %v1824_v48 }
  0xc9   :  { %v652_v51 = vadd.f32 %v651_v33, %v603_v45 }
  0xcc   :  { %v627_v56 = vpop.f32.mrf.mxu2 }
  0xcd   :  { %v676_v57 = vpop.f32.mrf.mxu3  ;;  %v628_v58 = vadd.f32 %v1754_v3, %v627_v56 }
  0xce   :  { %v1850_v63 = vpop.f32.mrf.mxu0 }
  0xcf   :  { %v1848_v62 = vadd.f32 %v676_v57, %v628_v58  ;;  %v606_v58 = vadd.f32 %v1754_v3, %v1818_v43 }
  0xd1   :  { %727 = vmatmul.bf16.gmra.mxu2 %v1135_v59  ;;  %1295 = vmatmul.msk.bf16.gmra.mxu0 %vm561_vm0, %v1143_v61 }
  0xd2   :  { %776 = vmatmul.bf16.gmra.mxu3 %v1139_v60  ;;  %v656_v60 = vpop.f32.mrf.mxu1 }
  0xd4   :  { %v630_v1 = vpop.f32.mrf.mxu2 }
  0xd5   :  { %v679_v4 = vpop.f32.mrf.mxu3  ;;  %v631_v5 = vadd.f32 %v1754_v3, %v630_v1 }
  0xd6   :  { %v1856_v9 = vpop.f32.mrf.mxu0 }
  0xd7   :  { %v1854_v6 = vadd.f32 %v679_v4, %v631_v5  ;;  %v655_v4 = vadd.f32 %v654_v50, %v606_v58  ;;  %v613_v33 = vadd.f32 %v1754_v3, %v1856_v9 }
  0xdc   :  { %v632_v11 = vpop.f32.mrf.mxu2 }
  0xdd   :  { %v681_v12 = vpop.f32.mrf.mxu3  ;;  %v633_v13 = vadd.f32 %v1754_v3, %v632_v11 }
  0xde   :  { %v791_v15 = vpop.f32.mrf.mxu0 }
  0xdf   :  { %v1859_v14 = vadd.f32 %v681_v12, %v633_v13  ;;  %v657_v13 = vadd.f32 %v656_v60, %v608_v10 }
  0xe4   :  { %v693_v17 = vpop.f32.mrf.mxu2 }
  0xe5   :  { %v742_v18 = vpop.f32.mrf.mxu3  ;;  %v694_v24 = vadd.f32 %v693_v17, %v645_v19 }
  0xe6   :  { %v793_v25 = vpop.f32.mrf.mxu0 }
  0xe7   :  { %v743_v29 = vadd.f32 %v742_v18, %v694_v24  ;;  %v659_v18 = vpop.f32.mrf.mxu1  ;;  %v611_v24 = vadd.f32 %v1754_v3, %v1850_v63 }
  0xe9   :  { %v792_v34 = vadd.f32 %v791_v15, %v743_v29 }
  0xeb   :  { %v831_v38 = vmax.f32 %v792_v34, 0.0 }
  0xec   :  { %v695_v30 = vpop.f32.mrf.mxu2 }
  0xed   :  { %v744_v31 = vpop.f32.mrf.mxu3  ;;  %v696_v32 = vadd.f32 %v695_v30, %v647_v26 }
  0xee   :  { %v796_v36 = vpop.f32.mrf.mxu0 }
  0xef   :  { %v745_v35 = vadd.f32 %v744_v31, %v696_v32  ;;  %v660_v31 = vadd.f32 %v659_v18, %v611_v24 }
  0xf1   :  { %v794_v37 = vadd.f32 %v793_v25, %v745_v35 }
  0xf3   :  { %v832_v39 = vmax.f32 %v794_v37, 0.0 }
  0xf4   :  { %v698_v40 = vpop.f32.mrf.mxu2 }
  0xf5   :  { %v747_v41 = vpop.f32.mrf.mxu3  ;;  %v847_v44 = vpack.c.bf16 %v832_v39, %v831_v38  ;;  %v699_v46 = vadd.f32 %v698_v40, %v650_v8 }
  0xf6   :  { %v798_v49 = vpop.f32.mrf.mxu0 }
  0xf7   :  { %1312 = vmatmul.msk.bf16.vlgmr.msrb.gmra.mxu1 %vm561_vm0, %v847_v44  ;;  %v748_v52 = vadd.f32 %v747_v41, %v699_v46 }
  0xf9   :  { %v797_v55 = vadd.f32 %v796_v36, %v748_v52  ;;  %v661_v36 = vpop.f32.mrf.mxu1 }
  0xfa   :  { %v662_v2 = vadd.f32 %v661_v36, %v613_v33 }
  0xfb   :  { %v833_v61 = vmax.f32 %v797_v55, 0.0 }
  0xfc   :  { %v700_v53 = vpop.f32.mrf.mxu2 }
  0xfd   :  { %v749_v54 = vpop.f32.mrf.mxu3  ;;  %v701_v23 = vadd.f32 %v700_v53, %v652_v51 }
  0xfe   :  { %v801_v57 = vpop.f32.mrf.mxu0 }
  0xff   :  { %v750_v56 = vadd.f32 %v749_v54, %v701_v23 }
 0x101   :  { %v799_v59 = vadd.f32 %v798_v49, %v750_v56 }
 0x103   :  { %v834_v28 = vmax.f32 %v799_v59, 0.0 }
 0x104   :  { %v703_v0 = vpop.f32.mrf.mxu2 }
 0x105   :  { %v752_v1 = vpop.f32.mrf.mxu3  ;;  %v848_v5 = vpack.c.bf16 %v834_v28, %v833_v61  ;;  %v704_v11 = vadd.f32 %v703_v0, %v655_v4 }
 0x106   :  { %v803_v12 = vpop.f32.mrf.mxu0 }
 0x107   :  { %1313 = vmatmul.msk.bf16.gmra.mxu1 %vm561_vm0, %v848_v5  ;;  %v753_v15 = vadd.f32 %v752_v1, %v704_v11 }
 0x109   :  { %v802_v19 = vadd.f32 %v801_v57, %v753_v15 }
 0x10b   :  { %v835_v26 = vmax.f32 %v802_v19, 0.0 }
 0x10c   :  { %v705_v16 = vpop.f32.mrf.mxu2 }
 0x10d   :  { %v754_v17 = vpop.f32.mrf.mxu3  ;;  %v706_v43 = vadd.f32 %v705_v16, %v657_v13 }
 0x10e   :  { %v806_v21 = vpop.f32.mrf.mxu0 }
 0x10f   :  { %v755_v20 = vadd.f32 %v754_v17, %v706_v43 }
 0x111   :  { %v804_v25 = vadd.f32 %v803_v12, %v755_v20 }
 0x113   :  { %v836_v29 = vmax.f32 %v804_v25, 0.0 }
 0x114   :  { %v708_v48 = vpop.f32.mrf.mxu2 }
 0x115   :  { %v757_v30 = vpop.f32.mrf.mxu3  ;;  %v849_v32 = vpack.c.bf16 %v836_v29, %v835_v26  ;;  %v709_v34 = vadd.f32 %v708_v48, %v660_v31 }
 0x116   :  { %v808_v35 = vpop.f32.mrf.mxu0 }
 0x117   :  { %1314 = vmatmul.msk.bf16.gmra.mxu1 %vm561_vm0, %v849_v32  ;;  %v758_v37 = vadd.f32 %v757_v30, %v709_v34 }
 0x119   :  { %v807_v40 = vadd.f32 %v806_v21, %v758_v37 }
 0x11b   :  { %v837_v45 = vmax.f32 %v807_v40, 0.0 }
 0x11c   :  { %v710_v38 = vpop.f32.mrf.mxu2 }
 0x11d   :  { %v759_v39 = vpop.f32.mrf.mxu3  ;;  %v711_v63 = vadd.f32 %v710_v38, %v662_v2 }
 0x11e   :  { %v811_v8 = vpop.f32.mrf.mxu0 }
 0x11f   :  { %v760_v41 = vadd.f32 %v759_v39, %v711_v63 }
 0x121   :  { %v809_v44 = vadd.f32 %v808_v35, %v760_v41 }
 0x123   :  { %v838_v46 = vmax.f32 %v809_v44, 0.0 }
 0x124   :  { %v713_v49 = vpop.f32.mrf.mxu2 }
 0x125   :  { %v762_v50 = vpop.f32.mrf.mxu3  ;;  %v850_v51 = vpack.c.bf16 %v838_v46, %v837_v45  ;;  %v714_v3 = vadd.f32 %v713_v49, %v1758_v7 }
 0x126   :  { %v813_v9 = vpop.f32.mrf.mxu0 }
 0x127   :  { %1315 = vmatmul.msk.bf16.gmra.mxu1 %vm561_vm0, %v850_v51  ;;  %v763_v52 = vadd.f32 %v762_v50, %v714_v3 }
 0x129   :  { %v812_v55 = vadd.f32 %v811_v8, %v763_v52 }
 0x12b   :  { %v839_v59 = vmax.f32 %v812_v55, 0.0 }
 0x12c   :  { %v715_v53 = vpop.f32.mrf.mxu2 }
 0x12d   :  { %v764_v54 = vpop.f32.mrf.mxu3  ;;  %v716_v23 = vadd.f32 %v715_v53, %v1784_v22 }
 0x12e   :  { %v816_v57 = vpop.f32.mrf.mxu0 }
 0x12f   :  { %v765_v56 = vadd.f32 %v764_v54, %v716_v23 }
 0x131   :  { %v814_v58 = vadd.f32 %v813_v9, %v765_v56 }
 0x133   :  { %v840_v60 = vmax.f32 %v814_v58, 0.0 }
 0x134   :  { %v718_v61 = vpop.f32.mrf.mxu2 }
 0x135   :  { %v767_v28 = vpop.f32.mrf.mxu3  ;;  %v851_v0 = vpack.c.bf16 %v840_v60, %v839_v59  ;;  %v719_v1 = vadd.f32 %v718_v61, %v1790_v27 }
 0x136   :  { %v818_v7 = vpop.f32.mrf.mxu0 }
 0x137   :  { %1316 = vmatmul.msk.bf16.gmra.mxu1 %vm561_vm0, %v851_v0  ;;  %v768_v4 = vadd.f32 %v767_v28, %v719_v1 }
 0x139   :  { %v817_v22 = vadd.f32 %v816_v57, %v768_v4 }
 0x13b   :  { %v841_v16 = vmax.f32 %v817_v22, 0.0 }
 0x13c   :  { %v720_v5 = vpop.f32.mrf.mxu2 }
 0x13d   :  { %v769_v10 = vpop.f32.mrf.mxu3  ;;  %v721_v11 = vadd.f32 %v720_v5, %v1816_v42 }
 0x13e   :  { %v821_v15 = vpop.f32.mrf.mxu0 }
 0x13f   :  { %v770_v12 = vadd.f32 %v769_v10, %v721_v11 }
 0x141   :  { %v819_v13 = vadd.f32 %v818_v7, %v770_v12 }
 0x143   :  { %v842_v17 = vmax.f32 %v819_v13, 0.0 }
 0x144   :  { %v723_v43 = vpop.f32.mrf.mxu2 }
 0x145   :  { %v772_v18 = vpop.f32.mrf.mxu3  ;;  %v852_v19 = vpack.c.bf16 %v842_v17, %v841_v16  ;;  %v724_v20 = vadd.f32 %v723_v43, %v1822_v47 }
 0x146   :  { %v823_v21 = vpop.f32.mrf.mxu0 }
 0x147   :  { %1317 = vmatmul.msk.bf16.gmra.mxu1 %vm561_vm0, %v852_v19  ;;  %v773_v27 = vadd.f32 %v772_v18, %v724_v20 }
 0x149   :  { %v822_v42 = vadd.f32 %v821_v15, %v773_v27 }
 0x14b   :  { %v843_v30 = vmax.f32 %v822_v42, 0.0 }
 0x14c   :  { %v725_v24 = vpop.f32.mrf.mxu2 }
 0x14d   :  { %v774_v25 = vpop.f32.mrf.mxu3  ;;  %v726_v26 = vadd.f32 %v725_v24, %v1848_v62 }
 0x14e   :  { %v826_v35 = vpop.f32.mrf.mxu0 }
 0x14f   :  { %v775_v29 = vadd.f32 %v774_v25, %v726_v26 }
 0x151   :  { %v824_v48 = vadd.f32 %v823_v21, %v775_v29 }
 0x153   :  { %v844_v31 = vmax.f32 %v824_v48, 0.0 }
 0x154   :  { %v728_v32 = vpop.f32.mrf.mxu2 }
 0x155   :  { %v777_v33 = vpop.f32.mrf.mxu3  ;;  %v853_v34 = vpack.c.bf16 %v844_v31, %v843_v30  ;;  %v729_v36 = vadd.f32 %v728_v32, %v1854_v6  ;;  %v1417_v6 = vld [vmem:[%s1948_s4] ss:$0 sm:$0xff] }
 0x156   :  { %v828_v63 = vpop.f32.mrf.mxu0 }
 0x157   :  { %1318 = vmatmul.msk.bf16.gmra.mxu1 %vm561_vm0, %v853_v34  ;;  %v778_v47 = vadd.f32 %v777_v33, %v729_v36 }
 0x159   :  { %v827_v39 = vadd.f32 %v826_v35, %v778_v47 }
 0x15b   :  { %v845_v41 = vmax.f32 %v827_v39, 0.0 }
 0x15c   :  { %v730_v2 = vpop.f32.mrf.mxu2 }
 0x15d   :  { %v731_v37 = vadd.f32 %v730_v2, %v1859_v14  ;;  %v779_v38 = vpop.f32.mrf.mxu3 }
 0x15f   :  { %v780_v62 = vadd.f32 %v779_v38, %v731_v37 }
 0x161   :  { %v829_v40 = vadd.f32 %v828_v63, %v780_v62 }
 0x163   :  { %v846_v8 = vmax.f32 %v829_v40, 0.0 }
 0x165   :  { %v854_v44 = vpack.c.bf16 %v846_v8, %v845_v41 }
 0x167   :  { %1319 = vmatmul.msk.bf16.gmra.mxu1 %vm561_vm0, %v854_v44 }
 0x174   :  { %v924_v45 = vpop.f32.mrf.mxu1 }
 0x175   :  { %v925_v46 = vadd.f32 %v1417_v6, %v924_v45 }
 0x177   :  { %964 = vst [vmem:[%s1949_s5] sm:$0xff] %v925_v46 }
 0x17c   :  { %v926_v14 = vpop.f32.mrf.mxu1 }
 0x17d   :  { %v927_v49 = vadd.f32 %v1417_v6, %v926_v14 }
 0x17f   :  { %965 = vst [vmem:[%s1949_s5 + $0x8] sm:$0xff] %v927_v49 }
 0x184   :  { %v929_v50 = vpop.f32.mrf.mxu1 }
 0x185   :  { %v930_v51 = vadd.f32 %v1417_v6, %v929_v50 }
 0x187   :  { %966 = vst [vmem:[%s1949_s5 + $0x10] sm:$0xff] %v930_v51 }
 0x18c   :  { %v931_v3 = vpop.f32.mrf.mxu1 }
 0x18d   :  { %v932_v9 = vadd.f32 %v1417_v6, %v931_v3 }
 0x18f   :  { %967 = vst [vmem:[%s1949_s5 + $0x18] sm:$0xff] %v932_v9 }
 0x194   :  { %v934_v52 = vpop.f32.mrf.mxu1 }
 0x195   :  { %v935_v53 = vadd.f32 %v1417_v6, %v934_v52 }
 0x197   :  { %968 = vst [vmem:[%s1949_s5 + $0x20] sm:$0xff] %v935_v53 }
 0x19c   :  { %v936_v54 = vpop.f32.mrf.mxu1 }
 0x19d   :  { %v937_v23 = vadd.f32 %v1417_v6, %v936_v54 }
 0x19f   :  { %969 = vst [vmem:[%s1949_s5 + $0x28] sm:$0xff] %v937_v23 }
 0x1a4   :  { %v939_v55 = vpop.f32.mrf.mxu1 }
 0x1a5   :  { %v940_v56 = vadd.f32 %v1417_v6, %v939_v55 }
 0x1a7   :  { %970 = vst [vmem:[%s1949_s5 + $0x30] sm:$0xff] %v940_v56 }
 0x1ac   :  { %v941_v57 = vpop.f32.mrf.mxu1 }
 0x1ad   :  { %v942_v58 = vadd.f32 %v1417_v6, %v941_v57 }
 0x1af   :  { %971 = vst [vmem:[%s1949_s5 + $0x38] sm:$0xff] %v942_v58 }
 0x1b4   :  { %v944_v59 = vpop.f32.mrf.mxu1 }
 0x1b5   :  { %v945_v60 = vadd.f32 %v1417_v6, %v944_v59 }
 0x1b7   :  { %972 = vst [vmem:[%s1949_s5 + $0x40] sm:$0xff] %v945_v60 }
 0x1bc   :  { %v946_v61 = vpop.f32.mrf.mxu1 }
 0x1bd   :  { %v947_v28 = vadd.f32 %v1417_v6, %v946_v61 }
 0x1bf   :  { %973 = vst [vmem:[%s1949_s5 + $0x48] sm:$0xff] %v947_v28 }
 0x1c4   :  { %v949_v0 = vpop.f32.mrf.mxu1 }
 0x1c5   :  { %v950_v1 = vadd.f32 %v1417_v6, %v949_v0 }
 0x1c7   :  { %974 = vst [vmem:[%s1949_s5 + $0x50] sm:$0xff] %v950_v1 }
 0x1cc   :  { %v951_v7 = vpop.f32.mrf.mxu1 }
 0x1cd   :  { %v952_v4 = vadd.f32 %v1417_v6, %v951_v7 }
 0x1cf   :  { %975 = vst [vmem:[%s1949_s5 + $0x58] sm:$0xff] %v952_v4 }
 0x1d4   :  { %v954_v5 = vpop.f32.mrf.mxu1 }
 0x1d5   :  { %v955_v10 = vadd.f32 %v1417_v6, %v954_v5 }
 0x1d7   :  { %976 = vst [vmem:[%s1949_s5 + $0x60] sm:$0xff] %v955_v10 }
 0x1dc   :  { %v956_v11 = vpop.f32.mrf.mxu1 }
 0x1dd   :  { %v957_v22 = vadd.f32 %v1417_v6, %v956_v11 }
 0x1df   :  { %977 = vst [vmem:[%s1949_s5 + $0x68] sm:$0xff] %v957_v22 }
 0x1e4   :  { %v959_v12 = vpop.f32.mrf.mxu1 }
 0x1e5   :  { %v960_v13 = vadd.f32 %v1417_v6, %v959_v12 }
 0x1e7   :  { %978 = vst [vmem:[%s1949_s5 + $0x70] sm:$0xff] %v960_v13 }
 0x1ec   :  { %v961_v15 = vpop.f32.mrf.mxu1 }
 0x1ed   :  { %v962_v16 = vadd.f32 %v1417_v6, %v961_v15 }
 0x1ef   :  { %979 = vst [vmem:[%s1949_s5 + $0x78] sm:$0xff] %v962_v16 }

// kernel: motor_det_net.11
= control target key start
LH: loop header
LB: loop body
LE: loop exit
PB: predicated region body
PF: predicated region fallthrough
CT: control target
= control target key end

     0   :  { %s1725_s18 = smov 0   ;;  %s2044_s0 = inlined_call_operand.vmem [shape: bf16[512,288], index: 0, kind: input, shape index: {}]   ;;  %s2045_s1 = inlined_call_operand.vmem [shape: bf16[288,32], index: 1, kind: input, shape index: {}]   ;;  %s2046_s2 = inlined_call_operand.vmem [shape: f32[1,32], index: 2, kind: input, shape index: {}]   ;;  %s2047_s3 = inlined_call_operand.vmem [shape: bf16[32,128], index: 3, kind: input, shape index: {}]   ;;  %s2048_s4 = inlined_call_operand.vmem [shape: f32[1,128], index: 4, kind: input, shape index: {}]   ;;  %s2049_s5 = inlined_call_operand.vmem [shape: f32[512,128], index: 5, kind: output, shape index: {}]  }
   0x1 LB: > { %s1293_s19 = sadd.s32 4294967295, %s1693_s18   ;;  %p1297_p0 = scmp.ge.s32.totalorder %s1693_s18, 1  ;;  %s1693_s18 = sphi %s1725_s18, %s15_s18  }
   0x2   : > { %p189_p1 = scmp.lt.s32.totalorder %s1693_s18, 3 }
   0x4   : > { %p190_p2 = pnand %p1297_p0, %p189_p1 }
   0x5   : > { %s1298_s24 = sshll.u32 (!%p190_p2), %s1293_s19, 5 }
   0x6   : > { %193 = sbr.rel (%p190_p2) target bundleno = 570 (0x23a), region = 40  ;;  %p219_p3 = scmp.lt.s32.totalorder (!%p190_p2), %s1298_s24, 63 }
   0xb   : > { %v1663_v0 = vld [vmem:[%s2045_s1 + $0x38] sm:$0xff]  ;;  %v1662_v2 = vld [vmem:[%s2045_s1 + $0x30] sm:$0xff]  ;;  %v1673_v4 = vld [vmem:[%s2045_s1 + $0x88] sm:$0xff]  ;;  %s2051_s24 = smov (!%p219_p3, %s1298_s24), 63  ;;  %vm684_vm0 = vcmask 261120  }
   0xc   : > { %v1671_v1 = vld [vmem:[%s2045_s1 + $0x78] sm:$0xff]  ;;  %733 = vmatpush.bf16.msra.mxu0 %v1663_v0  ;;  %v1670_v3 = vld [vmem:[%s2045_s1 + $0x70] sm:$0xff]  ;;  %917 = vmatpush.bf16.msra.mxu2 %v1673_v4  ;;  %v1672_v5 = vld [vmem:[%s2045_s1 + $0x80] sm:$0xff]  ;;  %s1676_s10 = smul.u32 12, %s2051_s24 }
   0xd   : > { %822 = vmatpush.bf16.msra.mxu1 %v1671_v1  ;;  %v1661_v6 = vld [vmem:[%s2045_s1 + $0x28] sm:$0xff]  ;;  %v1660_v11 = vld [vmem:[%s2045_s1 + $0x20] sm:$0xff]  ;;  %v1659_v13 = vld [vmem:[%s2045_s1 + $0x18] sm:$0xff] }
   0xe   : > { %v1669_v7 = vld [vmem:[%s2045_s1 + $0x68] sm:$0xff]  ;;  %s1763_s15 = scalar_lea.vmem %s2044_s0, %s1676_s10  ;;  %v1668_v12 = vld [vmem:[%s2045_s1 + $0x60] sm:$0xff]  ;;  %v1667_v14 = vld [vmem:[%s2045_s1 + $0x58] sm:$0xff] }
   0xf   : > { %v1312_v8 = vld [vmem:[%s1763_s15 + $0x8] sm:$0xf]  ;;  %v1610_v9 = vld [vmem:[%s1763_s15 + $0x10] sm:$0xf0]  ;;  %v1324_v17 = vld [vmem:[%s1763_s15 + $0x20] sm:$0xf] }
  0x10   : > { %734 = vmatpush.bf16.msra.mxu0 %v1662_v2  ;;  %918 = vmatpush.bf16.msra.mxu2 %v1672_v5  ;;  %v1313_v10 = vor.u32 %v1610_v9, %v1312_v8  ;;  %v1658_v15 = vld [vmem:[%s2045_s1 + $0x10] sm:$0xff]  ;;  %v1613_v18 = vld [vmem:[%s1763_s15 + $0x28] sm:$0xf0]  ;;  %v1656_v22 = vld [vmem:[%s2045_s1] sm:$0xff] }
  0x11   : > { %823 = vmatpush.bf16.msra.mxu1 %v1670_v3  ;;  %v1666_v16 = vld [vmem:[%s2045_s1 + $0x50] sm:$0xff]  ;;  %v1657_v19 = vld [vmem:[%s2045_s1 + $0x8] sm:$0xff]  ;;  %v1325_v21 = vor.u32 %v1613_v18, %v1324_v17  ;;  %v1664_v23 = vld [vmem:[%s2045_s1 + $0x40] sm:$0xff] }
  0x12   : > { %v1665_v20 = vld [vmem:[%s2045_s1 + $0x48] sm:$0xff]  ;;  %v1304_v24 = vld [vmem:[%s1763_s15] sm:$0xf]  ;;  %v1608_v26 = vld [vmem:[%s1763_s15 + $0x4] sm:$0xf] }
  0x13   : > { %1566 = vmatmul.msk.bf16.vlgmr.msra.gmra.mxu2 %vm684_vm0, %v1313_v10  ;;  %v1609_v25 = vld [vmem:[%s1763_s15 + $0x8] sm:$0xf0]  ;;  %v1306_v27 = vld [vmem:[%s1763_s15 + $0xc] sm:$0xf0]  ;;  %v1336_v30 = vld [vmem:[%s1763_s15 + $0x38] sm:$0xf] }
  0x14   : > { %735 = vmatpush.bf16.msra.mxu0 %v1661_v6  ;;  %v1305_v28 = vor.u32 %v1609_v25, %v1304_v24  ;;  %v1309_v29 = vor.u32 %v1608_v26, %v1306_v27  ;;  %v1616_v31 = vld [vmem:[%s1763_s15 + $0x40] sm:$0xf0]  ;;  %v1316_v33 = vld [vmem:[%s1763_s15 + $0x18] sm:$0xf]  ;;  %v1611_v35 = vld [vmem:[%s1763_s15 + $0x1c] sm:$0xf] }
  0x15   : > { %824 = vmatpush.bf16.msra.mxu1 %v1669_v7  ;;  %v1337_v32 = vor.u32 %v1616_v31, %v1336_v30  ;;  %v1612_v34 = vld [vmem:[%s1763_s15 + $0x20] sm:$0xf0]  ;;  %v1318_v36 = vld [vmem:[%s1763_s15 + $0x24] sm:$0xf0]  ;;  %v1348_v39 = vld [vmem:[%s1763_s15 + $0x50] sm:$0xf] }
  0x16   : > { %v1317_v37 = vor.u32 %v1612_v34, %v1316_v33  ;;  %v1321_v38 = vor.u32 %v1611_v35, %v1318_v36  ;;  %v1619_v40 = vld [vmem:[%s1763_s15 + $0x58] sm:$0xf0]  ;;  %v1328_v42 = vld [vmem:[%s1763_s15 + $0x30] sm:$0xf]  ;;  %v1614_v44 = vld [vmem:[%s1763_s15 + $0x34] sm:$0xf] }
  0x17   : > { %v1349_v41 = vor.u32 %v1619_v40, %v1348_v39  ;;  %v1615_v43 = vld [vmem:[%s1763_s15 + $0x38] sm:$0xf0]  ;;  %v1330_v45 = vld [vmem:[%s1763_s15 + $0x3c] sm:$0xf0]  ;;  %v1360_v48 = vld [vmem:[%s1763_s15 + $0x68] sm:$0xf] }
  0x18   : > { %736 = vmatpush.bf16.msra.mxu0 %v1660_v11  ;;  %v1329_v46 = vor.u32 %v1615_v43, %v1328_v42  ;;  %v1333_v47 = vor.u32 %v1614_v44, %v1330_v45  ;;  %v1622_v49 = vld [vmem:[%s1763_s15 + $0x70] sm:$0xf0]  ;;  %v1340_v51 = vld [vmem:[%s1763_s15 + $0x48] sm:$0xf]  ;;  %v1617_v53 = vld [vmem:[%s1763_s15 + $0x4c] sm:$0xf] }
  0x19   : > { %825 = vmatpush.bf16.msra.mxu1 %v1668_v12  ;;  %v1361_v50 = vor.u32 %v1622_v49, %v1360_v48  ;;  %v1618_v52 = vld [vmem:[%s1763_s15 + $0x50] sm:$0xf0]  ;;  %v1342_v54 = vld [vmem:[%s1763_s15 + $0x54] sm:$0xf0]  ;;  %v1372_v57 = vld [vmem:[%s1763_s15 + $0x80] sm:$0xf] }
  0x1a   : > { %v1341_v55 = vor.u32 %v1618_v52, %v1340_v51  ;;  %v1345_v56 = vor.u32 %v1617_v53, %v1342_v54  ;;  %v1625_v58 = vld [vmem:[%s1763_s15 + $0x88] sm:$0xf0]  ;;  %v1352_v60 = vld [vmem:[%s1763_s15 + $0x60] sm:$0xf]  ;;  %v1620_v62 = vld [vmem:[%s1763_s15 + $0x64] sm:$0xf] }
  0x1b   : > { %v1373_v59 = vor.u32 %v1625_v58, %v1372_v57  ;;  %v1621_v61 = vld [vmem:[%s1763_s15 + $0x68] sm:$0xf0]  ;;  %v1354_v63 = vld [vmem:[%s1763_s15 + $0x6c] sm:$0xf0]  ;;  %v1384_v2 = vld [vmem:[%s1763_s15 + $0x98] sm:$0xf] }
  0x1c   : > { %737 = vmatpush.bf16.msra.mxu0 %v1659_v13  ;;  %v1353_v0 = vor.u32 %v1621_v61, %v1352_v60  ;;  %v1357_v1 = vor.u32 %v1620_v62, %v1354_v63  ;;  %v1628_v3 = vld [vmem:[%s1763_s15 + $0xa0] sm:$0xf0]  ;;  %v1364_v5 = vld [vmem:[%s1763_s15 + $0x78] sm:$0xf]  ;;  %v1623_v7 = vld [vmem:[%s1763_s15 + $0x7c] sm:$0xf] }
  0x1d   : > { %826 = vmatpush.bf16.msra.mxu1 %v1667_v14  ;;  %v1385_v4 = vor.u32 %v1628_v3, %v1384_v2  ;;  %v1624_v6 = vld [vmem:[%s1763_s15 + $0x80] sm:$0xf0]  ;;  %v1366_v8 = vld [vmem:[%s1763_s15 + $0x84] sm:$0xf0]  ;;  %v1396_v11 = vld [vmem:[%s1763_s15 + $0xb0] sm:$0xf] }
  0x1e   : > { %v1365_v9 = vor.u32 %v1624_v6, %v1364_v5  ;;  %v1369_v10 = vor.u32 %v1623_v7, %v1366_v8  ;;  %v1631_v12 = vld [vmem:[%s1763_s15 + $0xb8] sm:$0xf0]  ;;  %v1376_v14 = vld [vmem:[%s1763_s15 + $0x90] sm:$0xf]  ;;  %v1378_v17 = vld [vmem:[%s1763_s15 + $0x9c] sm:$0xf0] }
  0x1f   : > { %v1397_v13 = vor.u32 %v1631_v12, %v1396_v11  ;;  %v1388_v24 = vld [vmem:[%s1763_s15 + $0xa8] sm:$0xf]  ;;  %v1630_v25 = vld [vmem:[%s1763_s15 + $0xb0] sm:$0xf0]  ;;  %v1629_v26 = vld [vmem:[%s1763_s15 + $0xac] sm:$0xf] }
  0x20   : > { %738 = vmatpush.bf16.msra.mxu0 %v1658_v15  ;;  %v1627_v15 = vld [vmem:[%s1763_s15 + $0x98] sm:$0xf0]  ;;  %v1390_v27 = vld [vmem:[%s1763_s15 + $0xb4] sm:$0xf0]  ;;  %v1637_v33 = vld [vmem:[%s1763_s15 + $0xe8] sm:$0xf0] }
  0x21   : > { %827 = vmatpush.bf16.msra.mxu1 %v1666_v16  ;;  %v1626_v16 = vld [vmem:[%s1763_s15 + $0x94] sm:$0xf]  ;;  %v1377_v18 = vor.u32 %v1627_v15, %v1376_v14  ;;  %v1393_v30 = vor.u32 %v1629_v26, %v1390_v27  ;;  %v1400_v36 = vld [vmem:[%s1763_s15 + $0xc0] sm:$0xf]  ;;  %v1402_v39 = vld [vmem:[%s1763_s15 + $0xcc] sm:$0xf0] }
  0x22   : > { %v1870_v40 = vld [vmem:[%s2046_s2] ss:$0 sm:$0xff]  ;;  %v1640_v48 = vld [vmem:[%s1763_s15 + $0x100] sm:$0xf0]  ;;  %v1412_v57 = vld [vmem:[%s1763_s15 + $0xd8] sm:$0xf] }
  0x23   : > { %1567 = vmatmul.msk.bf16.gmra.mxu2 %vm684_vm0, %v1325_v21  ;;  %v1634_v21 = vld [vmem:[%s1763_s15 + $0xd0] sm:$0xf0]  ;;  %v1636_v58 = vld [vmem:[%s1763_s15 + $0xe0] sm:$0xf0]  ;;  %v1414_v60 = vld [vmem:[%s1763_s15 + $0xe4] sm:$0xf0] }
  0x24   : > { %739 = vmatpush.bf16.msra.mxu0 %v1657_v19  ;;  %v1381_v19 = vor.u32 %v1626_v16, %v1378_v17  ;;  %v1444_v7 = vld [vmem:[%s1763_s15 + $0x110] sm:$0xf]  ;;  %v1643_v8 = vld [vmem:[%s1763_s15 + $0x118] sm:$0xf0] }
  0x25   : > { %828 = vmatpush.bf16.msra.mxu1 %v1665_v20  ;;  %v1408_v20 = vld [vmem:[%s1763_s15 + $0xc8] sm:$0xf]  ;;  %v1445_v14 = vor.u32 %v1643_v8, %v1444_v7  ;;  %v1424_v17 = vld [vmem:[%s1763_s15 + $0xf0] sm:$0xf] }
  0x28   : > { %740 = vmatpush.bf16.msra.mxu0 %v1656_v22  ;;  %v1409_v22 = vor.u32 %v1634_v21, %v1408_v20  ;;  %v1426_v20 = vld [vmem:[%s1763_s15 + $0xfc] sm:$0xf0] }
  0x29   : > { %829 = vmatpush.bf16.msra.mxu1 %v1664_v23  ;;  %v1675_v23 = vld [vmem:[%s2047_s3 + $0x8] sm:$0xff] }
  0x2a   : > { %1122 = vmatpush.bf16.msra.mxu3 %v1675_v23 }
  0x2b   : > { %741 = vmatmul.bf16.vlgmr.msra.gmra.mxu0 %v1305_v28  ;;  %v1674_v28 = vld [vmem:[%s2047_s3] sm:$0xff] }
  0x2c   : > { %830 = vmatmul.bf16.vlgmr.msra.gmra.mxu1 %v1309_v29  ;;  %v1389_v29 = vor.u32 %v1630_v25, %v1388_v24 }
  0x2e   : > { %1123 = vmatpush.bf16.msra.mxu3 %v1674_v28 }
  0x33   : > { %1568 = vmatmul.msk.bf16.gmra.mxu2 %vm684_vm0, %v1337_v32  ;;  %v1420_v32 = vld [vmem:[%s1763_s15 + $0xe0] sm:$0xf] }
  0x34   : > { %v1421_v35 = vor.u32 %v1637_v33, %v1420_v32  ;;  %v1646_v32 = vld [vmem:[%s1763_s15 + $0x130] sm:$0xf0] }
  0x3b   : > { %746 = vmatmul.bf16.gmra.mxu0 %v1317_v37  ;;  %v1633_v37 = vld [vmem:[%s1763_s15 + $0xc8] sm:$0xf0] }
  0x3c   : > { %835 = vmatmul.bf16.gmra.mxu1 %v1321_v38  ;;  %v1632_v38 = vld [vmem:[%s1763_s15 + $0xc4] sm:$0xf] }
  0x3d   : > { %v1405_v42 = vor.u32 %v1632_v38, %v1402_v39 }
  0x43   : > { %1569 = vmatmul.msk.bf16.gmra.mxu2 %vm684_vm0, %v1349_v41  ;;  %v1401_v41 = vor.u32 %v1633_v37, %v1400_v36 }
  0x4b   : > { %751 = vmatmul.bf16.gmra.mxu0 %v1329_v46 }
  0x4c   : > { %840 = vmatmul.bf16.gmra.mxu1 %v1333_v47  ;;  %v1432_v47 = vld [vmem:[%s1763_s15 + $0xf8] sm:$0xf] }
  0x4d   : > { %v1433_v54 = vor.u32 %v1640_v48, %v1432_v47 }
  0x53   : > { %1570 = vmatmul.msk.bf16.gmra.mxu2 %vm684_vm0, %v1361_v50 }
  0x5b   : > { %756 = vmatmul.bf16.gmra.mxu0 %v1341_v55 }
  0x5c   : > { %845 = vmatmul.bf16.gmra.mxu1 %v1345_v56 }
  0x63   : > { %1571 = vmatmul.msk.bf16.gmra.mxu2 %vm684_vm0, %v1373_v59  ;;  %v1635_v59 = vld [vmem:[%s1763_s15 + $0xdc] sm:$0xf] }
  0x6b   : > { %761 = vmatmul.bf16.gmra.mxu0 %v1353_v0  ;;  %v1413_v0 = vor.u32 %v1636_v58, %v1412_v57  ;;  %v1649_v57 = vld [vmem:[%s1763_s15 + $0x148] sm:$0xf0] }
  0x6c   : > { %850 = vmatmul.bf16.gmra.mxu1 %v1357_v1  ;;  %v1417_v1 = vor.u32 %v1635_v59, %v1414_v60 }
  0x73   : > { %1572 = vmatmul.msk.bf16.gmra.mxu2 %vm684_vm0, %v1385_v4 }
  0x7b   : > { %766 = vmatmul.bf16.gmra.mxu0 %v1365_v9 }
  0x7c   : > { %855 = vmatmul.bf16.gmra.mxu1 %v1369_v10 }
  0x83   : > { %1573 = vmatmul.msk.bf16.gmra.mxu2 %vm684_vm0, %v1397_v13 }
  0x8b   : > { %771 = vmatmul.bf16.gmra.mxu0 %v1377_v18  ;;  %v1639_v18 = vld [vmem:[%s1763_s15 + $0xf8] sm:$0xf0] }
  0x8c   : > { %860 = vmatmul.bf16.gmra.mxu1 %v1381_v19  ;;  %v1638_v19 = vld [vmem:[%s1763_s15 + $0xf4] sm:$0xf]  ;;  %v1425_v24 = vor.u32 %v1639_v18, %v1424_v17  ;;  %v1652_v17 = vld [vmem:[%s1763_s15 + $0x160] sm:$0xf0] }
  0x8d   : > { %v1429_v25 = vor.u32 %v1638_v19, %v1426_v20 }
  0x93   : > { %1574 = vmatmul.msk.bf16.gmra.mxu2 %vm684_vm0, %v1409_v22 }
  0x96   : > { %v920_v31 = vpop.f32.mrf.mxu2 }
  0x9b   : > { %776 = vmatmul.bf16.gmra.mxu0 %v1389_v29 }
  0x9c   : > { %865 = vmatmul.bf16.gmra.mxu1 %v1393_v30 }
  0x9e   : > { %v922_v34 = vpop.f32.mrf.mxu2 }
  0xa3   : > { %1575 = vmatmul.msk.bf16.gmra.mxu2 %vm684_vm0, %v1421_v35 }
  0xa6   : > { %v925_v45 = vpop.f32.mrf.mxu2 }
  0xa8   : > { %v742_v43 = vpop.f32.mrf.mxu0 }
  0xa9   : > { %v831_v44 = vpop.f32.mrf.mxu1  ;;  %v743_v46 = vadd.f32 %v1870_v40, %v742_v43  ;;  %v1642_v43 = vld [vmem:[%s1763_s15 + $0x110] sm:$0xf0] }
  0xab   : > { %781 = vmatmul.bf16.gmra.mxu0 %v1401_v41  ;;  %v832_v49 = vadd.f32 %v831_v44, %v743_v46  ;;  %v1641_v44 = vld [vmem:[%s1763_s15 + $0x10c] sm:$0xf] }
  0xac   : > { %870 = vmatmul.bf16.gmra.mxu1 %v1405_v42  ;;  %v1436_v42 = vld [vmem:[%s1763_s15 + $0x108] sm:$0xf] }
  0xad   : > { %v921_v55 = vadd.f32 %v920_v31, %v832_v49  ;;  %v1456_v31 = vld [vmem:[%s1763_s15 + $0x128] sm:$0xf]  ;;  %v1437_v49 = vor.u32 %v1642_v43, %v1436_v42  ;;  %v1655_v42 = vld [vmem:[%s1763_s15 + $0x178] sm:$0xf0] }
  0xae   : > { %v927_v53 = vpop.f32.mrf.mxu2  ;;  %v1457_v38 = vor.u32 %v1646_v32, %v1456_v31 }
  0xaf   : > { %v1000_v62 = vmax.f32 %v921_v55, 0.0 }
  0xb0   : > { %v744_v50 = vpop.f32.mrf.mxu0 }
  0xb1   : > { %v833_v51 = vpop.f32.mrf.mxu1  ;;  %v745_v52 = vadd.f32 %v1870_v40, %v744_v50 }
  0xb3   : > { %v834_v56 = vadd.f32 %v833_v51, %v745_v52  ;;  %1576 = vmatmul.msk.bf16.gmra.mxu2 %vm684_vm0, %v1433_v54 }
  0xb5   : > { %v923_v61 = vadd.f32 %v922_v34, %v834_v56  ;;  %v1468_v56 = vld [vmem:[%s1763_s15 + $0x140] sm:$0xf] }
  0xb6   : > { %v930_v5 = vpop.f32.mrf.mxu2 }
  0xb7   : > { %v1001_v63 = vmax.f32 %v923_v61, 0.0 }
  0xb8   : > { %v747_v2 = vpop.f32.mrf.mxu0 }
  0xb9   : > { %v836_v3 = vpop.f32.mrf.mxu1  ;;  %v1032_v4 = vpack.c.bf16 %v1001_v63, %v1000_v62  ;;  %v748_v6 = vadd.f32 %v1870_v40, %v747_v2  ;;  %v1469_v63 = vor.u32 %v1649_v57, %v1468_v56  ;;  %v1448_v2 = vld [vmem:[%s1763_s15 + $0x120] sm:$0xf] }
  0xbb   : > { %786 = vmatmul.bf16.gmra.mxu0 %v1413_v0  ;;  %1590 = vmatmul.msk.bf16.vlgmr.msra.gmra.mxu3 %vm684_vm0, %v1032_v4  ;;  %v837_v9 = vadd.f32 %v836_v3, %v748_v6  ;;  %v1645_v3 = vld [vmem:[%s1763_s15 + $0x128] sm:$0xf0]  ;;  %v1644_v4 = vld [vmem:[%s1763_s15 + $0x124] sm:$0xf] }
  0xbc   : > { %875 = vmatmul.bf16.gmra.mxu1 %v1417_v1 }
  0xbd   : > { %v926_v15 = vadd.f32 %v925_v45, %v837_v9  ;;  %v1438_v45 = vld [vmem:[%s1763_s15 + $0x114] sm:$0xf0]  ;;  %v1449_v9 = vor.u32 %v1645_v3, %v1448_v2 }
  0xbe   : > { %v932_v13 = vpop.f32.mrf.mxu2  ;;  %v1441_v50 = vor.u32 %v1641_v44, %v1438_v45 }
  0xbf   : > { %v1002_v22 = vmax.f32 %v926_v15, 0.0 }
  0xc0   : > { %v749_v10 = vpop.f32.mrf.mxu0 }
  0xc1   : > { %v838_v11 = vpop.f32.mrf.mxu1  ;;  %v750_v12 = vadd.f32 %v1870_v40, %v749_v10 }
  0xc3   : > { %v839_v16 = vadd.f32 %v838_v11, %v750_v12  ;;  %1577 = vmatmul.msk.bf16.gmra.mxu2 %vm684_vm0, %v1445_v14 }
  0xc5   : > { %v928_v21 = vadd.f32 %v927_v53, %v839_v16  ;;  %v1480_v16 = vld [vmem:[%s1763_s15 + $0x158] sm:$0xf] }
  0xc6   : > { %v935_v29 = vpop.f32.mrf.mxu2 }
  0xc7   : > { %v1003_v23 = vmax.f32 %v928_v21, 0.0 }
  0xc8   : > { %v752_v26 = vpop.f32.mrf.mxu0 }
  0xc9   : > { %v841_v27 = vpop.f32.mrf.mxu1  ;;  %v1033_v28 = vpack.c.bf16 %v1003_v23, %v1002_v22  ;;  %v753_v30 = vadd.f32 %v1870_v40, %v752_v26  ;;  %v1481_v23 = vor.u32 %v1652_v17, %v1480_v16  ;;  %v1460_v26 = vld [vmem:[%s1763_s15 + $0x138] sm:$0xf] }
  0xcb   : > { %791 = vmatmul.bf16.gmra.mxu0 %v1425_v24  ;;  %1591 = vmatmul.msk.bf16.gmra.mxu3 %vm684_vm0, %v1033_v28  ;;  %v842_v33 = vadd.f32 %v841_v27, %v753_v30  ;;  %v1648_v27 = vld [vmem:[%s1763_s15 + $0x140] sm:$0xf0]  ;;  %v1647_v28 = vld [vmem:[%s1763_s15 + $0x13c] sm:$0xf] }
  0xcc   : > { %880 = vmatmul.bf16.gmra.mxu1 %v1429_v25 }
  0xcd   : > { %v931_v39 = vadd.f32 %v930_v5, %v842_v33  ;;  %v1450_v5 = vld [vmem:[%s1763_s15 + $0x12c] sm:$0xf0]  ;;  %v1461_v33 = vor.u32 %v1648_v27, %v1460_v26 }
  0xce   : > { %v937_v37 = vpop.f32.mrf.mxu2  ;;  %v1453_v10 = vor.u32 %v1644_v4, %v1450_v5 }
  0xcf   : > { %v1004_v47 = vmax.f32 %v931_v39, 0.0 }
  0xd0   : > { %v754_v34 = vpop.f32.mrf.mxu0 }
  0xd1   : > { %v843_v35 = vpop.f32.mrf.mxu1  ;;  %v755_v36 = vadd.f32 %v1870_v40, %v754_v34 }
  0xd3   : > { %v844_v41 = vadd.f32 %v843_v35, %v755_v36  ;;  %1578 = vmatmul.msk.bf16.gmra.mxu2 %vm684_vm0, %v1457_v38 }
  0xd5   : > { %v933_v46 = vadd.f32 %v932_v13, %v844_v41  ;;  %v1492_v41 = vld [vmem:[%s1763_s15 + $0x170] sm:$0xf] }
  0xd6   : > { %v940_v54 = vpop.f32.mrf.mxu2 }
  0xd7   : > { %v1005_v48 = vmax.f32 %v933_v46, 0.0 }
  0xd8   : > { %v757_v51 = vpop.f32.mrf.mxu0 }
  0xd9   : > { %v846_v52 = vpop.f32.mrf.mxu1  ;;  %v1034_v53 = vpack.c.bf16 %v1005_v48, %v1004_v47  ;;  %v758_v55 = vadd.f32 %v1870_v40, %v757_v51  ;;  %v1493_v48 = vor.u32 %v1655_v42, %v1492_v41  ;;  %v1472_v51 = vld [vmem:[%s1763_s15 + $0x150] sm:$0xf] }
  0xdb   : > { %796 = vmatmul.bf16.gmra.mxu0 %v1437_v49  ;;  %1592 = vmatmul.msk.bf16.gmra.mxu3 %vm684_vm0, %v1034_v53  ;;  %v847_v58 = vadd.f32 %v846_v52, %v758_v55  ;;  %v1651_v52 = vld [vmem:[%s1763_s15 + $0x158] sm:$0xf0]  ;;  %v1650_v53 = vld [vmem:[%s1763_s15 + $0x154] sm:$0xf] }
  0xdc   : > { %885 = vmatmul.bf16.gmra.mxu1 %v1441_v50 }
  0xdd   : > { %v936_v0 = vadd.f32 %v935_v29, %v847_v58  ;;  %v1462_v29 = vld [vmem:[%s1763_s15 + $0x144] sm:$0xf0]  ;;  %v1473_v58 = vor.u32 %v1651_v52, %v1472_v51 }
  0xde   : > { %v942_v62 = vpop.f32.mrf.mxu2  ;;  %v1465_v34 = vor.u32 %v1647_v28, %v1462_v29 }
  0xdf   : > { %v1006_v7 = vmax.f32 %v936_v0, 0.0 }
  0xe0   : > { %v759_v59 = vpop.f32.mrf.mxu0 }
  0xe1   : > { %v848_v60 = vpop.f32.mrf.mxu1  ;;  %v760_v61 = vadd.f32 %v1870_v40, %v759_v59 }
  0xe3   : > { %v849_v1 = vadd.f32 %v848_v60, %v760_v61  ;;  %1579 = vmatmul.msk.bf16.gmra.mxu2 %vm684_vm0, %v1469_v63 }
  0xe5   : > { %v938_v6 = vadd.f32 %v937_v37, %v849_v1 }
  0xe6   : > { %v945_v14 = vpop.f32.mrf.mxu2 }
  0xe7   : > { %v1007_v8 = vmax.f32 %v938_v6, 0.0 }
  0xe8   : > { %v762_v11 = vpop.f32.mrf.mxu0 }
  0xe9   : > { %v851_v12 = vpop.f32.mrf.mxu1  ;;  %v1035_v13 = vpack.c.bf16 %v1007_v8, %v1006_v7  ;;  %v763_v15 = vadd.f32 %v1870_v40, %v762_v11  ;;  %v1484_v8 = vld [vmem:[%s1763_s15 + $0x168] sm:$0xf]  ;;  %v1486_v11 = vld [vmem:[%s1763_s15 + $0x174] sm:$0xf0] }
  0xeb   : > { %801 = vmatmul.bf16.gmra.mxu0 %v1449_v9  ;;  %1593 = vmatmul.msk.bf16.gmra.mxu3 %vm684_vm0, %v1035_v13  ;;  %v852_v18 = vadd.f32 %v851_v12, %v763_v15  ;;  %v1654_v9 = vld [vmem:[%s1763_s15 + $0x170] sm:$0xf0] }
  0xec   : > { %890 = vmatmul.bf16.gmra.mxu1 %v1453_v10  ;;  %v1653_v10 = vld [vmem:[%s1763_s15 + $0x16c] sm:$0xf]  ;;  %v1485_v15 = vor.u32 %v1654_v9, %v1484_v8 }
  0xed   : > { %v941_v24 = vadd.f32 %v940_v54, %v852_v18  ;;  %v1474_v54 = vld [vmem:[%s1763_s15 + $0x15c] sm:$0xf0]  ;;  %v1489_v16 = vor.u32 %v1653_v10, %v1486_v11  ;;  %s1301_s15 = sshll.u32 %s2051_s24, 3 }
  0xee   : > { %v947_v22 = vpop.f32.mrf.mxu2  ;;  %v1477_v59 = vor.u32 %v1650_v53, %v1474_v54  ;;  %v1950_v53 = vld [vmem:[%s2048_s4] ss:$0 sm:$0xff]  ;;  %s1955_s26 = scalar_lea.vmem %s2049_s5, %s1301_s15 }
  0xef   : > { %v1008_v31 = vmax.f32 %v941_v24, 0.0 }
  0xf0   : > { %v764_v19 = vpop.f32.mrf.mxu0 }
  0xf1   : > { %v853_v20 = vpop.f32.mrf.mxu1  ;;  %v765_v21 = vadd.f32 %v1870_v40, %v764_v19 }
  0xf3   : > { %v854_v25 = vadd.f32 %v853_v20, %v765_v21  ;;  %1580 = vmatmul.msk.bf16.gmra.mxu2 %vm684_vm0, %v1481_v23 }
  0xf5   : > { %v943_v30 = vadd.f32 %v942_v62, %v854_v25 }
  0xf6   : > { %v950_v38 = vpop.f32.mrf.mxu2 }
  0xf7   : > { %v1009_v32 = vmax.f32 %v943_v30, 0.0 }
  0xf8   : > { %v767_v35 = vpop.f32.mrf.mxu0 }
  0xf9   : > { %v856_v36 = vpop.f32.mrf.mxu1  ;;  %v1036_v37 = vpack.c.bf16 %v1009_v32, %v1008_v31  ;;  %v768_v39 = vadd.f32 %v1870_v40, %v767_v35 }
  0xfb   : > { %806 = vmatmul.bf16.gmra.mxu0 %v1461_v33  ;;  %1594 = vmatmul.msk.bf16.gmra.mxu3 %vm684_vm0, %v1036_v37  ;;  %v857_v43 = vadd.f32 %v856_v36, %v768_v39 }
  0xfc   : > { %895 = vmatmul.bf16.gmra.mxu1 %v1465_v34 }
  0xfd   : > { %v946_v49 = vadd.f32 %v945_v14, %v857_v43 }
  0xfe   : > { %v952_v47 = vpop.f32.mrf.mxu2 }
  0xff   : > { %v1010_v56 = vmax.f32 %v946_v49, 0.0 }
 0x100   : > { %v769_v44 = vpop.f32.mrf.mxu0 }
 0x101   : > { %v858_v45 = vpop.f32.mrf.mxu1  ;;  %v770_v46 = vadd.f32 %v1870_v40, %v769_v44 }
 0x103   : > { %v859_v50 = vadd.f32 %v858_v45, %v770_v46  ;;  %1581 = vmatmul.msk.bf16.gmra.mxu2 %vm684_vm0, %v1493_v48 }
 0x105   : > { %v948_v55 = vadd.f32 %v947_v22, %v859_v50 }
 0x106   : > { %v955_v63 = vpop.f32.mrf.mxu2 }
 0x107   : > { %v1011_v57 = vmax.f32 %v948_v55, 0.0 }
 0x108   : > { %v772_v60 = vpop.f32.mrf.mxu0 }
 0x109   : > { %v861_v61 = vpop.f32.mrf.mxu1  ;;  %v1037_v62 = vpack.c.bf16 %v1011_v57, %v1010_v56  ;;  %v773_v0 = vadd.f32 %v1870_v40, %v772_v60 }
 0x10b   : > { %811 = vmatmul.bf16.gmra.mxu0 %v1473_v58  ;;  %1595 = vmatmul.msk.bf16.gmra.mxu3 %vm684_vm0, %v1037_v62  ;;  %v862_v1 = vadd.f32 %v861_v61, %v773_v0 }
 0x10c   : > { %900 = vmatmul.bf16.gmra.mxu1 %v1477_v59 }
 0x10d   : > { %v951_v6 = vadd.f32 %v950_v38, %v862_v1 }
 0x10e   : > { %v957_v5 = vpop.f32.mrf.mxu2 }
 0x10f   : > { %v1012_v13 = vmax.f32 %v951_v6, 0.0 }
 0x110   : > { %v774_v2 = vpop.f32.mrf.mxu0 }
 0x111   : > { %v863_v3 = vpop.f32.mrf.mxu1  ;;  %v775_v4 = vadd.f32 %v1870_v40, %v774_v2 }
 0x113   : > { %v864_v7 = vadd.f32 %v863_v3, %v775_v4 }
 0x115   : > { %v953_v12 = vadd.f32 %v952_v47, %v864_v7 }
 0x116   : > { %v960_v20 = vpop.f32.mrf.mxu2 }
 0x117   : > { %v1013_v14 = vmax.f32 %v953_v12, 0.0 }
 0x118   : > { %v777_v17 = vpop.f32.mrf.mxu0 }
 0x119   : > { %v866_v18 = vpop.f32.mrf.mxu1  ;;  %v1038_v19 = vpack.c.bf16 %v1013_v14, %v1012_v13  ;;  %v778_v21 = vadd.f32 %v1870_v40, %v777_v17 }
 0x11b   : > { %816 = vmatmul.bf16.gmra.mxu0 %v1485_v15  ;;  %1596 = vmatmul.msk.bf16.gmra.mxu3 %vm684_vm0, %v1038_v19  ;;  %v867_v22 = vadd.f32 %v866_v18, %v778_v21 }
 0x11c   : > { %905 = vmatmul.bf16.gmra.mxu1 %v1489_v16 }
 0x11d   : > { %v956_v27 = vadd.f32 %v955_v63, %v867_v22 }
 0x11e   : > { %v962_v26 = vpop.f32.mrf.mxu2 }
 0x11f   : > { %v1014_v30 = vmax.f32 %v956_v27, 0.0 }
 0x120   : > { %v779_v23 = vpop.f32.mrf.mxu0 }
 0x121   : > { %v868_v24 = vpop.f32.mrf.mxu1  ;;  %v780_v25 = vadd.f32 %v1870_v40, %v779_v23 }
 0x123   : > { %v869_v28 = vadd.f32 %v868_v24, %v780_v25 }
 0x125   : > { %v958_v29 = vadd.f32 %v957_v5, %v869_v28 }
 0x126   : > { %v965_v35 = vpop.f32.mrf.mxu2 }
 0x127   : > { %v1015_v31 = vmax.f32 %v958_v29, 0.0 }
 0x128   : > { %v782_v32 = vpop.f32.mrf.mxu0 }
 0x129   : > { %v871_v33 = vpop.f32.mrf.mxu1  ;;  %v1039_v34 = vpack.c.bf16 %v1015_v31, %v1014_v30  ;;  %v783_v36 = vadd.f32 %v1870_v40, %v782_v32 }
 0x12b   : > { %1597 = vmatmul.msk.bf16.gmra.mxu3 %vm684_vm0, %v1039_v34  ;;  %v872_v37 = vadd.f32 %v871_v33, %v783_v36 }
 0x12d   : > { %v961_v43 = vadd.f32 %v960_v20, %v872_v37 }
 0x12e   : > { %v967_v42 = vpop.f32.mrf.mxu2 }
 0x12f   : > { %v1016_v46 = vmax.f32 %v961_v43, 0.0 }
 0x130   : > { %v784_v38 = vpop.f32.mrf.mxu0 }
 0x131   : > { %v873_v39 = vpop.f32.mrf.mxu1  ;;  %v785_v41 = vadd.f32 %v1870_v40, %v784_v38 }
 0x133   : > { %v874_v44 = vadd.f32 %v873_v39, %v785_v41 }
 0x135   : > { %v963_v45 = vadd.f32 %v962_v26, %v874_v44 }
 0x136   : > { %v970_v51 = vpop.f32.mrf.mxu2 }
 0x137   : > { %v1017_v47 = vmax.f32 %v963_v45, 0.0 }
 0x138   : > { %v787_v48 = vpop.f32.mrf.mxu0 }
 0x139   : > { %v876_v49 = vpop.f32.mrf.mxu1  ;;  %v1040_v50 = vpack.c.bf16 %v1017_v47, %v1016_v46  ;;  %v788_v52 = vadd.f32 %v1870_v40, %v787_v48 }
 0x13b   : > { %1598 = vmatmul.msk.bf16.gmra.mxu3 %vm684_vm0, %v1040_v50  ;;  %v877_v54 = vadd.f32 %v876_v49, %v788_v52 }
 0x13d   : > { %v966_v61 = vadd.f32 %v965_v35, %v877_v54 }
 0x13e   : > { %v1125_v55 = vpop.f32.mrf.mxu3  ;;  %v972_v60 = vpop.f32.mrf.mxu2 }
 0x13f   : > { %v1126_v56 = vadd.f32 %v1950_v53, %v1125_v55  ;;  %v1018_v0 = vmax.f32 %v966_v61, 0.0 }
 0x140   : > { %v789_v57 = vpop.f32.mrf.mxu0 }
 0x141   : > { %v878_v58 = vpop.f32.mrf.mxu1  ;;  %v790_v59 = vadd.f32 %v1870_v40, %v789_v57  ;;  %1205 = vst [vmem:[%s1955_s26] sm:$0xff] %v1126_v56 }
 0x143   : > { %v879_v62 = vadd.f32 %v878_v58, %v790_v59 }
 0x145   : > { %v968_v63 = vadd.f32 %v967_v42, %v879_v62 }
 0x146   : > { %v1127_v2 = vpop.f32.mrf.mxu3  ;;  %v975_v7 = vpop.f32.mrf.mxu2 }
 0x147   : > { %v1019_v1 = vmax.f32 %v968_v63, 0.0  ;;  %v1128_v3 = vadd.f32 %v1950_v53, %v1127_v2 }
 0x148   : > { %v792_v4 = vpop.f32.mrf.mxu0 }
 0x149   : > { %v881_v5 = vpop.f32.mrf.mxu1  ;;  %v1041_v6 = vpack.c.bf16 %v1019_v1, %v1018_v0  ;;  %1206 = vst [vmem:[%s1955_s26 + $0x8] sm:$0xff] %v1128_v3  ;;  %v793_v8 = vadd.f32 %v1870_v40, %v792_v4 }
 0x14b   : > { %1599 = vmatmul.msk.bf16.gmra.mxu3 %vm684_vm0, %v1041_v6  ;;  %v882_v9 = vadd.f32 %v881_v5, %v793_v8 }
 0x14d   : > { %v971_v15 = vadd.f32 %v970_v51, %v882_v9 }
 0x14e   : > { %v1130_v10 = vpop.f32.mrf.mxu3  ;;  %v977_v17 = vpop.f32.mrf.mxu2 }
 0x14f   : > { %v1131_v11 = vadd.f32 %v1950_v53, %v1130_v10  ;;  %v1020_v19 = vmax.f32 %v971_v15, 0.0 }
 0x150   : > { %v794_v12 = vpop.f32.mrf.mxu0 }
 0x151   : > { %v883_v13 = vpop.f32.mrf.mxu1  ;;  %v795_v14 = vadd.f32 %v1870_v40, %v794_v12  ;;  %1207 = vst [vmem:[%s1955_s26 + $0x10] sm:$0xff] %v1131_v11 }
 0x153   : > { %v884_v16 = vadd.f32 %v883_v13, %v795_v14 }
 0x155   : > { %v973_v18 = vadd.f32 %v972_v60, %v884_v16 }
 0x156   : > { %v1132_v21 = vpop.f32.mrf.mxu3  ;;  %v980_v27 = vpop.f32.mrf.mxu2 }
 0x157   : > { %v1021_v20 = vmax.f32 %v973_v18, 0.0  ;;  %v1133_v22 = vadd.f32 %v1950_v53, %v1132_v21 }
 0x158   : > { %v797_v23 = vpop.f32.mrf.mxu0 }
 0x159   : > { %v886_v24 = vpop.f32.mrf.mxu1  ;;  %v1042_v25 = vpack.c.bf16 %v1021_v20, %v1020_v19  ;;  %1208 = vst [vmem:[%s1955_s26 + $0x18] sm:$0xff] %v1133_v22  ;;  %v798_v26 = vadd.f32 %v1870_v40, %v797_v23 }
 0x15b   : > { %1600 = vmatmul.msk.bf16.gmra.mxu3 %vm684_vm0, %v1042_v25  ;;  %v887_v28 = vadd.f32 %v886_v24, %v798_v26 }
 0x15d   : > { %v976_v34 = vadd.f32 %v975_v7, %v887_v28 }
 0x15e   : > { %v1135_v29 = vpop.f32.mrf.mxu3  ;;  %v982_v41 = vpop.f32.mrf.mxu2 }
 0x15f   : > { %v1136_v30 = vadd.f32 %v1950_v53, %v1135_v29  ;;  %v1022_v37 = vmax.f32 %v976_v34, 0.0 }
 0x160   : > { %v799_v31 = vpop.f32.mrf.mxu0 }
 0x161   : > { %v888_v32 = vpop.f32.mrf.mxu1  ;;  %v800_v33 = vadd.f32 %v1870_v40, %v799_v31  ;;  %1209 = vst [vmem:[%s1955_s26 + $0x20] sm:$0xff] %v1136_v30 }
 0x163   : > { %v889_v35 = vadd.f32 %v888_v32, %v800_v33 }
 0x165   : > { %v978_v36 = vadd.f32 %v977_v17, %v889_v35 }
 0x166   : > { %v1137_v39 = vpop.f32.mrf.mxu3  ;;  %v985_v54 = vpop.f32.mrf.mxu2 }
 0x167   : > { %v1023_v38 = vmax.f32 %v978_v36, 0.0  ;;  %v1138_v42 = vadd.f32 %v1950_v53, %v1137_v39 }
 0x168   : > { %v802_v43 = vpop.f32.mrf.mxu0 }
 0x169   : > { %v891_v44 = vpop.f32.mrf.mxu1  ;;  %v1043_v45 = vpack.c.bf16 %v1023_v38, %v1022_v37  ;;  %1210 = vst [vmem:[%s1955_s26 + $0x28] sm:$0xff] %v1138_v42  ;;  %v803_v46 = vadd.f32 %v1870_v40, %v802_v43 }
 0x16b   : > { %1601 = vmatmul.msk.bf16.gmra.mxu3 %vm684_vm0, %v1043_v45  ;;  %v892_v47 = vadd.f32 %v891_v44, %v803_v46 }
 0x16d   : > { %v981_v55 = vadd.f32 %v980_v27, %v892_v47 }
 0x16e   : > { %v1140_v48 = vpop.f32.mrf.mxu3  ;;  %v987_v2 = vpop.f32.mrf.mxu2 }
 0x16f   : > { %v1141_v49 = vadd.f32 %v1950_v53, %v1140_v48  ;;  %v1024_v58 = vmax.f32 %v981_v55, 0.0 }
 0x170   : > { %v804_v50 = vpop.f32.mrf.mxu0 }
 0x171   : > { %v893_v51 = vpop.f32.mrf.mxu1  ;;  %v805_v52 = vadd.f32 %v1870_v40, %v804_v50  ;;  %1211 = vst [vmem:[%s1955_s26 + $0x30] sm:$0xff] %v1141_v49 }
 0x173   : > { %v894_v56 = vadd.f32 %v893_v51, %v805_v52 }
 0x175   : > { %v983_v57 = vadd.f32 %v982_v41, %v894_v56 }
 0x176   : > { %v1142_v60 = vpop.f32.mrf.mxu3  ;;  %v990_v12 = vpop.f32.mrf.mxu2 }
 0x177   : > { %v1025_v59 = vmax.f32 %v983_v57, 0.0  ;;  %v1143_v61 = vadd.f32 %v1950_v53, %v1142_v60 }
 0x178   : > { %v807_v62 = vpop.f32.mrf.mxu0 }
 0x179   : > { %v896_v63 = vpop.f32.mrf.mxu1  ;;  %v1044_v0 = vpack.c.bf16 %v1025_v59, %v1024_v58  ;;  %1212 = vst [vmem:[%s1955_s26 + $0x38] sm:$0xff] %v1143_v61  ;;  %v808_v1 = vadd.f32 %v1870_v40, %v807_v62 }
 0x17b   : > { %1602 = vmatmul.msk.bf16.gmra.mxu3 %vm684_vm0, %v1044_v0  ;;  %v897_v3 = vadd.f32 %v896_v63, %v808_v1 }
 0x17d   : > { %v986_v9 = vadd.f32 %v985_v54, %v897_v3 }
 0x17e   : > { %v1145_v4 = vpop.f32.mrf.mxu3  ;;  %v992_v22 = vpop.f32.mrf.mxu2 }
 0x17f   : > { %v1146_v5 = vadd.f32 %v1950_v53, %v1145_v4  ;;  %v1026_v13 = vmax.f32 %v986_v9, 0.0 }
 0x180   : > { %v809_v6 = vpop.f32.mrf.mxu0 }
 0x181   : > { %v898_v7 = vpop.f32.mrf.mxu1  ;;  %v810_v8 = vadd.f32 %v1870_v40, %v809_v6  ;;  %1213 = vst [vmem:[%s1955_s26 + $0x40] sm:$0xff] %v1146_v5 }
 0x183   : > { %v899_v10 = vadd.f32 %v898_v7, %v810_v8 }
 0x185   : > { %v988_v11 = vadd.f32 %v987_v2, %v899_v10 }
 0x186   : > { %v1147_v15 = vpop.f32.mrf.mxu3  ;;  %v995_v38 = vpop.f32.mrf.mxu2 }
 0x187   : > { %v1027_v14 = vmax.f32 %v988_v11, 0.0  ;;  %v1148_v16 = vadd.f32 %v1950_v53, %v1147_v15 }
 0x188   : > { %v812_v17 = vpop.f32.mrf.mxu0 }
 0x189   : > { %v901_v18 = vpop.f32.mrf.mxu1  ;;  %v1045_v19 = vpack.c.bf16 %v1027_v14, %v1026_v13  ;;  %1214 = vst [vmem:[%s1955_s26 + $0x48] sm:$0xff] %v1148_v16  ;;  %v813_v20 = vadd.f32 %v1870_v40, %v812_v17 }
 0x18b   : > { %1603 = vmatmul.msk.bf16.gmra.mxu3 %vm684_vm0, %v1045_v19  ;;  %v902_v21 = vadd.f32 %v901_v18, %v813_v20 }
 0x18d   : > { %v991_v28 = vadd.f32 %v990_v12, %v902_v21 }
 0x18e   : > { %v1150_v23 = vpop.f32.mrf.mxu3  ;;  %v997_v49 = vpop.f32.mrf.mxu2 }
 0x18f   : > { %v1151_v24 = vadd.f32 %v1950_v53, %v1150_v23  ;;  %v1028_v31 = vmax.f32 %v991_v28, 0.0 }
 0x190   : > { %v814_v25 = vpop.f32.mrf.mxu0 }
 0x191   : > { %v903_v26 = vpop.f32.mrf.mxu1  ;;  %v815_v27 = vadd.f32 %v1870_v40, %v814_v25  ;;  %1215 = vst [vmem:[%s1955_s26 + $0x50] sm:$0xff] %v1151_v24 }
 0x193   : > { %v904_v29 = vadd.f32 %v903_v26, %v815_v27 }
 0x195   : > { %v993_v30 = vadd.f32 %v992_v22, %v904_v29 }
 0x196   : > { %v1152_v33 = vpop.f32.mrf.mxu3 }
 0x197   : > { %v1029_v32 = vmax.f32 %v993_v30, 0.0  ;;  %v1153_v34 = vadd.f32 %v1950_v53, %v1152_v33 }
 0x198   : > { %v817_v35 = vpop.f32.mrf.mxu0 }
 0x199   : > { %v906_v36 = vpop.f32.mrf.mxu1  ;;  %v1046_v37 = vpack.c.bf16 %v1029_v32, %v1028_v31  ;;  %1216 = vst [vmem:[%s1955_s26 + $0x58] sm:$0xff] %v1153_v34  ;;  %v818_v39 = vadd.f32 %v1870_v40, %v817_v35 }
 0x19b   : > { %1604 = vmatmul.msk.bf16.gmra.mxu3 %vm684_vm0, %v1046_v37  ;;  %v907_v41 = vadd.f32 %v906_v36, %v818_v39 }
 0x19d   : > { %v996_v47 = vadd.f32 %v995_v38, %v907_v41 }
 0x19e   : > { %v1155_v42 = vpop.f32.mrf.mxu3 }
 0x19f   : > { %v1156_v43 = vadd.f32 %v1950_v53, %v1155_v42  ;;  %v1030_v51 = vmax.f32 %v996_v47, 0.0 }
 0x1a0   : > { %v819_v44 = vpop.f32.mrf.mxu0 }
 0x1a1   : > { %v820_v45 = vadd.f32 %v1870_v40, %v819_v44  ;;  %1217 = vst [vmem:[%s1955_s26 + $0x60] sm:$0xff] %v1156_v43  ;;  %v908_v46 = vpop.f32.mrf.mxu1 }
 0x1a3   : > { %v909_v48 = vadd.f32 %v908_v46, %v820_v45 }
 0x1a5   : > { %v998_v50 = vadd.f32 %v997_v49, %v909_v48 }
 0x1a6   : > { %v1157_v54 = vpop.f32.mrf.mxu3 }
 0x1a7   : > { %v1031_v52 = vmax.f32 %v998_v50, 0.0  ;;  %v1158_v55 = vadd.f32 %v1950_v53, %v1157_v54 }
 0x1a9   : > { %v1047_v56 = vpack.c.bf16 %v1031_v52, %v1030_v51  ;;  %1218 = vst [vmem:[%s1955_s26 + $0x68] sm:$0xff] %v1158_v55 }
 0x1ab   : > { %1605 = vmatmul.msk.bf16.gmra.mxu3 %vm684_vm0, %v1047_v56 }
 0x1ae   : > { %v1160_v40 = vpop.f32.mrf.mxu3 }
 0x1af   : > { %v1161_v57 = vadd.f32 %v1950_v53, %v1160_v40 }
 0x1b1   : > { %1219 = vst [vmem:[%s1955_s26 + $0x70] sm:$0xff] %v1161_v57 }
 0x1b6   : > { %v1162_v58 = vpop.f32.mrf.mxu3 }
 0x1b7   : > { %v1163_v59 = vadd.f32 %v1950_v53, %v1162_v58 }
 0x1b9   : > { %1220 = vst [vmem:[%s1955_s26 + $0x78] sm:$0xff] %v1163_v59 }
 0x1be   : > { %v1165_v60 = vpop.f32.mrf.mxu3 }
 0x1bf   : > { %v1166_v61 = vadd.f32 %v1950_v53, %v1165_v60 }
 0x1c1   : > { %1221 = vst [vmem:[%s1955_s26 + $0x80] sm:$0xff] %v1166_v61 }
 0x1c6   : > { %v1167_v62 = vpop.f32.mrf.mxu3 }
 0x1c7   : > { %v1168_v63 = vadd.f32 %v1950_v53, %v1167_v62 }
 0x1c9   : > { %1222 = vst [vmem:[%s1955_s26 + $0x88] sm:$0xff] %v1168_v63 }
 0x1ce   : > { %v1170_v0 = vpop.f32.mrf.mxu3 }
 0x1cf   : > { %v1171_v1 = vadd.f32 %v1950_v53, %v1170_v0 }
 0x1d1   : > { %1223 = vst [vmem:[%s1955_s26 + $0x90] sm:$0xff] %v1171_v1 }
 0x1d6   : > { %v1172_v2 = vpop.f32.mrf.mxu3 }
 0x1d7   : > { %v1173_v3 = vadd.f32 %v1950_v53, %v1172_v2 }
 0x1d9   : > { %1224 = vst [vmem:[%s1955_s26 + $0x98] sm:$0xff] %v1173_v3 }
 0x1de   : > { %v1175_v4 = vpop.f32.mrf.mxu3 }
 0x1df   : > { %v1176_v5 = vadd.f32 %v1950_v53, %v1175_v4 }
 0x1e1   : > { %1225 = vst [vmem:[%s1955_s26 + $0xa0] sm:$0xff] %v1176_v5 }
 0x1e6   : > { %v1177_v6 = vpop.f32.mrf.mxu3 }
 0x1e7   : > { %v1178_v7 = vadd.f32 %v1950_v53, %v1177_v6 }
 0x1e9   : > { %1226 = vst [vmem:[%s1955_s26 + $0xa8] sm:$0xff] %v1178_v7 }
 0x1ee   : > { %v1180_v8 = vpop.f32.mrf.mxu3 }
 0x1ef   : > { %v1181_v9 = vadd.f32 %v1950_v53, %v1180_v8 }
 0x1f1   : > { %1227 = vst [vmem:[%s1955_s26 + $0xb0] sm:$0xff] %v1181_v9 }
 0x1f6   : > { %v1182_v10 = vpop.f32.mrf.mxu3 }
 0x1f7   : > { %v1183_v11 = vadd.f32 %v1950_v53, %v1182_v10 }
 0x1f9   : > { %1228 = vst [vmem:[%s1955_s26 + $0xb8] sm:$0xff] %v1183_v11 }
 0x1fe   : > { %v1185_v12 = vpop.f32.mrf.mxu3 }
 0x1ff   : > { %v1186_v13 = vadd.f32 %v1950_v53, %v1185_v12 }
 0x201   : > { %1229 = vst [vmem:[%s1955_s26 + $0xc0] sm:$0xff] %v1186_v13 }
 0x206   : > { %v1187_v14 = vpop.f32.mrf.mxu3 }
 0x207   : > { %v1188_v15 = vadd.f32 %v1950_v53, %v1187_v14 }
 0x209   : > { %1230 = vst [vmem:[%s1955_s26 + $0xc8] sm:$0xff] %v1188_v15 }
 0x20e   : > { %v1190_v16 = vpop.f32.mrf.mxu3 }
 0x20f   : > { %v1191_v17 = vadd.f32 %v1950_v53, %v1190_v16 }
 0x211   : > { %1231 = vst [vmem:[%s1955_s26 + $0xd0] sm:$0xff] %v1191_v17 }
 0x216   : > { %v1192_v18 = vpop.f32.mrf.mxu3 }
 0x217   : > { %v1193_v19 = vadd.f32 %v1950_v53, %v1192_v18 }
 0x219   : > { %1232 = vst [vmem:[%s1955_s26 + $0xd8] sm:$0xff] %v1193_v19 }
 0x21e   : > { %v1195_v20 = vpop.f32.mrf.mxu3 }
 0x21f   : > { %v1196_v21 = vadd.f32 %v1950_v53, %v1195_v20 }
 0x221   : > { %1233 = vst [vmem:[%s1955_s26 + $0xe0] sm:$0xff] %v1196_v21 }
 0x226   : > { %v1197_v22 = vpop.f32.mrf.mxu3 }
 0x227   : > { %v1198_v23 = vadd.f32 %v1950_v53, %v1197_v22 }
 0x229   : > { %1234 = vst [vmem:[%s1955_s26 + $0xe8] sm:$0xff] %v1198_v23 }
 0x22e   : > { %v1200_v24 = vpop.f32.mrf.mxu3 }
 0x22f   : > { %v1201_v25 = vadd.f32 %v1950_v53, %v1200_v24 }
 0x231   : > { %1235 = vst [vmem:[%s1955_s26 + $0xf0] sm:$0xff] %v1201_v25 }
 0x236   : > { %v1202_v26 = vpop.f32.mrf.mxu3 }
 0x237   : > { %v1203_v27 = vadd.f32 %v1950_v53, %v1202_v26 }
 0x239   : > { %1236 = vst [vmem:[%s1955_s26 + $0xf8] sm:$0xff] %v1203_v27 }
 0x23a PF: > { %s15_s18 = sadd.s32 1, %s1693_s18  }
 0x23b   : > { %p12_p4 = scmp.ge.s32.totalorder %s15_s18, 4  }
 0x23d   :  { %14 = sbr.rel (!%p12_p4) target bundleno = 1 (0x1), region = 70 }

</bundles_post_ra>
